<compile_context>
chip_gen: v6e
topology: v6e:2x2x1
jax: 0.10.0
libtpu: 0.0.40
codegen_flags: <defaults>
</compile_context>

<pallas_src>
import math

import jax
import jax.numpy as jnp
from jax.experimental import pallas as pl
from jax.experimental.pallas import tpu as pltpu

# ---- model hyper-parameters (consistent with the module __init__) ----------
ACTION_DIM = 4
CHUNK = 8                 # chunk_size
HIDDEN = 32               # hidden_dim
NHEAD = 4                 # transformer_nhead
HEAD_DIM = HIDDEN // NHEAD
FFN = 64                  # dim_feedforward
NUM_ENC = 2
NUM_DEC = 2
SRC_LEN = CHUNK + 1       # 8 action tokens + 1 time token
LN_EPS = 1e-5
HEAD_PAD = 128            # lane-padded head width (wrapper slices to ACTION_DIM)
LANES = 128


# ------------------------- packed parameter layout ---------------------------
def _build_layout():
    """Static layout of every parameter inside the single packed buffer."""
    D, F, T3 = HIDDEN, FFN, 3 * HIDDEN
    spec = [
        ("in_w", ACTION_DIM, D), ("in_b", 1, D),
        ("t1_w", D, 4 * D), ("t1_b", 1, 4 * D),
        ("t2_w", 4 * D, D), ("t2_b", 1, D),
        ("pos", SRC_LEN, D),
        ("head_w", D, HEAD_PAD), ("head_b", 1, HEAD_PAD),
    ]
    for l in range(NUM_ENC):
        spec += [
            (f"enc{l}_qkv_w", D, T3), (f"enc{l}_qkv_b", 1, T3),
            (f"enc{l}_o_w", D, D), (f"enc{l}_o_b", 1, D),
            (f"enc{l}_f1_w", D, F), (f"enc{l}_f1_b", 1, F),
            (f"enc{l}_f2_w", F, D), (f"enc{l}_f2_b", 1, D),
            (f"enc{l}_ln1_g", 1, D), (f"enc{l}_ln1_b", 1, D),
            (f"enc{l}_ln2_g", 1, D), (f"enc{l}_ln2_b", 1, D),
        ]
    for l in range(NUM_DEC):
        spec += [
            (f"dec{l}_qkv_w", D, T3), (f"dec{l}_qkv_b", 1, T3),
            (f"dec{l}_o_w", D, D), (f"dec{l}_o_b", 1, D),
            # cross-attention pre-folded: W_v @ W_o and b_v @ W_o + b_o
            (f"dec{l}_ca_w", D, D), (f"dec{l}_ca_b", 1, D),
            (f"dec{l}_f1_w", D, F), (f"dec{l}_f1_b", 1, F),
            (f"dec{l}_f2_w", F, D), (f"dec{l}_f2_b", 1, D),
            (f"dec{l}_ln1_g", 1, D), (f"dec{l}_ln1_b", 1, D),
            (f"dec{l}_ln2_g", 1, D), (f"dec{l}_ln2_b", 1, D),
            (f"dec{l}_ln3_g", 1, D), (f"dec{l}_ln3_b", 1, D),
        ]
    layout, row = {}, 0
    for name, r, c in spec:
        layout[name] = (row, r, c)
        row += -(-r // 16) * 16        # 16-sublane alignment (bf16-tile friendly)
    return layout, row


_LAYOUT, _TOTAL_ROWS = _build_layout()


# ------------------------------ fused kernel ---------------------------------
def _fused_forward_kernel(actions_ref, temb_ref, pf_ref, pb_ref, out_ref):
    D, H, DH = HIDDEN, NHEAD, HEAD_DIM

    def w16(name):                      # bf16 weight view (MXU operand)
        r0, nr, nc = _LAYOUT[name]
        return pb_ref[r0:r0 + nr, :nc]

    def f32(name):                      # f32 view (bias / LN / pos-embed)
        r0, nr, nc = _LAYOUT[name]
        return pf_ref[r0:r0 + nr, :nc]

    def mm(x, w):                       # bf16 operands, f32 accumulation
        return jnp.dot(x.astype(jnp.bfloat16), w,
                       preferred_element_type=jnp.float32)

    def layer_norm(x, g, b):            # residual add fused by the caller
        mu = jnp.mean(x, axis=-1, keepdims=True)
        var = jnp.mean(jnp.square(x - mu), axis=-1, keepdims=True)
        return (x - mu) * jax.lax.rsqrt(var + LN_EPS) * g + b

    def self_attn(x, prefix):
        # 1/sqrt(head_dim) is pre-folded into the Q slice of the packed weights.
        qkv = mm(x, w16(prefix + "_qkv_w")) + f32(prefix + "_qkv_b")   # (sq, 3D)
        # Head-batched operands (3H, sq, DH) via leading-dim stack of lane
        # slices (avoids lane-splitting reshapes).
        parts = jnp.stack([qkv[:, i * DH:(i + 1) * DH] for i in range(3 * H)],
                          axis=0)
        q = parts[:H].astype(jnp.bfloat16)
        k = parts[H:2 * H].astype(jnp.bfloat16)
        v = parts[2 * H:].astype(jnp.bfloat16)
        # One batched dot for QK^T (batch dim = heads).
        s = jax.lax.dot_general(q, k, (((2,), (2,)), ((0,), (0,))),
                                preferred_element_type=jnp.float32)    # (H,sq,sq)
        m = jnp.max(s, axis=-1, keepdims=True)
        p = jnp.exp(s - m)
        p = p * pl.reciprocal(jnp.sum(p, axis=-1, keepdims=True), approx=True)
        # One batched dot for PV.
        o = jax.lax.dot_general(p.astype(jnp.bfloat16), v,
                                (((2,), (1,)), ((0,), (0,))),
                                preferred_element_type=jnp.float32)    # (H,sq,DH)
        o = jnp.concatenate([o[h] for h in range(H)], axis=-1)         # (sq, D)
        return mm(o, w16(prefix + "_o_w")) + f32(prefix + "_o_b")

    # ---- embeddings / src construction (one batch element per grid step) ----
    act = mm(actions_ref[0], w16("in_w")) + f32("in_b")                # (CHUNK, D)
    t = mm(temb_ref[0], w16("t1_w")) + f32("t1_b")                     # (1, 4D)
    t = t * jnp.tanh(jax.nn.softplus(t))                               # Mish
    t = mm(t, w16("t2_w")) + f32("t2_b")                               # (1, D)

    src = jnp.concatenate([act, t], axis=0) + f32("pos")               # (S, D)
    tgt = src[:CHUNK]                                                  # (CHUNK, D)

    # ---- encoder (post-norm, gelu) ----
    x = src
    for l in range(NUM_ENC):
        a = self_attn(x, f"enc{l}")
        x = layer_norm(x + a, f32(f"enc{l}_ln1_g"), f32(f"enc{l}_ln1_b"))
        ff = jax.nn.gelu(mm(x, w16(f"enc{l}_f1_w")) + f32(f"enc{l}_f1_b"),
                         approximate=True)     # tanh GELU (EUP) per review
        ff = mm(ff, w16(f"enc{l}_f2_w")) + f32(f"enc{l}_f2_b")
        x = layer_norm(x + ff, f32(f"enc{l}_ln2_g"), f32(f"enc{l}_ln2_b"))

    mem = x[CHUNK:SRC_LEN]                                             # (1, D)

    # ---- decoder (post-norm, gelu) ----
    h = tgt
    for l in range(NUM_DEC):
        a = self_attn(h, f"dec{l}")
        h = layer_norm(h + a, f32(f"dec{l}_ln1_g"), f32(f"dec{l}_ln1_b"))
        # Cross-attention with a single key: softmax == 1 exactly, so the
        # attended output is mem @ (W_v @ W_o) + (b_v @ W_o + b_o), pre-folded.
        ca = mm(mem, w16(f"dec{l}_ca_w")) + f32(f"dec{l}_ca_b")        # (1, D)
        h = layer_norm(h + ca, f32(f"dec{l}_ln2_g"), f32(f"dec{l}_ln2_b"))
        ff = jax.nn.gelu(mm(h, w16(f"dec{l}_f1_w")) + f32(f"dec{l}_f1_b"),
                         approximate=True)
        ff = mm(ff, w16(f"dec{l}_f2_w")) + f32(f"dec{l}_f2_b")
        h = layer_norm(h + ff, f32(f"dec{l}_ln3_g"), f32(f"dec{l}_ln3_b"))

    # ---- action head: lane-padded 128-wide output -> one unmasked store ----
    out = mm(h, w16("head_w")) + f32("head_b")                         # (CHUNK, 128)
    out_ref[0] = out.astype(out_ref.dtype)


# ------------------------------ wrapper / model -------------------------------
def sinusoidal_pos_emb(t, dim):
    half = dim // 2
    freq = math.log(10000.0) / (half - 1)
    freq = jnp.exp(jnp.arange(half, dtype=jnp.float32) * -freq)
    emb = t.astype(jnp.float32)[:, None] * freq[None, :]
    return jnp.concatenate([jnp.sin(emb), jnp.cos(emb)], axis=-1)


@jax.jit
def forward(packed_f32, packed_bf16, actions, timestep):
    bs = actions.shape[0]
    # trivial scalar-driven time embedding stays in plain JAX (fused by XLA)
    t = jnp.broadcast_to(jnp.asarray(timestep, jnp.int32).reshape(-1), (bs,))
    temb = sinusoidal_pos_emb(t, HIDDEN).reshape(bs, 1, HIDDEN)
    actions = actions.astype(jnp.float32)

    out = pl.pallas_call(
        _fused_forward_kernel,
        out_shape=jax.ShapeDtypeStruct((bs, CHUNK, HEAD_PAD), jnp.float32),
        grid=(bs,),
        in_specs=[
            pl.BlockSpec((1, CHUNK, ACTION_DIM), lambda b: (b, 0, 0)),
            pl.BlockSpec((1, 1, HIDDEN), lambda b: (b, 0, 0)),
            pl.BlockSpec((_TOTAL_ROWS, LANES), lambda b: (0, 0)),
            pl.BlockSpec((_TOTAL_ROWS, LANES), lambda b: (0, 0)),
        ],
        out_specs=pl.BlockSpec((1, CHUNK, HEAD_PAD), lambda b: (b, 0, 0)),
        compiler_params=pltpu.CompilerParams(
            dimension_semantics=("parallel",)),   # v7x: split batch across TCs
    )(actions, temb, packed_f32, packed_bf16)
    return out[:, :, :ACTION_DIM]


# ---------------------------- parameters & packing -----------------------------
def init_params(key):
    keys = iter(jax.random.split(key, 64))

    def rnd(shape):
        return 0.02 * jax.random.normal(next(keys), shape, jnp.float32)

    p = {}
    p["in_w"], p["in_b"] = rnd((ACTION_DIM, HIDDEN)), rnd((HIDDEN,))
    p["t1_w"], p["t1_b"] = rnd((HIDDEN, 4 * HIDDEN)), rnd((4 * HIDDEN,))
    p["t2_w"], p["t2_b"] = rnd((4 * HIDDEN, HIDDEN)), rnd((HIDDEN,))
    p["pos"] = rnd((SRC_LEN, HIDDEN))
    p["head_w"], p["head_b"] = rnd((HIDDEN, ACTION_DIM)), rnd((ACTION_DIM,))
    for pre, n in (("enc", NUM_ENC), ("dec", NUM_DEC)):
        for l in range(n):
            k = f"{pre}{l}"
            p[f"{k}_qkv_w"], p[f"{k}_qkv_b"] = rnd((HIDDEN, 3 * HIDDEN)), rnd((3 * HIDDEN,))
            p[f"{k}_o_w"], p[f"{k}_o_b"] = rnd((HIDDEN, HIDDEN)), rnd((HIDDEN,))
            if pre == "dec":
                p[f"{k}_caqkv_w"], p[f"{k}_caqkv_b"] = rnd((HIDDEN, 3 * HIDDEN)), rnd((3 * HIDDEN,))
                p[f"{k}_cao_w"], p[f"{k}_cao_b"] = rnd((HIDDEN, HIDDEN)), rnd((HIDDEN,))
            p[f"{k}_f1_w"], p[f"{k}_f1_b"] = rnd((HIDDEN, FFN)), rnd((FFN,))
            p[f"{k}_f2_w"], p[f"{k}_f2_b"] = rnd((FFN, HIDDEN)), rnd((HIDDEN,))
            lns = ("ln1", "ln2") if pre == "enc" else ("ln1", "ln2", "ln3")
            for nm in lns:
                p[f"{k}_{nm}_g"] = jnp.ones((HIDDEN,), jnp.float32)
                p[f"{k}_{nm}_b"] = jnp.zeros((HIDDEN,), jnp.float32)
    return p


def pack_params(p):
    """Fold algebraic identities and pack everything into one (R, 128) buffer."""
    D = HIDDEN
    scale = 1.0 / math.sqrt(HEAD_DIM)
    vals = {}

    def put(name, arr):
        arr = jnp.asarray(arr, jnp.float32)
        if arr.ndim == 1:
            arr = arr[None, :]
        vals[name] = arr

    put("in_w", p["in_w"]); put("in_b", p["in_b"])
    put("t1_w", p["t1_w"]); put("t1_b", p["t1_b"])
    put("t2_w", p["t2_w"]); put("t2_b", p["t2_b"])
    put("pos", p["pos"])
    head_w = jnp.zeros((D, HEAD_PAD), jnp.float32).at[:, :ACTION_DIM].set(p["head_w"])
    head_b = jnp.zeros((HEAD_PAD,), jnp.float32).at[:ACTION_DIM].set(p["head_b"])
    put("head_w", head_w); put("head_b", head_b)

    for pre, n in (("enc", NUM_ENC), ("dec", NUM_DEC)):
        for l in range(n):
            k = f"{pre}{l}"
            # fold 1/sqrt(head_dim) into the Q slice of W_qkv / b_qkv
            put(f"{k}_qkv_w", p[f"{k}_qkv_w"].at[:, :D].multiply(scale))
            put(f"{k}_qkv_b", p[f"{k}_qkv_b"].at[:D].multiply(scale))
            put(f"{k}_o_w", p[f"{k}_o_w"]); put(f"{k}_o_b", p[f"{k}_o_b"])
            if pre == "dec":
                # 1-token cross-attention: output == V -> fold V and O projections
                w_v = p[f"{k}_caqkv_w"][:, 2 * D:]
                b_v = p[f"{k}_caqkv_b"][2 * D:]
                put(f"{k}_ca_w", w_v @ p[f"{k}_cao_w"])
                put(f"{k}_ca_b", b_v @ p[f"{k}_cao_w"] + p[f"{k}_cao_b"])
            put(f"{k}_f1_w", p[f"{k}_f1_w"]); put(f"{k}_f1_b", p[f"{k}_f1_b"])
            put(f"{k}_f2_w", p[f"{k}_f2_w"]); put(f"{k}_f2_b", p[f"{k}_f2_b"])
            lns = ("ln1", "ln2") if pre == "enc" else ("ln1", "ln2", "ln3")
            for nm in lns:
                put(f"{k}_{nm}_g", p[f"{k}_{nm}_g"])
                put(f"{k}_{nm}_b", p[f"{k}_{nm}_b"])

    buf = jnp.zeros((_TOTAL_ROWS, LANES), jnp.float32)
    for name, (row, r, c) in _LAYOUT.items():
        arr = vals[name]
        assert arr.shape == (r, c), (name, arr.shape, (r, c))
        buf = buf.at[row:row + r, :c].set(arr)
    return buf, buf.astype(jnp.bfloat16)


# ----------------------------------- main -------------------------------------
if __name__ == "__main__":
    key = jax.random.PRNGKey(0)
    pkey, akey = jax.random.split(key)

    params = init_params(pkey)
    packed_f32, packed_bf16 = pack_params(params)

    actions = jax.random.normal(akey, (2, CHUNK, ACTION_DIM), jnp.float32)
    timestep = jnp.asarray(5, dtype=jnp.int32)   # scalar diffusion timestep

    a_hat = forward(packed_f32, packed_bf16, actions, timestep)
    a_hat = jax.block_until_ready(a_hat)

    assert a_hat.shape == (2, CHUNK, ACTION_DIM), a_hat.shape
    assert a_hat.dtype == jnp.float32
    assert bool(jnp.all(jnp.isfinite(a_hat)))
    print("KERNEL_OK")
</pallas_src>

<mosaic_0001>
module attributes {stable_mosaic.version = 11 : i64} {
  func.func @_fused_forward_kernel(%arg0: i32, %arg1: memref<1x8x4xf32, #tpu.memory_space<vmem>>, %arg2: memref<1x1x32xf32, #tpu.memory_space<vmem>>, %arg3: memref<1600x128xf32, #tpu.memory_space<vmem>>, %arg4: memref<1600x128xbf16, #tpu.memory_space<vmem>>, %arg5: memref<1x8x128xf32, #tpu.memory_space<vmem>>) attributes {dimension_semantics = [#tpu.dimension_semantics<parallel>], iteration_bounds = array<i64: 2>, scalar_prefetch = 0 : i64, scratch_operands = 0 : i64, tpu.core_type = #tpu.core_type<tc>, window_params = [{transform_indices = @transform_0, window_bounds = array<i64: 1, 8, 4>}, {transform_indices = @transform_1, window_bounds = array<i64: 1, 1, 32>}, {pipeline_mode = #tpu.pipeline_mode<synchronous>, transform_indices = @transform_2, window_bounds = array<i64: 1600, 128>}, {pipeline_mode = #tpu.pipeline_mode<synchronous>, transform_indices = @transform_3, window_bounds = array<i64: 1600, 128>}, {transform_indices = @transform_4, window_bounds = array<i64: 1, 8, 128>}]} {
    %c0 = arith.constant 0 : index
    %c0_0 = arith.constant 0 : index
    %c0_1 = arith.constant 0 : index
    %0 = vector.load %arg1[%c0, %c0_0, %c0_1] : memref<1x8x4xf32, #tpu.memory_space<vmem>>, vector<1x8x4xf32>
    %1 = vector.shape_cast %0 : vector<1x8x4xf32> to vector<8x4xf32>
    %c0_2 = arith.constant 0 : index
    %c0_3 = arith.constant 0 : index
    %2 = vector.load %arg4[%c0_2, %c0_3] : memref<1600x128xbf16, #tpu.memory_space<vmem>>, vector<4x32xbf16>
    %3 = arith.truncf %1 : vector<8x4xf32> to vector<8x4xbf16>
    %cst = arith.constant dense<0.000000e+00> : vector<8x32xf32>
    %4 = tpu.matmul %3, %2, %cst {dimension_numbers = #tpu.dot_dimension_numbers<[1], [0], [0], [1], [0, 0, 1, 1], [], []>} : vector<8x4xbf16>, vector<4x32xbf16>, vector<8x32xf32> -> vector<8x32xf32>
    %c16 = arith.constant 16 : index
    %c0_4 = arith.constant 0 : index
    %5 = vector.load %arg3[%c16, %c0_4] : memref<1600x128xf32, #tpu.memory_space<vmem>>, vector<1x32xf32>
    %6 = vector.broadcast %5 : vector<1x32xf32> to vector<8x32xf32>
    %7 = arith.addf %4, %6 : vector<8x32xf32>
    %c0_5 = arith.constant 0 : index
    %c0_6 = arith.constant 0 : index
    %c0_7 = arith.constant 0 : index
    %8 = vector.load %arg2[%c0_5, %c0_6, %c0_7] : memref<1x1x32xf32, #tpu.memory_space<vmem>>, vector<1x1x32xf32>
    %9 = vector.shape_cast %8 : vector<1x1x32xf32> to vector<1x32xf32>
    %c32 = arith.constant 32 : index
    %c0_8 = arith.constant 0 : index
    %10 = vector.load %arg4[%c32, %c0_8] : memref<1600x128xbf16, #tpu.memory_space<vmem>>, vector<32x128xbf16>
    %11 = arith.truncf %9 : vector<1x32xf32> to vector<1x32xbf16>
    %cst_9 = arith.constant dense<0.000000e+00> : vector<1x128xf32>
    %12 = tpu.matmul %11, %10, %cst_9 {dimension_numbers = #tpu.dot_dimension_numbers<[1], [0], [0], [1], [0, 0, 1, 1], [], []>} : vector<1x32xbf16>, vector<32x128xbf16>, vector<1x128xf32> -> vector<1x128xf32>
    %c64 = arith.constant 64 : index
    %c0_10 = arith.constant 0 : index
    %13 = vector.load %arg3[%c64, %c0_10] : memref<1600x128xf32, #tpu.memory_space<vmem>>, vector<1x128xf32>
    %14 = arith.addf %12, %13 : vector<1x128xf32>
    %cst_11 = arith.constant 0.000000e+00 : f32
    %15 = vector.broadcast %cst_11 : f32 to vector<1x128xf32>
    %16 = arith.maximumf %14, %15 : vector<1x128xf32>
    %17 = vector.broadcast %cst_11 : f32 to vector<1x128xf32>
    %18 = arith.subf %14, %17 : vector<1x128xf32>
    %19 = arith.cmpf one, %18, %18 : vector<1x128xf32>
    %20 = vector.broadcast %cst_11 : f32 to vector<1x128xf32>
    %21 = arith.addf %14, %20 : vector<1x128xf32>
    %22 = math.absf %18 : vector<1x128xf32>
    %cst_12 = arith.constant 0.000000e+00 : f32
    %23 = vector.broadcast %cst_12 : f32 to vector<1x128xf32>
    %24 = arith.subf %23, %22 : vector<1x128xf32>
    %25 = math.exp %24 : vector<1x128xf32>
    %26 = math.log1p %25 : vector<1x128xf32>
    %27 = arith.addf %16, %26 : vector<1x128xf32>
    %28 = arith.select %19, %21, %27 : vector<1x128xi1>, vector<1x128xf32>
    %29 = math.tanh %28 : vector<1x128xf32>
    %30 = arith.mulf %14, %29 : vector<1x128xf32>
    %c80 = arith.constant 80 : index
    %c0_13 = arith.constant 0 : index
    %31 = vector.load %arg4[%c80, %c0_13] : memref<1600x128xbf16, #tpu.memory_space<vmem>>, vector<128x32xbf16>
    %32 = arith.truncf %30 : vector<1x128xf32> to vector<1x128xbf16>
    %cst_14 = arith.constant dense<0.000000e+00> : vector<1x32xf32>
    %33 = tpu.matmul %32, %31, %cst_14 {dimension_numbers = #tpu.dot_dimension_numbers<[1], [0], [0], [1], [0, 0, 1, 1], [], []>} : vector<1x128xbf16>, vector<128x32xbf16>, vector<1x32xf32> -> vector<1x32xf32>
    %c208 = arith.constant 208 : index
    %c0_15 = arith.constant 0 : index
    %34 = vector.load %arg3[%c208, %c0_15] : memref<1600x128xf32, #tpu.memory_space<vmem>>, vector<1x32xf32>
    %35 = arith.addf %33, %34 : vector<1x32xf32>
    %36 = tpu.concatenate %7, %35 in 0 : vector<8x32xf32>, vector<1x32xf32> -> vector<9x32xf32>
    %c224 = arith.constant 224 : index
    %c0_16 = arith.constant 0 : index
    %37 = vector.load %arg3[%c224, %c0_16] : memref<1600x128xf32, #tpu.memory_space<vmem>>, vector<9x32xf32>
    %38 = arith.addf %36, %37 : vector<9x32xf32>
    %39 = vector.extract_strided_slice %38 {offsets = [0, 0], sizes = [8, 32], strides = [1, 1]} : vector<9x32xf32> to vector<8x32xf32>
    %c288 = arith.constant 288 : index
    %c0_17 = arith.constant 0 : index
    %40 = vector.load %arg4[%c288, %c0_17] : memref<1600x128xbf16, #tpu.memory_space<vmem>>, vector<32x96xbf16>
    %41 = arith.truncf %38 : vector<9x32xf32> to vector<9x32xbf16>
    %cst_18 = arith.constant dense<0.000000e+00> : vector<9x96xf32>
    %42 = tpu.matmul %41, %40, %cst_18 {dimension_numbers = #tpu.dot_dimension_numbers<[1], [0], [0], [1], [0, 0, 1, 1], [], []>} : vector<9x32xbf16>, vector<32x96xbf16>, vector<9x96xf32> -> vector<9x96xf32>
    %c320 = arith.constant 320 : index
    %c0_19 = arith.constant 0 : index
    %43 = vector.load %arg3[%c320, %c0_19] : memref<1600x128xf32, #tpu.memory_space<vmem>>, vector<1x96xf32>
    %44 = vector.broadcast %43 : vector<1x96xf32> to vector<9x96xf32>
    %45 = arith.addf %42, %44 : vector<9x96xf32>
    %46 = vector.extract_strided_slice %45 {offsets = [0, 0], sizes = [9, 8], strides = [1, 1]} : vector<9x96xf32> to vector<9x8xf32>
    %47 = vector.extract_strided_slice %45 {offsets = [0, 8], sizes = [9, 8], strides = [1, 1]} : vector<9x96xf32> to vector<9x8xf32>
    %48 = vector.extract_strided_slice %45 {offsets = [0, 16], sizes = [9, 8], strides = [1, 1]} : vector<9x96xf32> to vector<9x8xf32>
    %49 = vector.extract_strided_slice %45 {offsets = [0, 24], sizes = [9, 8], strides = [1, 1]} : vector<9x96xf32> to vector<9x8xf32>
    %50 = vector.extract_strided_slice %45 {offsets = [0, 32], sizes = [9, 8], strides = [1, 1]} : vector<9x96xf32> to vector<9x8xf32>
    %51 = vector.extract_strided_slice %45 {offsets = [0, 40], sizes = [9, 8], strides = [1, 1]} : vector<9x96xf32> to vector<9x8xf32>
    %52 = vector.extract_strided_slice %45 {offsets = [0, 48], sizes = [9, 8], strides = [1, 1]} : vector<9x96xf32> to vector<9x8xf32>
    %53 = vector.extract_strided_slice %45 {offsets = [0, 56], sizes = [9, 8], strides = [1, 1]} : vector<9x96xf32> to vector<9x8xf32>
    %54 = vector.extract_strided_slice %45 {offsets = [0, 64], sizes = [9, 8], strides = [1, 1]} : vector<9x96xf32> to vector<9x8xf32>
    %55 = vector.extract_strided_slice %45 {offsets = [0, 72], sizes = [9, 8], strides = [1, 1]} : vector<9x96xf32> to vector<9x8xf32>
    %56 = vector.extract_strided_slice %45 {offsets = [0, 80], sizes = [9, 8], strides = [1, 1]} : vector<9x96xf32> to vector<9x8xf32>
    %57 = vector.extract_strided_slice %45 {offsets = [0, 88], sizes = [9, 8], strides = [1, 1]} : vector<9x96xf32> to vector<9x8xf32>
    %58 = vector.shape_cast %46 : vector<9x8xf32> to vector<1x9x8xf32>
    %59 = vector.shape_cast %47 : vector<9x8xf32> to vector<1x9x8xf32>
    %60 = vector.shape_cast %48 : vector<9x8xf32> to vector<1x9x8xf32>
    %61 = vector.shape_cast %49 : vector<9x8xf32> to vector<1x9x8xf32>
    %62 = vector.shape_cast %50 : vector<9x8xf32> to vector<1x9x8xf32>
    %63 = vector.shape_cast %51 : vector<9x8xf32> to vector<1x9x8xf32>
    %64 = vector.shape_cast %52 : vector<9x8xf32> to vector<1x9x8xf32>
    %65 = vector.shape_cast %53 : vector<9x8xf32> to vector<1x9x8xf32>
    %66 = vector.shape_cast %54 : vector<9x8xf32> to vector<1x9x8xf32>
    %67 = vector.shape_cast %55 : vector<9x8xf32> to vector<1x9x8xf32>
    %68 = vector.shape_cast %56 : vector<9x8xf32> to vector<1x9x8xf32>
    %69 = vector.shape_cast %57 : vector<9x8xf32> to vector<1x9x8xf32>
    %70 = tpu.concatenate %58, %59, %60, %61, %62, %63, %64, %65, %66, %67, %68, %69 in 0 : vector<1x9x8xf32>, vector<1x9x8xf32>, vector<1x9x8xf32>, vector<1x9x8xf32>, vector<1x9x8xf32>, vector<1x9x8xf32>, vector<1x9x8xf32>, vector<1x9x8xf32>, vector<1x9x8xf32>, vector<1x9x8xf32>, vector<1x9x8xf32>, vector<1x9x8xf32> -> vector<12x9x8xf32>
    %71 = vector.extract_strided_slice %70 {offsets = [0, 0, 0], sizes = [4, 9, 8], strides = [1, 1, 1]} : vector<12x9x8xf32> to vector<4x9x8xf32>
    %72 = arith.truncf %71 : vector<4x9x8xf32> to vector<4x9x8xbf16>
    %73 = vector.extract_strided_slice %70 {offsets = [4, 0, 0], sizes = [4, 9, 8], strides = [1, 1, 1]} : vector<12x9x8xf32> to vector<4x9x8xf32>
    %74 = arith.truncf %73 : vector<4x9x8xf32> to vector<4x9x8xbf16>
    %75 = vector.extract_strided_slice %70 {offsets = [8, 0, 0], sizes = [4, 9, 8], strides = [1, 1, 1]} : vector<12x9x8xf32> to vector<4x9x8xf32>
    %76 = arith.truncf %75 : vector<4x9x8xf32> to vector<4x9x8xbf16>
    %cst_20 = arith.constant dense<0.000000e+00> : vector<4x9x9xf32>
    %77 = tpu.matmul %72, %74, %cst_20 {dimension_numbers = #tpu.dot_dimension_numbers<[2], [2], [1], [1], [0, 0, 0, 1, 1, 1], [0], [0]>} : vector<4x9x8xbf16>, vector<4x9x8xbf16>, vector<4x9x9xf32> -> vector<4x9x9xf32>
    %cst_21 = arith.constant dense<0xFF800000> : vector<4x9xf32>
    %78 = vector.multi_reduction <maximumf>, %77, %cst_21 [2] : vector<4x9x9xf32> to vector<4x9xf32>
    %79 = vector.shape_cast %78 : vector<4x9xf32> to vector<4x9x1xf32>
    %80 = vector.broadcast %79 : vector<4x9x1xf32> to vector<4x9x9xf32>
    %81 = arith.subf %77, %80 : vector<4x9x9xf32>
    %82 = math.exp %81 : vector<4x9x9xf32>
    %cst_22 = arith.constant dense<0.000000e+00> : vector<4x9xf32>
    %83 = vector.multi_reduction <add>, %82, %cst_22 [2] : vector<4x9x9xf32> to vector<4x9xf32>
    %84 = vector.shape_cast %83 : vector<4x9xf32> to vector<4x9x1xf32>
    %85 = tpu.reciprocal %84 {approx = true} : vector<4x9x1xf32> -> vector<4x9x1xf32>
    %86 = vector.broadcast %85 : vector<4x9x1xf32> to vector<4x9x9xf32>
    %87 = arith.mulf %82, %86 : vector<4x9x9xf32>
    %88 = arith.truncf %87 : vector<4x9x9xf32> to vector<4x9x9xbf16>
    %cst_23 = arith.constant dense<0.000000e+00> : vector<4x9x8xf32>
    %89 = tpu.matmul %88, %76, %cst_23 {dimension_numbers = #tpu.dot_dimension_numbers<[2], [1], [1], [2], [0, 0, 0, 1, 1, 2], [0], [0]>} : vector<4x9x9xbf16>, vector<4x9x8xbf16>, vector<4x9x8xf32> -> vector<4x9x8xf32>
    %90 = vector.extract_strided_slice %89 {offsets = [0, 0, 0], sizes = [1, 9, 8], strides = [1, 1, 1]} : vector<4x9x8xf32> to vector<1x9x8xf32>
    %91 = vector.shape_cast %90 : vector<1x9x8xf32> to vector<9x8xf32>
    %92 = vector.extract_strided_slice %89 {offsets = [1, 0, 0], sizes = [1, 9, 8], strides = [1, 1, 1]} : vector<4x9x8xf32> to vector<1x9x8xf32>
    %93 = vector.shape_cast %92 : vector<1x9x8xf32> to vector<9x8xf32>
    %94 = vector.extract_strided_slice %89 {offsets = [2, 0, 0], sizes = [1, 9, 8], strides = [1, 1, 1]} : vector<4x9x8xf32> to vector<1x9x8xf32>
    %95 = vector.shape_cast %94 : vector<1x9x8xf32> to vector<9x8xf32>
    %96 = vector.extract_strided_slice %89 {offsets = [3, 0, 0], sizes = [1, 9, 8], strides = [1, 1, 1]} : vector<4x9x8xf32> to vector<1x9x8xf32>
    %97 = vector.shape_cast %96 : vector<1x9x8xf32> to vector<9x8xf32>
    %98 = tpu.concatenate %91, %93, %95, %97 in 1 : vector<9x8xf32>, vector<9x8xf32>, vector<9x8xf32>, vector<9x8xf32> -> vector<9x32xf32>
    %c336 = arith.constant 336 : index
    %c0_24 = arith.constant 0 : index
    %99 = vector.load %arg4[%c336, %c0_24] : memref<1600x128xbf16, #tpu.memory_space<vmem>>, vector<32x32xbf16>
    %100 = arith.truncf %98 : vector<9x32xf32> to vector<9x32xbf16>
    %cst_25 = arith.constant dense<0.000000e+00> : vector<9x32xf32>
    %101 = tpu.matmul %100, %99, %cst_25 {dimension_numbers = #tpu.dot_dimension_numbers<[1], [0], [0], [1], [0, 0, 1, 1], [], []>} : vector<9x32xbf16>, vector<32x32xbf16>, vector<9x32xf32> -> vector<9x32xf32>
    %c368 = arith.constant 368 : index
    %c0_26 = arith.constant 0 : index
    %102 = vector.load %arg3[%c368, %c0_26] : memref<1600x128xf32, #tpu.memory_space<vmem>>, vector<1x32xf32>
    %103 = vector.broadcast %102 : vector<1x32xf32> to vector<9x32xf32>
    %104 = arith.addf %101, %103 : vector<9x32xf32>
    %105 = arith.addf %38, %104 : vector<9x32xf32>
    %c512 = arith.constant 512 : index
    %c0_27 = arith.constant 0 : index
    %106 = vector.load %arg3[%c512, %c0_27] : memref<1600x128xf32, #tpu.memory_space<vmem>>, vector<1x32xf32>
    %c528 = arith.constant 528 : index
    %c0_28 = arith.constant 0 : index
    %107 = vector.load %arg3[%c528, %c0_28] : memref<1600x128xf32, #tpu.memory_space<vmem>>, vector<1x32xf32>
    %cst_29 = arith.constant dense<0.000000e+00> : vector<9xf32>
    %108 = vector.multi_reduction <add>, %105, %cst_29 [1] : vector<9x32xf32> to vector<9xf32>
    %109 = vector.shape_cast %108 : vector<9xf32> to vector<9x1xf32>
    %cst_30 = arith.constant 3.200000e+01 : f32
    %110 = vector.broadcast %cst_30 : f32 to vector<9x1xf32>
    %111 = arith.divf %109, %110 : vector<9x1xf32>
    %112 = vector.broadcast %111 : vector<9x1xf32> to vector<9x32xf32>
    %113 = arith.subf %105, %112 : vector<9x32xf32>
    %114 = arith.mulf %113, %113 : vector<9x32xf32>
    %cst_31 = arith.constant dense<0.000000e+00> : vector<9xf32>
    %115 = vector.multi_reduction <add>, %114, %cst_31 [1] : vector<9x32xf32> to vector<9xf32>
    %116 = vector.shape_cast %115 : vector<9xf32> to vector<9x1xf32>
    %cst_32 = arith.constant 3.200000e+01 : f32
    %117 = vector.broadcast %cst_32 : f32 to vector<9x1xf32>
    %118 = arith.divf %116, %117 : vector<9x1xf32>
    %119 = vector.broadcast %111 : vector<9x1xf32> to vector<9x32xf32>
    %120 = arith.subf %105, %119 : vector<9x32xf32>
    %cst_33 = arith.constant 9.99999974E-6 : f32
    %121 = vector.broadcast %cst_33 : f32 to vector<9x1xf32>
    %122 = arith.addf %118, %121 : vector<9x1xf32>
    %123 = math.rsqrt %122 : vector<9x1xf32>
    %124 = vector.broadcast %123 : vector<9x1xf32> to vector<9x32xf32>
    %125 = arith.mulf %120, %124 : vector<9x32xf32>
    %126 = vector.broadcast %106 : vector<1x32xf32> to vector<9x32xf32>
    %127 = arith.mulf %125, %126 : vector<9x32xf32>
    %128 = vector.broadcast %107 : vector<1x32xf32> to vector<9x32xf32>
    %129 = arith.addf %127, %128 : vector<9x32xf32>
    %c384 = arith.constant 384 : index
    %c0_34 = arith.constant 0 : index
    %130 = vector.load %arg4[%c384, %c0_34] : memref<1600x128xbf16, #tpu.memory_space<vmem>>, vector<32x64xbf16>
    %131 = arith.truncf %129 : vector<9x32xf32> to vector<9x32xbf16>
    %cst_35 = arith.constant dense<0.000000e+00> : vector<9x64xf32>
    %132 = tpu.matmul %131, %130, %cst_35 {dimension_numbers = #tpu.dot_dimension_numbers<[1], [0], [0], [1], [0, 0, 1, 1], [], []>} : vector<9x32xbf16>, vector<32x64xbf16>, vector<9x64xf32> -> vector<9x64xf32>
    %c416 = arith.constant 416 : index
    %c0_36 = arith.constant 0 : index
    %133 = vector.load %arg3[%c416, %c0_36] : memref<1600x128xf32, #tpu.memory_space<vmem>>, vector<1x64xf32>
    %134 = vector.broadcast %133 : vector<1x64xf32> to vector<9x64xf32>
    %135 = arith.addf %132, %134 : vector<9x64xf32>
    %136 = arith.mulf %135, %135 : vector<9x64xf32>
    %137 = arith.mulf %135, %136 : vector<9x64xf32>
    %cst_37 = arith.constant 4.471500e-02 : f32
    %138 = vector.broadcast %cst_37 : f32 to vector<9x64xf32>
    %139 = arith.mulf %138, %137 : vector<9x64xf32>
    %140 = arith.addf %135, %139 : vector<9x64xf32>
    %cst_38 = arith.constant 0.797884583 : f32
    %141 = vector.broadcast %cst_38 : f32 to vector<9x64xf32>
    %142 = arith.mulf %141, %140 : vector<9x64xf32>
    %143 = math.tanh %142 : vector<9x64xf32>
    %cst_39 = arith.constant 1.000000e+00 : f32
    %144 = vector.broadcast %cst_39 : f32 to vector<9x64xf32>
    %145 = arith.addf %144, %143 : vector<9x64xf32>
    %cst_40 = arith.constant 5.000000e-01 : f32
    %146 = vector.broadcast %cst_40 : f32 to vector<9x64xf32>
    %147 = arith.mulf %146, %145 : vector<9x64xf32>
    %148 = arith.mulf %135, %147 : vector<9x64xf32>
    %c432 = arith.constant 432 : index
    %c0_41 = arith.constant 0 : index
    %149 = vector.load %arg4[%c432, %c0_41] : memref<1600x128xbf16, #tpu.memory_space<vmem>>, vector<64x32xbf16>
    %150 = arith.truncf %148 : vector<9x64xf32> to vector<9x64xbf16>
    %cst_42 = arith.constant dense<0.000000e+00> : vector<9x32xf32>
    %151 = tpu.matmul %150, %149, %cst_42 {dimension_numbers = #tpu.dot_dimension_numbers<[1], [0], [0], [1], [0, 0, 1, 1], [], []>} : vector<9x64xbf16>, vector<64x32xbf16>, vector<9x32xf32> -> vector<9x32xf32>
    %c496 = arith.constant 496 : index
    %c0_43 = arith.constant 0 : index
    %152 = vector.load %arg3[%c496, %c0_43] : memref<1600x128xf32, #tpu.memory_space<vmem>>, vector<1x32xf32>
    %153 = vector.broadcast %152 : vector<1x32xf32> to vector<9x32xf32>
    %154 = arith.addf %151, %153 : vector<9x32xf32>
    %155 = arith.addf %129, %154 : vector<9x32xf32>
    %c544 = arith.constant 544 : index
    %c0_44 = arith.constant 0 : index
    %156 = vector.load %arg3[%c544, %c0_44] : memref<1600x128xf32, #tpu.memory_space<vmem>>, vector<1x32xf32>
    %c560 = arith.constant 560 : index
    %c0_45 = arith.constant 0 : index
    %157 = vector.load %arg3[%c560, %c0_45] : memref<1600x128xf32, #tpu.memory_space<vmem>>, vector<1x32xf32>
    %cst_46 = arith.constant dense<0.000000e+00> : vector<9xf32>
    %158 = vector.multi_reduction <add>, %155, %cst_46 [1] : vector<9x32xf32> to vector<9xf32>
    %159 = vector.shape_cast %158 : vector<9xf32> to vector<9x1xf32>
    %cst_47 = arith.constant 3.200000e+01 : f32
    %160 = vector.broadcast %cst_47 : f32 to vector<9x1xf32>
    %161 = arith.divf %159, %160 : vector<9x1xf32>
    %162 = vector.broadcast %161 : vector<9x1xf32> to vector<9x32xf32>
    %163 = arith.subf %155, %162 : vector<9x32xf32>
    %164 = arith.mulf %163, %163 : vector<9x32xf32>
    %cst_48 = arith.constant dense<0.000000e+00> : vector<9xf32>
    %165 = vector.multi_reduction <add>, %164, %cst_48 [1] : vector<9x32xf32> to vector<9xf32>
    %166 = vector.shape_cast %165 : vector<9xf32> to vector<9x1xf32>
    %cst_49 = arith.constant 3.200000e+01 : f32
    %167 = vector.broadcast %cst_49 : f32 to vector<9x1xf32>
    %168 = arith.divf %166, %167 : vector<9x1xf32>
    %169 = vector.broadcast %161 : vector<9x1xf32> to vector<9x32xf32>
    %170 = arith.subf %155, %169 : vector<9x32xf32>
    %cst_50 = arith.constant 9.99999974E-6 : f32
    %171 = vector.broadcast %cst_50 : f32 to vector<9x1xf32>
    %172 = arith.addf %168, %171 : vector<9x1xf32>
    %173 = math.rsqrt %172 : vector<9x1xf32>
    %174 = vector.broadcast %173 : vector<9x1xf32> to vector<9x32xf32>
    %175 = arith.mulf %170, %174 : vector<9x32xf32>
    %176 = vector.broadcast %156 : vector<1x32xf32> to vector<9x32xf32>
    %177 = arith.mulf %175, %176 : vector<9x32xf32>
    %178 = vector.broadcast %157 : vector<1x32xf32> to vector<9x32xf32>
    %179 = arith.addf %177, %178 : vector<9x32xf32>
    %c576 = arith.constant 576 : index
    %c0_51 = arith.constant 0 : index
    %180 = vector.load %arg4[%c576, %c0_51] : memref<1600x128xbf16, #tpu.memory_space<vmem>>, vector<32x96xbf16>
    %181 = arith.truncf %179 : vector<9x32xf32> to vector<9x32xbf16>
    %cst_52 = arith.constant dense<0.000000e+00> : vector<9x96xf32>
    %182 = tpu.matmul %181, %180, %cst_52 {dimension_numbers = #tpu.dot_dimension_numbers<[1], [0], [0], [1], [0, 0, 1, 1], [], []>} : vector<9x32xbf16>, vector<32x96xbf16>, vector<9x96xf32> -> vector<9x96xf32>
    %c608 = arith.constant 608 : index
    %c0_53 = arith.constant 0 : index
    %183 = vector.load %arg3[%c608, %c0_53] : memref<1600x128xf32, #tpu.memory_space<vmem>>, vector<1x96xf32>
    %184 = vector.broadcast %183 : vector<1x96xf32> to vector<9x96xf32>
    %185 = arith.addf %182, %184 : vector<9x96xf32>
    %186 = vector.extract_strided_slice %185 {offsets = [0, 0], sizes = [9, 8], strides = [1, 1]} : vector<9x96xf32> to vector<9x8xf32>
    %187 = vector.extract_strided_slice %185 {offsets = [0, 8], sizes = [9, 8], strides = [1, 1]} : vector<9x96xf32> to vector<9x8xf32>
    %188 = vector.extract_strided_slice %185 {offsets = [0, 16], sizes = [9, 8], strides = [1, 1]} : vector<9x96xf32> to vector<9x8xf32>
    %189 = vector.extract_strided_slice %185 {offsets = [0, 24], sizes = [9, 8], strides = [1, 1]} : vector<9x96xf32> to vector<9x8xf32>
    %190 = vector.extract_strided_slice %185 {offsets = [0, 32], sizes = [9, 8], strides = [1, 1]} : vector<9x96xf32> to vector<9x8xf32>
    %191 = vector.extract_strided_slice %185 {offsets = [0, 40], sizes = [9, 8], strides = [1, 1]} : vector<9x96xf32> to vector<9x8xf32>
    %192 = vector.extract_strided_slice %185 {offsets = [0, 48], sizes = [9, 8], strides = [1, 1]} : vector<9x96xf32> to vector<9x8xf32>
    %193 = vector.extract_strided_slice %185 {offsets = [0, 56], sizes = [9, 8], strides = [1, 1]} : vector<9x96xf32> to vector<9x8xf32>
    %194 = vector.extract_strided_slice %185 {offsets = [0, 64], sizes = [9, 8], strides = [1, 1]} : vector<9x96xf32> to vector<9x8xf32>
    %195 = vector.extract_strided_slice %185 {offsets = [0, 72], sizes = [9, 8], strides = [1, 1]} : vector<9x96xf32> to vector<9x8xf32>
    %196 = vector.extract_strided_slice %185 {offsets = [0, 80], sizes = [9, 8], strides = [1, 1]} : vector<9x96xf32> to vector<9x8xf32>
    %197 = vector.extract_strided_slice %185 {offsets = [0, 88], sizes = [9, 8], strides = [1, 1]} : vector<9x96xf32> to vector<9x8xf32>
    %198 = vector.shape_cast %186 : vector<9x8xf32> to vector<1x9x8xf32>
    %199 = vector.shape_cast %187 : vector<9x8xf32> to vector<1x9x8xf32>
    %200 = vector.shape_cast %188 : vector<9x8xf32> to vector<1x9x8xf32>
    %201 = vector.shape_cast %189 : vector<9x8xf32> to vector<1x9x8xf32>
    %202 = vector.shape_cast %190 : vector<9x8xf32> to vector<1x9x8xf32>
    %203 = vector.shape_cast %191 : vector<9x8xf32> to vector<1x9x8xf32>
    %204 = vector.shape_cast %192 : vector<9x8xf32> to vector<1x9x8xf32>
    %205 = vector.shape_cast %193 : vector<9x8xf32> to vector<1x9x8xf32>
    %206 = vector.shape_cast %194 : vector<9x8xf32> to vector<1x9x8xf32>
    %207 = vector.shape_cast %195 : vector<9x8xf32> to vector<1x9x8xf32>
    %208 = vector.shape_cast %196 : vector<9x8xf32> to vector<1x9x8xf32>
    %209 = vector.shape_cast %197 : vector<9x8xf32> to vector<1x9x8xf32>
    %210 = tpu.concatenate %198, %199, %200, %201, %202, %203, %204, %205, %206, %207, %208, %209 in 0 : vector<1x9x8xf32>, vector<1x9x8xf32>, vector<1x9x8xf32>, vector<1x9x8xf32>, vector<1x9x8xf32>, vector<1x9x8xf32>, vector<1x9x8xf32>, vector<1x9x8xf32>, vector<1x9x8xf32>, vector<1x9x8xf32>, vector<1x9x8xf32>, vector<1x9x8xf32> -> vector<12x9x8xf32>
    %211 = vector.extract_strided_slice %210 {offsets = [0, 0, 0], sizes = [4, 9, 8], strides = [1, 1, 1]} : vector<12x9x8xf32> to vector<4x9x8xf32>
    %212 = arith.truncf %211 : vector<4x9x8xf32> to vector<4x9x8xbf16>
    %213 = vector.extract_strided_slice %210 {offsets = [4, 0, 0], sizes = [4, 9, 8], strides = [1, 1, 1]} : vector<12x9x8xf32> to vector<4x9x8xf32>
    %214 = arith.truncf %213 : vector<4x9x8xf32> to vector<4x9x8xbf16>
    %215 = vector.extract_strided_slice %210 {offsets = [8, 0, 0], sizes = [4, 9, 8], strides = [1, 1, 1]} : vector<12x9x8xf32> to vector<4x9x8xf32>
    %216 = arith.truncf %215 : vector<4x9x8xf32> to vector<4x9x8xbf16>
    %cst_54 = arith.constant dense<0.000000e+00> : vector<4x9x9xf32>
    %217 = tpu.matmul %212, %214, %cst_54 {dimension_numbers = #tpu.dot_dimension_numbers<[2], [2], [1], [1], [0, 0, 0, 1, 1, 1], [0], [0]>} : vector<4x9x8xbf16>, vector<4x9x8xbf16>, vector<4x9x9xf32> -> vector<4x9x9xf32>
    %cst_55 = arith.constant dense<0xFF800000> : vector<4x9xf32>
    %218 = vector.multi_reduction <maximumf>, %217, %cst_55 [2] : vector<4x9x9xf32> to vector<4x9xf32>
    %219 = vector.shape_cast %218 : vector<4x9xf32> to vector<4x9x1xf32>
    %220 = vector.broadcast %219 : vector<4x9x1xf32> to vector<4x9x9xf32>
    %221 = arith.subf %217, %220 : vector<4x9x9xf32>
    %222 = math.exp %221 : vector<4x9x9xf32>
    %cst_56 = arith.constant dense<0.000000e+00> : vector<4x9xf32>
    %223 = vector.multi_reduction <add>, %222, %cst_56 [2] : vector<4x9x9xf32> to vector<4x9xf32>
    %224 = vector.shape_cast %223 : vector<4x9xf32> to vector<4x9x1xf32>
    %225 = tpu.reciprocal %224 {approx = true} : vector<4x9x1xf32> -> vector<4x9x1xf32>
    %226 = vector.broadcast %225 : vector<4x9x1xf32> to vector<4x9x9xf32>
    %227 = arith.mulf %222, %226 : vector<4x9x9xf32>
    %228 = arith.truncf %227 : vector<4x9x9xf32> to vector<4x9x9xbf16>
    %cst_57 = arith.constant dense<0.000000e+00> : vector<4x9x8xf32>
    %229 = tpu.matmul %228, %216, %cst_57 {dimension_numbers = #tpu.dot_dimension_numbers<[2], [1], [1], [2], [0, 0, 0, 1, 1, 2], [0], [0]>} : vector<4x9x9xbf16>, vector<4x9x8xbf16>, vector<4x9x8xf32> -> vector<4x9x8xf32>
    %230 = vector.extract_strided_slice %229 {offsets = [0, 0, 0], sizes = [1, 9, 8], strides = [1, 1, 1]} : vector<4x9x8xf32> to vector<1x9x8xf32>
    %231 = vector.shape_cast %230 : vector<1x9x8xf32> to vector<9x8xf32>
    %232 = vector.extract_strided_slice %229 {offsets = [1, 0, 0], sizes = [1, 9, 8], strides = [1, 1, 1]} : vector<4x9x8xf32> to vector<1x9x8xf32>
    %233 = vector.shape_cast %232 : vector<1x9x8xf32> to vector<9x8xf32>
    %234 = vector.extract_strided_slice %229 {offsets = [2, 0, 0], sizes = [1, 9, 8], strides = [1, 1, 1]} : vector<4x9x8xf32> to vector<1x9x8xf32>
    %235 = vector.shape_cast %234 : vector<1x9x8xf32> to vector<9x8xf32>
    %236 = vector.extract_strided_slice %229 {offsets = [3, 0, 0], sizes = [1, 9, 8], strides = [1, 1, 1]} : vector<4x9x8xf32> to vector<1x9x8xf32>
    %237 = vector.shape_cast %236 : vector<1x9x8xf32> to vector<9x8xf32>
    %238 = tpu.concatenate %231, %233, %235, %237 in 1 : vector<9x8xf32>, vector<9x8xf32>, vector<9x8xf32>, vector<9x8xf32> -> vector<9x32xf32>
    %c624 = arith.constant 624 : index
    %c0_58 = arith.constant 0 : index
    %239 = vector.load %arg4[%c624, %c0_58] : memref<1600x128xbf16, #tpu.memory_space<vmem>>, vector<32x32xbf16>
    %240 = arith.truncf %238 : vector<9x32xf32> to vector<9x32xbf16>
    %cst_59 = arith.constant dense<0.000000e+00> : vector<9x32xf32>
    %241 = tpu.matmul %240, %239, %cst_59 {dimension_numbers = #tpu.dot_dimension_numbers<[1], [0], [0], [1], [0, 0, 1, 1], [], []>} : vector<9x32xbf16>, vector<32x32xbf16>, vector<9x32xf32> -> vector<9x32xf32>
    %c656 = arith.constant 656 : index
    %c0_60 = arith.constant 0 : index
    %242 = vector.load %arg3[%c656, %c0_60] : memref<1600x128xf32, #tpu.memory_space<vmem>>, vector<1x32xf32>
    %243 = vector.broadcast %242 : vector<1x32xf32> to vector<9x32xf32>
    %244 = arith.addf %241, %243 : vector<9x32xf32>
    %245 = arith.addf %179, %244 : vector<9x32xf32>
    %c800 = arith.constant 800 : index
    %c0_61 = arith.constant 0 : index
    %246 = vector.load %arg3[%c800, %c0_61] : memref<1600x128xf32, #tpu.memory_space<vmem>>, vector<1x32xf32>
    %c816 = arith.constant 816 : index
    %c0_62 = arith.constant 0 : index
    %247 = vector.load %arg3[%c816, %c0_62] : memref<1600x128xf32, #tpu.memory_space<vmem>>, vector<1x32xf32>
    %cst_63 = arith.constant dense<0.000000e+00> : vector<9xf32>
    %248 = vector.multi_reduction <add>, %245, %cst_63 [1] : vector<9x32xf32> to vector<9xf32>
    %249 = vector.shape_cast %248 : vector<9xf32> to vector<9x1xf32>
    %cst_64 = arith.constant 3.200000e+01 : f32
    %250 = vector.broadcast %cst_64 : f32 to vector<9x1xf32>
    %251 = arith.divf %249, %250 : vector<9x1xf32>
    %252 = vector.broadcast %251 : vector<9x1xf32> to vector<9x32xf32>
    %253 = arith.subf %245, %252 : vector<9x32xf32>
    %254 = arith.mulf %253, %253 : vector<9x32xf32>
    %cst_65 = arith.constant dense<0.000000e+00> : vector<9xf32>
    %255 = vector.multi_reduction <add>, %254, %cst_65 [1] : vector<9x32xf32> to vector<9xf32>
    %256 = vector.shape_cast %255 : vector<9xf32> to vector<9x1xf32>
    %cst_66 = arith.constant 3.200000e+01 : f32
    %257 = vector.broadcast %cst_66 : f32 to vector<9x1xf32>
    %258 = arith.divf %256, %257 : vector<9x1xf32>
    %259 = vector.broadcast %251 : vector<9x1xf32> to vector<9x32xf32>
    %260 = arith.subf %245, %259 : vector<9x32xf32>
    %cst_67 = arith.constant 9.99999974E-6 : f32
    %261 = vector.broadcast %cst_67 : f32 to vector<9x1xf32>
    %262 = arith.addf %258, %261 : vector<9x1xf32>
    %263 = math.rsqrt %262 : vector<9x1xf32>
    %264 = vector.broadcast %263 : vector<9x1xf32> to vector<9x32xf32>
    %265 = arith.mulf %260, %264 : vector<9x32xf32>
    %266 = vector.broadcast %246 : vector<1x32xf32> to vector<9x32xf32>
    %267 = arith.mulf %265, %266 : vector<9x32xf32>
    %268 = vector.broadcast %247 : vector<1x32xf32> to vector<9x32xf32>
    %269 = arith.addf %267, %268 : vector<9x32xf32>
    %c672 = arith.constant 672 : index
    %c0_68 = arith.constant 0 : index
    %270 = vector.load %arg4[%c672, %c0_68] : memref<1600x128xbf16, #tpu.memory_space<vmem>>, vector<32x64xbf16>
    %271 = arith.truncf %269 : vector<9x32xf32> to vector<9x32xbf16>
    %cst_69 = arith.constant dense<0.000000e+00> : vector<9x64xf32>
    %272 = tpu.matmul %271, %270, %cst_69 {dimension_numbers = #tpu.dot_dimension_numbers<[1], [0], [0], [1], [0, 0, 1, 1], [], []>} : vector<9x32xbf16>, vector<32x64xbf16>, vector<9x64xf32> -> vector<9x64xf32>
    %c704 = arith.constant 704 : index
    %c0_70 = arith.constant 0 : index
    %273 = vector.load %arg3[%c704, %c0_70] : memref<1600x128xf32, #tpu.memory_space<vmem>>, vector<1x64xf32>
    %274 = vector.broadcast %273 : vector<1x64xf32> to vector<9x64xf32>
    %275 = arith.addf %272, %274 : vector<9x64xf32>
    %276 = arith.mulf %275, %275 : vector<9x64xf32>
    %277 = arith.mulf %275, %276 : vector<9x64xf32>
    %cst_71 = arith.constant 4.471500e-02 : f32
    %278 = vector.broadcast %cst_71 : f32 to vector<9x64xf32>
    %279 = arith.mulf %278, %277 : vector<9x64xf32>
    %280 = arith.addf %275, %279 : vector<9x64xf32>
    %cst_72 = arith.constant 0.797884583 : f32
    %281 = vector.broadcast %cst_72 : f32 to vector<9x64xf32>
    %282 = arith.mulf %281, %280 : vector<9x64xf32>
    %283 = math.tanh %282 : vector<9x64xf32>
    %cst_73 = arith.constant 1.000000e+00 : f32
    %284 = vector.broadcast %cst_73 : f32 to vector<9x64xf32>
    %285 = arith.addf %284, %283 : vector<9x64xf32>
    %cst_74 = arith.constant 5.000000e-01 : f32
    %286 = vector.broadcast %cst_74 : f32 to vector<9x64xf32>
    %287 = arith.mulf %286, %285 : vector<9x64xf32>
    %288 = arith.mulf %275, %287 : vector<9x64xf32>
    %c720 = arith.constant 720 : index
    %c0_75 = arith.constant 0 : index
    %289 = vector.load %arg4[%c720, %c0_75] : memref<1600x128xbf16, #tpu.memory_space<vmem>>, vector<64x32xbf16>
    %290 = arith.truncf %288 : vector<9x64xf32> to vector<9x64xbf16>
    %cst_76 = arith.constant dense<0.000000e+00> : vector<9x32xf32>
    %291 = tpu.matmul %290, %289, %cst_76 {dimension_numbers = #tpu.dot_dimension_numbers<[1], [0], [0], [1], [0, 0, 1, 1], [], []>} : vector<9x64xbf16>, vector<64x32xbf16>, vector<9x32xf32> -> vector<9x32xf32>
    %c784 = arith.constant 784 : index
    %c0_77 = arith.constant 0 : index
    %292 = vector.load %arg3[%c784, %c0_77] : memref<1600x128xf32, #tpu.memory_space<vmem>>, vector<1x32xf32>
    %293 = vector.broadcast %292 : vector<1x32xf32> to vector<9x32xf32>
    %294 = arith.addf %291, %293 : vector<9x32xf32>
    %295 = arith.addf %269, %294 : vector<9x32xf32>
    %c832 = arith.constant 832 : index
    %c0_78 = arith.constant 0 : index
    %296 = vector.load %arg3[%c832, %c0_78] : memref<1600x128xf32, #tpu.memory_space<vmem>>, vector<1x32xf32>
    %c848 = arith.constant 848 : index
    %c0_79 = arith.constant 0 : index
    %297 = vector.load %arg3[%c848, %c0_79] : memref<1600x128xf32, #tpu.memory_space<vmem>>, vector<1x32xf32>
    %cst_80 = arith.constant dense<0.000000e+00> : vector<9xf32>
    %298 = vector.multi_reduction <add>, %295, %cst_80 [1] : vector<9x32xf32> to vector<9xf32>
    %299 = vector.shape_cast %298 : vector<9xf32> to vector<9x1xf32>
    %cst_81 = arith.constant 3.200000e+01 : f32
    %300 = vector.broadcast %cst_81 : f32 to vector<9x1xf32>
    %301 = arith.divf %299, %300 : vector<9x1xf32>
    %302 = vector.broadcast %301 : vector<9x1xf32> to vector<9x32xf32>
    %303 = arith.subf %295, %302 : vector<9x32xf32>
    %304 = arith.mulf %303, %303 : vector<9x32xf32>
    %cst_82 = arith.constant dense<0.000000e+00> : vector<9xf32>
    %305 = vector.multi_reduction <add>, %304, %cst_82 [1] : vector<9x32xf32> to vector<9xf32>
    %306 = vector.shape_cast %305 : vector<9xf32> to vector<9x1xf32>
    %cst_83 = arith.constant 3.200000e+01 : f32
    %307 = vector.broadcast %cst_83 : f32 to vector<9x1xf32>
    %308 = arith.divf %306, %307 : vector<9x1xf32>
    %309 = vector.broadcast %301 : vector<9x1xf32> to vector<9x32xf32>
    %310 = arith.subf %295, %309 : vector<9x32xf32>
    %cst_84 = arith.constant 9.99999974E-6 : f32
    %311 = vector.broadcast %cst_84 : f32 to vector<9x1xf32>
    %312 = arith.addf %308, %311 : vector<9x1xf32>
    %313 = math.rsqrt %312 : vector<9x1xf32>
    %314 = vector.broadcast %313 : vector<9x1xf32> to vector<9x32xf32>
    %315 = arith.mulf %310, %314 : vector<9x32xf32>
    %316 = vector.broadcast %296 : vector<1x32xf32> to vector<9x32xf32>
    %317 = arith.mulf %315, %316 : vector<9x32xf32>
    %318 = vector.broadcast %297 : vector<1x32xf32> to vector<9x32xf32>
    %319 = arith.addf %317, %318 : vector<9x32xf32>
    %320 = vector.extract_strided_slice %319 {offsets = [8, 0], sizes = [1, 32], strides = [1, 1]} : vector<9x32xf32> to vector<1x32xf32>
    %c864 = arith.constant 864 : index
    %c0_85 = arith.constant 0 : index
    %321 = vector.load %arg4[%c864, %c0_85] : memref<1600x128xbf16, #tpu.memory_space<vmem>>, vector<32x96xbf16>
    %322 = arith.truncf %39 : vector<8x32xf32> to vector<8x32xbf16>
    %cst_86 = arith.constant dense<0.000000e+00> : vector<8x96xf32>
    %323 = tpu.matmul %322, %321, %cst_86 {dimension_numbers = #tpu.dot_dimension_numbers<[1], [0], [0], [1], [0, 0, 1, 1], [], []>} : vector<8x32xbf16>, vector<32x96xbf16>, vector<8x96xf32> -> vector<8x96xf32>
    %c896 = arith.constant 896 : index
    %c0_87 = arith.constant 0 : index
    %324 = vector.load %arg3[%c896, %c0_87] : memref<1600x128xf32, #tpu.memory_space<vmem>>, vector<1x96xf32>
    %325 = vector.broadcast %324 : vector<1x96xf32> to vector<8x96xf32>
    %326 = arith.addf %323, %325 : vector<8x96xf32>
    %327 = vector.extract_strided_slice %326 {offsets = [0, 0], sizes = [8, 8], strides = [1, 1]} : vector<8x96xf32> to vector<8x8xf32>
    %328 = vector.extract_strided_slice %326 {offsets = [0, 8], sizes = [8, 8], strides = [1, 1]} : vector<8x96xf32> to vector<8x8xf32>
    %329 = vector.extract_strided_slice %326 {offsets = [0, 16], sizes = [8, 8], strides = [1, 1]} : vector<8x96xf32> to vector<8x8xf32>
    %330 = vector.extract_strided_slice %326 {offsets = [0, 24], sizes = [8, 8], strides = [1, 1]} : vector<8x96xf32> to vector<8x8xf32>
    %331 = vector.extract_strided_slice %326 {offsets = [0, 32], sizes = [8, 8], strides = [1, 1]} : vector<8x96xf32> to vector<8x8xf32>
    %332 = vector.extract_strided_slice %326 {offsets = [0, 40], sizes = [8, 8], strides = [1, 1]} : vector<8x96xf32> to vector<8x8xf32>
    %333 = vector.extract_strided_slice %326 {offsets = [0, 48], sizes = [8, 8], strides = [1, 1]} : vector<8x96xf32> to vector<8x8xf32>
    %334 = vector.extract_strided_slice %326 {offsets = [0, 56], sizes = [8, 8], strides = [1, 1]} : vector<8x96xf32> to vector<8x8xf32>
    %335 = vector.extract_strided_slice %326 {offsets = [0, 64], sizes = [8, 8], strides = [1, 1]} : vector<8x96xf32> to vector<8x8xf32>
    %336 = vector.extract_strided_slice %326 {offsets = [0, 72], sizes = [8, 8], strides = [1, 1]} : vector<8x96xf32> to vector<8x8xf32>
    %337 = vector.extract_strided_slice %326 {offsets = [0, 80], sizes = [8, 8], strides = [1, 1]} : vector<8x96xf32> to vector<8x8xf32>
    %338 = vector.extract_strided_slice %326 {offsets = [0, 88], sizes = [8, 8], strides = [1, 1]} : vector<8x96xf32> to vector<8x8xf32>
    %339 = vector.shape_cast %327 : vector<8x8xf32> to vector<1x8x8xf32>
    %340 = vector.shape_cast %328 : vector<8x8xf32> to vector<1x8x8xf32>
    %341 = vector.shape_cast %329 : vector<8x8xf32> to vector<1x8x8xf32>
    %342 = vector.shape_cast %330 : vector<8x8xf32> to vector<1x8x8xf32>
    %343 = vector.shape_cast %331 : vector<8x8xf32> to vector<1x8x8xf32>
    %344 = vector.shape_cast %332 : vector<8x8xf32> to vector<1x8x8xf32>
    %345 = vector.shape_cast %333 : vector<8x8xf32> to vector<1x8x8xf32>
    %346 = vector.shape_cast %334 : vector<8x8xf32> to vector<1x8x8xf32>
    %347 = vector.shape_cast %335 : vector<8x8xf32> to vector<1x8x8xf32>
    %348 = vector.shape_cast %336 : vector<8x8xf32> to vector<1x8x8xf32>
    %349 = vector.shape_cast %337 : vector<8x8xf32> to vector<1x8x8xf32>
    %350 = vector.shape_cast %338 : vector<8x8xf32> to vector<1x8x8xf32>
    %351 = tpu.concatenate %339, %340, %341, %342, %343, %344, %345, %346, %347, %348, %349, %350 in 0 : vector<1x8x8xf32>, vector<1x8x8xf32>, vector<1x8x8xf32>, vector<1x8x8xf32>, vector<1x8x8xf32>, vector<1x8x8xf32>, vector<1x8x8xf32>, vector<1x8x8xf32>, vector<1x8x8xf32>, vector<1x8x8xf32>, vector<1x8x8xf32>, vector<1x8x8xf32> -> vector<12x8x8xf32>
    %352 = vector.extract_strided_slice %351 {offsets = [0, 0, 0], sizes = [4, 8, 8], strides = [1, 1, 1]} : vector<12x8x8xf32> to vector<4x8x8xf32>
    %353 = arith.truncf %352 : vector<4x8x8xf32> to vector<4x8x8xbf16>
    %354 = vector.extract_strided_slice %351 {offsets = [4, 0, 0], sizes = [4, 8, 8], strides = [1, 1, 1]} : vector<12x8x8xf32> to vector<4x8x8xf32>
    %355 = arith.truncf %354 : vector<4x8x8xf32> to vector<4x8x8xbf16>
    %356 = vector.extract_strided_slice %351 {offsets = [8, 0, 0], sizes = [4, 8, 8], strides = [1, 1, 1]} : vector<12x8x8xf32> to vector<4x8x8xf32>
    %357 = arith.truncf %356 : vector<4x8x8xf32> to vector<4x8x8xbf16>
    %cst_88 = arith.constant dense<0.000000e+00> : vector<4x8x8xf32>
    %358 = tpu.matmul %353, %355, %cst_88 {dimension_numbers = #tpu.dot_dimension_numbers<[2], [2], [1], [1], [0, 0, 0, 1, 1, 1], [0], [0]>} : vector<4x8x8xbf16>, vector<4x8x8xbf16>, vector<4x8x8xf32> -> vector<4x8x8xf32>
    %cst_89 = arith.constant dense<0xFF800000> : vector<4x8xf32>
    %359 = vector.multi_reduction <maximumf>, %358, %cst_89 [2] : vector<4x8x8xf32> to vector<4x8xf32>
    %360 = vector.shape_cast %359 : vector<4x8xf32> to vector<4x8x1xf32>
    %361 = vector.broadcast %360 : vector<4x8x1xf32> to vector<4x8x8xf32>
    %362 = arith.subf %358, %361 : vector<4x8x8xf32>
    %363 = math.exp %362 : vector<4x8x8xf32>
    %cst_90 = arith.constant dense<0.000000e+00> : vector<4x8xf32>
    %364 = vector.multi_reduction <add>, %363, %cst_90 [2] : vector<4x8x8xf32> to vector<4x8xf32>
    %365 = vector.shape_cast %364 : vector<4x8xf32> to vector<4x8x1xf32>
    %366 = tpu.reciprocal %365 {approx = true} : vector<4x8x1xf32> -> vector<4x8x1xf32>
    %367 = vector.broadcast %366 : vector<4x8x1xf32> to vector<4x8x8xf32>
    %368 = arith.mulf %363, %367 : vector<4x8x8xf32>
    %369 = arith.truncf %368 : vector<4x8x8xf32> to vector<4x8x8xbf16>
    %cst_91 = arith.constant dense<0.000000e+00> : vector<4x8x8xf32>
    %370 = tpu.matmul %369, %357, %cst_91 {dimension_numbers = #tpu.dot_dimension_numbers<[2], [1], [1], [2], [0, 0, 0, 1, 1, 2], [0], [0]>} : vector<4x8x8xbf16>, vector<4x8x8xbf16>, vector<4x8x8xf32> -> vector<4x8x8xf32>
    %371 = vector.extract_strided_slice %370 {offsets = [0, 0, 0], sizes = [1, 8, 8], strides = [1, 1, 1]} : vector<4x8x8xf32> to vector<1x8x8xf32>
    %372 = vector.shape_cast %371 : vector<1x8x8xf32> to vector<8x8xf32>
    %373 = vector.extract_strided_slice %370 {offsets = [1, 0, 0], sizes = [1, 8, 8], strides = [1, 1, 1]} : vector<4x8x8xf32> to vector<1x8x8xf32>
    %374 = vector.shape_cast %373 : vector<1x8x8xf32> to vector<8x8xf32>
    %375 = vector.extract_strided_slice %370 {offsets = [2, 0, 0], sizes = [1, 8, 8], strides = [1, 1, 1]} : vector<4x8x8xf32> to vector<1x8x8xf32>
    %376 = vector.shape_cast %375 : vector<1x8x8xf32> to vector<8x8xf32>
    %377 = vector.extract_strided_slice %370 {offsets = [3, 0, 0], sizes = [1, 8, 8], strides = [1, 1, 1]} : vector<4x8x8xf32> to vector<1x8x8xf32>
    %378 = vector.shape_cast %377 : vector<1x8x8xf32> to vector<8x8xf32>
    %379 = tpu.concatenate %372, %374, %376, %378 in 1 : vector<8x8xf32>, vector<8x8xf32>, vector<8x8xf32>, vector<8x8xf32> -> vector<8x32xf32>
    %c912 = arith.constant 912 : index
    %c0_92 = arith.constant 0 : index
    %380 = vector.load %arg4[%c912, %c0_92] : memref<1600x128xbf16, #tpu.memory_space<vmem>>, vector<32x32xbf16>
    %381 = arith.truncf %379 : vector<8x32xf32> to vector<8x32xbf16>
    %cst_93 = arith.constant dense<0.000000e+00> : vector<8x32xf32>
    %382 = tpu.matmul %381, %380, %cst_93 {dimension_numbers = #tpu.dot_dimension_numbers<[1], [0], [0], [1], [0, 0, 1, 1], [], []>} : vector<8x32xbf16>, vector<32x32xbf16>, vector<8x32xf32> -> vector<8x32xf32>
    %c944 = arith.constant 944 : index
    %c0_94 = arith.constant 0 : index
    %383 = vector.load %arg3[%c944, %c0_94] : memref<1600x128xf32, #tpu.memory_space<vmem>>, vector<1x32xf32>
    %384 = vector.broadcast %383 : vector<1x32xf32> to vector<8x32xf32>
    %385 = arith.addf %382, %384 : vector<8x32xf32>
    %386 = arith.addf %39, %385 : vector<8x32xf32>
    %c1136 = arith.constant 1136 : index
    %c0_95 = arith.constant 0 : index
    %387 = vector.load %arg3[%c1136, %c0_95] : memref<1600x128xf32, #tpu.memory_space<vmem>>, vector<1x32xf32>
    %c1152 = arith.constant 1152 : index
    %c0_96 = arith.constant 0 : index
    %388 = vector.load %arg3[%c1152, %c0_96] : memref<1600x128xf32, #tpu.memory_space<vmem>>, vector<1x32xf32>
    %cst_97 = arith.constant dense<0.000000e+00> : vector<8xf32>
    %389 = vector.multi_reduction <add>, %386, %cst_97 [1] : vector<8x32xf32> to vector<8xf32>
    %390 = vector.shape_cast %389 : vector<8xf32> to vector<8x1xf32>
    %cst_98 = arith.constant 3.200000e+01 : f32
    %391 = vector.broadcast %cst_98 : f32 to vector<8x1xf32>
    %392 = arith.divf %390, %391 : vector<8x1xf32>
    %393 = vector.broadcast %392 : vector<8x1xf32> to vector<8x32xf32>
    %394 = arith.subf %386, %393 : vector<8x32xf32>
    %395 = arith.mulf %394, %394 : vector<8x32xf32>
    %cst_99 = arith.constant dense<0.000000e+00> : vector<8xf32>
    %396 = vector.multi_reduction <add>, %395, %cst_99 [1] : vector<8x32xf32> to vector<8xf32>
    %397 = vector.shape_cast %396 : vector<8xf32> to vector<8x1xf32>
    %cst_100 = arith.constant 3.200000e+01 : f32
    %398 = vector.broadcast %cst_100 : f32 to vector<8x1xf32>
    %399 = arith.divf %397, %398 : vector<8x1xf32>
    %400 = vector.broadcast %392 : vector<8x1xf32> to vector<8x32xf32>
    %401 = arith.subf %386, %400 : vector<8x32xf32>
    %cst_101 = arith.constant 9.99999974E-6 : f32
    %402 = vector.broadcast %cst_101 : f32 to vector<8x1xf32>
    %403 = arith.addf %399, %402 : vector<8x1xf32>
    %404 = math.rsqrt %403 : vector<8x1xf32>
    %405 = vector.broadcast %404 : vector<8x1xf32> to vector<8x32xf32>
    %406 = arith.mulf %401, %405 : vector<8x32xf32>
    %407 = vector.broadcast %387 : vector<1x32xf32> to vector<8x32xf32>
    %408 = arith.mulf %406, %407 : vector<8x32xf32>
    %409 = vector.broadcast %388 : vector<1x32xf32> to vector<8x32xf32>
    %410 = arith.addf %408, %409 : vector<8x32xf32>
    %c960 = arith.constant 960 : index
    %c0_102 = arith.constant 0 : index
    %411 = vector.load %arg4[%c960, %c0_102] : memref<1600x128xbf16, #tpu.memory_space<vmem>>, vector<32x32xbf16>
    %412 = arith.truncf %320 : vector<1x32xf32> to vector<1x32xbf16>
    %cst_103 = arith.constant dense<0.000000e+00> : vector<1x32xf32>
    %413 = tpu.matmul %412, %411, %cst_103 {dimension_numbers = #tpu.dot_dimension_numbers<[1], [0], [0], [1], [0, 0, 1, 1], [], []>} : vector<1x32xbf16>, vector<32x32xbf16>, vector<1x32xf32> -> vector<1x32xf32>
    %c992 = arith.constant 992 : index
    %c0_104 = arith.constant 0 : index
    %414 = vector.load %arg3[%c992, %c0_104] : memref<1600x128xf32, #tpu.memory_space<vmem>>, vector<1x32xf32>
    %415 = arith.addf %413, %414 : vector<1x32xf32>
    %416 = vector.broadcast %415 : vector<1x32xf32> to vector<8x32xf32>
    %417 = arith.addf %410, %416 : vector<8x32xf32>
    %c1168 = arith.constant 1168 : index
    %c0_105 = arith.constant 0 : index
    %418 = vector.load %arg3[%c1168, %c0_105] : memref<1600x128xf32, #tpu.memory_space<vmem>>, vector<1x32xf32>
    %c1184 = arith.constant 1184 : index
    %c0_106 = arith.constant 0 : index
    %419 = vector.load %arg3[%c1184, %c0_106] : memref<1600x128xf32, #tpu.memory_space<vmem>>, vector<1x32xf32>
    %cst_107 = arith.constant dense<0.000000e+00> : vector<8xf32>
    %420 = vector.multi_reduction <add>, %417, %cst_107 [1] : vector<8x32xf32> to vector<8xf32>
    %421 = vector.shape_cast %420 : vector<8xf32> to vector<8x1xf32>
    %cst_108 = arith.constant 3.200000e+01 : f32
    %422 = vector.broadcast %cst_108 : f32 to vector<8x1xf32>
    %423 = arith.divf %421, %422 : vector<8x1xf32>
    %424 = vector.broadcast %423 : vector<8x1xf32> to vector<8x32xf32>
    %425 = arith.subf %417, %424 : vector<8x32xf32>
    %426 = arith.mulf %425, %425 : vector<8x32xf32>
    %cst_109 = arith.constant dense<0.000000e+00> : vector<8xf32>
    %427 = vector.multi_reduction <add>, %426, %cst_109 [1] : vector<8x32xf32> to vector<8xf32>
    %428 = vector.shape_cast %427 : vector<8xf32> to vector<8x1xf32>
    %cst_110 = arith.constant 3.200000e+01 : f32
    %429 = vector.broadcast %cst_110 : f32 to vector<8x1xf32>
    %430 = arith.divf %428, %429 : vector<8x1xf32>
    %431 = vector.broadcast %423 : vector<8x1xf32> to vector<8x32xf32>
    %432 = arith.subf %417, %431 : vector<8x32xf32>
    %cst_111 = arith.constant 9.99999974E-6 : f32
    %433 = vector.broadcast %cst_111 : f32 to vector<8x1xf32>
    %434 = arith.addf %430, %433 : vector<8x1xf32>
    %435 = math.rsqrt %434 : vector<8x1xf32>
    %436 = vector.broadcast %435 : vector<8x1xf32> to vector<8x32xf32>
    %437 = arith.mulf %432, %436 : vector<8x32xf32>
    %438 = vector.broadcast %418 : vector<1x32xf32> to vector<8x32xf32>
    %439 = arith.mulf %437, %438 : vector<8x32xf32>
    %440 = vector.broadcast %419 : vector<1x32xf32> to vector<8x32xf32>
    %441 = arith.addf %439, %440 : vector<8x32xf32>
    %c1008 = arith.constant 1008 : index
    %c0_112 = arith.constant 0 : index
    %442 = vector.load %arg4[%c1008, %c0_112] : memref<1600x128xbf16, #tpu.memory_space<vmem>>, vector<32x64xbf16>
    %443 = arith.truncf %441 : vector<8x32xf32> to vector<8x32xbf16>
    %cst_113 = arith.constant dense<0.000000e+00> : vector<8x64xf32>
    %444 = tpu.matmul %443, %442, %cst_113 {dimension_numbers = #tpu.dot_dimension_numbers<[1], [0], [0], [1], [0, 0, 1, 1], [], []>} : vector<8x32xbf16>, vector<32x64xbf16>, vector<8x64xf32> -> vector<8x64xf32>
    %c1040 = arith.constant 1040 : index
    %c0_114 = arith.constant 0 : index
    %445 = vector.load %arg3[%c1040, %c0_114] : memref<1600x128xf32, #tpu.memory_space<vmem>>, vector<1x64xf32>
    %446 = vector.broadcast %445 : vector<1x64xf32> to vector<8x64xf32>
    %447 = arith.addf %444, %446 : vector<8x64xf32>
    %448 = arith.mulf %447, %447 : vector<8x64xf32>
    %449 = arith.mulf %447, %448 : vector<8x64xf32>
    %cst_115 = arith.constant 4.471500e-02 : f32
    %450 = vector.broadcast %cst_115 : f32 to vector<8x64xf32>
    %451 = arith.mulf %450, %449 : vector<8x64xf32>
    %452 = arith.addf %447, %451 : vector<8x64xf32>
    %cst_116 = arith.constant 0.797884583 : f32
    %453 = vector.broadcast %cst_116 : f32 to vector<8x64xf32>
    %454 = arith.mulf %453, %452 : vector<8x64xf32>
    %455 = math.tanh %454 : vector<8x64xf32>
    %cst_117 = arith.constant 1.000000e+00 : f32
    %456 = vector.broadcast %cst_117 : f32 to vector<8x64xf32>
    %457 = arith.addf %456, %455 : vector<8x64xf32>
    %cst_118 = arith.constant 5.000000e-01 : f32
    %458 = vector.broadcast %cst_118 : f32 to vector<8x64xf32>
    %459 = arith.mulf %458, %457 : vector<8x64xf32>
    %460 = arith.mulf %447, %459 : vector<8x64xf32>
    %c1056 = arith.constant 1056 : index
    %c0_119 = arith.constant 0 : index
    %461 = vector.load %arg4[%c1056, %c0_119] : memref<1600x128xbf16, #tpu.memory_space<vmem>>, vector<64x32xbf16>
    %462 = arith.truncf %460 : vector<8x64xf32> to vector<8x64xbf16>
    %cst_120 = arith.constant dense<0.000000e+00> : vector<8x32xf32>
    %463 = tpu.matmul %462, %461, %cst_120 {dimension_numbers = #tpu.dot_dimension_numbers<[1], [0], [0], [1], [0, 0, 1, 1], [], []>} : vector<8x64xbf16>, vector<64x32xbf16>, vector<8x32xf32> -> vector<8x32xf32>
    %c1120 = arith.constant 1120 : index
    %c0_121 = arith.constant 0 : index
    %464 = vector.load %arg3[%c1120, %c0_121] : memref<1600x128xf32, #tpu.memory_space<vmem>>, vector<1x32xf32>
    %465 = vector.broadcast %464 : vector<1x32xf32> to vector<8x32xf32>
    %466 = arith.addf %463, %465 : vector<8x32xf32>
    %467 = arith.addf %441, %466 : vector<8x32xf32>
    %c1200 = arith.constant 1200 : index
    %c0_122 = arith.constant 0 : index
    %468 = vector.load %arg3[%c1200, %c0_122] : memref<1600x128xf32, #tpu.memory_space<vmem>>, vector<1x32xf32>
    %c1216 = arith.constant 1216 : index
    %c0_123 = arith.constant 0 : index
    %469 = vector.load %arg3[%c1216, %c0_123] : memref<1600x128xf32, #tpu.memory_space<vmem>>, vector<1x32xf32>
    %cst_124 = arith.constant dense<0.000000e+00> : vector<8xf32>
    %470 = vector.multi_reduction <add>, %467, %cst_124 [1] : vector<8x32xf32> to vector<8xf32>
    %471 = vector.shape_cast %470 : vector<8xf32> to vector<8x1xf32>
    %cst_125 = arith.constant 3.200000e+01 : f32
    %472 = vector.broadcast %cst_125 : f32 to vector<8x1xf32>
    %473 = arith.divf %471, %472 : vector<8x1xf32>
    %474 = vector.broadcast %473 : vector<8x1xf32> to vector<8x32xf32>
    %475 = arith.subf %467, %474 : vector<8x32xf32>
    %476 = arith.mulf %475, %475 : vector<8x32xf32>
    %cst_126 = arith.constant dense<0.000000e+00> : vector<8xf32>
    %477 = vector.multi_reduction <add>, %476, %cst_126 [1] : vector<8x32xf32> to vector<8xf32>
    %478 = vector.shape_cast %477 : vector<8xf32> to vector<8x1xf32>
    %cst_127 = arith.constant 3.200000e+01 : f32
    %479 = vector.broadcast %cst_127 : f32 to vector<8x1xf32>
    %480 = arith.divf %478, %479 : vector<8x1xf32>
    %481 = vector.broadcast %473 : vector<8x1xf32> to vector<8x32xf32>
    %482 = arith.subf %467, %481 : vector<8x32xf32>
    %cst_128 = arith.constant 9.99999974E-6 : f32
    %483 = vector.broadcast %cst_128 : f32 to vector<8x1xf32>
    %484 = arith.addf %480, %483 : vector<8x1xf32>
    %485 = math.rsqrt %484 : vector<8x1xf32>
    %486 = vector.broadcast %485 : vector<8x1xf32> to vector<8x32xf32>
    %487 = arith.mulf %482, %486 : vector<8x32xf32>
    %488 = vector.broadcast %468 : vector<1x32xf32> to vector<8x32xf32>
    %489 = arith.mulf %487, %488 : vector<8x32xf32>
    %490 = vector.broadcast %469 : vector<1x32xf32> to vector<8x32xf32>
    %491 = arith.addf %489, %490 : vector<8x32xf32>
    %c1232 = arith.constant 1232 : index
    %c0_129 = arith.constant 0 : index
    %492 = vector.load %arg4[%c1232, %c0_129] : memref<1600x128xbf16, #tpu.memory_space<vmem>>, vector<32x96xbf16>
    %493 = arith.truncf %491 : vector<8x32xf32> to vector<8x32xbf16>
    %cst_130 = arith.constant dense<0.000000e+00> : vector<8x96xf32>
    %494 = tpu.matmul %493, %492, %cst_130 {dimension_numbers = #tpu.dot_dimension_numbers<[1], [0], [0], [1], [0, 0, 1, 1], [], []>} : vector<8x32xbf16>, vector<32x96xbf16>, vector<8x96xf32> -> vector<8x96xf32>
    %c1264 = arith.constant 1264 : index
    %c0_131 = arith.constant 0 : index
    %495 = vector.load %arg3[%c1264, %c0_131] : memref<1600x128xf32, #tpu.memory_space<vmem>>, vector<1x96xf32>
    %496 = vector.broadcast %495 : vector<1x96xf32> to vector<8x96xf32>
    %497 = arith.addf %494, %496 : vector<8x96xf32>
    %498 = vector.extract_strided_slice %497 {offsets = [0, 0], sizes = [8, 8], strides = [1, 1]} : vector<8x96xf32> to vector<8x8xf32>
    %499 = vector.extract_strided_slice %497 {offsets = [0, 8], sizes = [8, 8], strides = [1, 1]} : vector<8x96xf32> to vector<8x8xf32>
    %500 = vector.extract_strided_slice %497 {offsets = [0, 16], sizes = [8, 8], strides = [1, 1]} : vector<8x96xf32> to vector<8x8xf32>
    %501 = vector.extract_strided_slice %497 {offsets = [0, 24], sizes = [8, 8], strides = [1, 1]} : vector<8x96xf32> to vector<8x8xf32>
    %502 = vector.extract_strided_slice %497 {offsets = [0, 32], sizes = [8, 8], strides = [1, 1]} : vector<8x96xf32> to vector<8x8xf32>
    %503 = vector.extract_strided_slice %497 {offsets = [0, 40], sizes = [8, 8], strides = [1, 1]} : vector<8x96xf32> to vector<8x8xf32>
    %504 = vector.extract_strided_slice %497 {offsets = [0, 48], sizes = [8, 8], strides = [1, 1]} : vector<8x96xf32> to vector<8x8xf32>
    %505 = vector.extract_strided_slice %497 {offsets = [0, 56], sizes = [8, 8], strides = [1, 1]} : vector<8x96xf32> to vector<8x8xf32>
    %506 = vector.extract_strided_slice %497 {offsets = [0, 64], sizes = [8, 8], strides = [1, 1]} : vector<8x96xf32> to vector<8x8xf32>
    %507 = vector.extract_strided_slice %497 {offsets = [0, 72], sizes = [8, 8], strides = [1, 1]} : vector<8x96xf32> to vector<8x8xf32>
    %508 = vector.extract_strided_slice %497 {offsets = [0, 80], sizes = [8, 8], strides = [1, 1]} : vector<8x96xf32> to vector<8x8xf32>
    %509 = vector.extract_strided_slice %497 {offsets = [0, 88], sizes = [8, 8], strides = [1, 1]} : vector<8x96xf32> to vector<8x8xf32>
    %510 = vector.shape_cast %498 : vector<8x8xf32> to vector<1x8x8xf32>
    %511 = vector.shape_cast %499 : vector<8x8xf32> to vector<1x8x8xf32>
    %512 = vector.shape_cast %500 : vector<8x8xf32> to vector<1x8x8xf32>
    %513 = vector.shape_cast %501 : vector<8x8xf32> to vector<1x8x8xf32>
    %514 = vector.shape_cast %502 : vector<8x8xf32> to vector<1x8x8xf32>
    %515 = vector.shape_cast %503 : vector<8x8xf32> to vector<1x8x8xf32>
    %516 = vector.shape_cast %504 : vector<8x8xf32> to vector<1x8x8xf32>
    %517 = vector.shape_cast %505 : vector<8x8xf32> to vector<1x8x8xf32>
    %518 = vector.shape_cast %506 : vector<8x8xf32> to vector<1x8x8xf32>
    %519 = vector.shape_cast %507 : vector<8x8xf32> to vector<1x8x8xf32>
    %520 = vector.shape_cast %508 : vector<8x8xf32> to vector<1x8x8xf32>
    %521 = vector.shape_cast %509 : vector<8x8xf32> to vector<1x8x8xf32>
    %522 = tpu.concatenate %510, %511, %512, %513, %514, %515, %516, %517, %518, %519, %520, %521 in 0 : vector<1x8x8xf32>, vector<1x8x8xf32>, vector<1x8x8xf32>, vector<1x8x8xf32>, vector<1x8x8xf32>, vector<1x8x8xf32>, vector<1x8x8xf32>, vector<1x8x8xf32>, vector<1x8x8xf32>, vector<1x8x8xf32>, vector<1x8x8xf32>, vector<1x8x8xf32> -> vector<12x8x8xf32>
    %523 = vector.extract_strided_slice %522 {offsets = [0, 0, 0], sizes = [4, 8, 8], strides = [1, 1, 1]} : vector<12x8x8xf32> to vector<4x8x8xf32>
    %524 = arith.truncf %523 : vector<4x8x8xf32> to vector<4x8x8xbf16>
    %525 = vector.extract_strided_slice %522 {offsets = [4, 0, 0], sizes = [4, 8, 8], strides = [1, 1, 1]} : vector<12x8x8xf32> to vector<4x8x8xf32>
    %526 = arith.truncf %525 : vector<4x8x8xf32> to vector<4x8x8xbf16>
    %527 = vector.extract_strided_slice %522 {offsets = [8, 0, 0], sizes = [4, 8, 8], strides = [1, 1, 1]} : vector<12x8x8xf32> to vector<4x8x8xf32>
    %528 = arith.truncf %527 : vector<4x8x8xf32> to vector<4x8x8xbf16>
    %cst_132 = arith.constant dense<0.000000e+00> : vector<4x8x8xf32>
    %529 = tpu.matmul %524, %526, %cst_132 {dimension_numbers = #tpu.dot_dimension_numbers<[2], [2], [1], [1], [0, 0, 0, 1, 1, 1], [0], [0]>} : vector<4x8x8xbf16>, vector<4x8x8xbf16>, vector<4x8x8xf32> -> vector<4x8x8xf32>
    %cst_133 = arith.constant dense<0xFF800000> : vector<4x8xf32>
    %530 = vector.multi_reduction <maximumf>, %529, %cst_133 [2] : vector<4x8x8xf32> to vector<4x8xf32>
    %531 = vector.shape_cast %530 : vector<4x8xf32> to vector<4x8x1xf32>
    %532 = vector.broadcast %531 : vector<4x8x1xf32> to vector<4x8x8xf32>
    %533 = arith.subf %529, %532 : vector<4x8x8xf32>
    %534 = math.exp %533 : vector<4x8x8xf32>
    %cst_134 = arith.constant dense<0.000000e+00> : vector<4x8xf32>
    %535 = vector.multi_reduction <add>, %534, %cst_134 [2] : vector<4x8x8xf32> to vector<4x8xf32>
    %536 = vector.shape_cast %535 : vector<4x8xf32> to vector<4x8x1xf32>
    %537 = tpu.reciprocal %536 {approx = true} : vector<4x8x1xf32> -> vector<4x8x1xf32>
    %538 = vector.broadcast %537 : vector<4x8x1xf32> to vector<4x8x8xf32>
    %539 = arith.mulf %534, %538 : vector<4x8x8xf32>
    %540 = arith.truncf %539 : vector<4x8x8xf32> to vector<4x8x8xbf16>
    %cst_135 = arith.constant dense<0.000000e+00> : vector<4x8x8xf32>
    %541 = tpu.matmul %540, %528, %cst_135 {dimension_numbers = #tpu.dot_dimension_numbers<[2], [1], [1], [2], [0, 0, 0, 1, 1, 2], [0], [0]>} : vector<4x8x8xbf16>, vector<4x8x8xbf16>, vector<4x8x8xf32> -> vector<4x8x8xf32>
    %542 = vector.extract_strided_slice %541 {offsets = [0, 0, 0], sizes = [1, 8, 8], strides = [1, 1, 1]} : vector<4x8x8xf32> to vector<1x8x8xf32>
    %543 = vector.shape_cast %542 : vector<1x8x8xf32> to vector<8x8xf32>
    %544 = vector.extract_strided_slice %541 {offsets = [1, 0, 0], sizes = [1, 8, 8], strides = [1, 1, 1]} : vector<4x8x8xf32> to vector<1x8x8xf32>
    %545 = vector.shape_cast %544 : vector<1x8x8xf32> to vector<8x8xf32>
    %546 = vector.extract_strided_slice %541 {offsets = [2, 0, 0], sizes = [1, 8, 8], strides = [1, 1, 1]} : vector<4x8x8xf32> to vector<1x8x8xf32>
    %547 = vector.shape_cast %546 : vector<1x8x8xf32> to vector<8x8xf32>
    %548 = vector.extract_strided_slice %541 {offsets = [3, 0, 0], sizes = [1, 8, 8], strides = [1, 1, 1]} : vector<4x8x8xf32> to vector<1x8x8xf32>
    %549 = vector.shape_cast %548 : vector<1x8x8xf32> to vector<8x8xf32>
    %550 = tpu.concatenate %543, %545, %547, %549 in 1 : vector<8x8xf32>, vector<8x8xf32>, vector<8x8xf32>, vector<8x8xf32> -> vector<8x32xf32>
    %c1280 = arith.constant 1280 : index
    %c0_136 = arith.constant 0 : index
    %551 = vector.load %arg4[%c1280, %c0_136] : memref<1600x128xbf16, #tpu.memory_space<vmem>>, vector<32x32xbf16>
    %552 = arith.truncf %550 : vector<8x32xf32> to vector<8x32xbf16>
    %cst_137 = arith.constant dense<0.000000e+00> : vector<8x32xf32>
    %553 = tpu.matmul %552, %551, %cst_137 {dimension_numbers = #tpu.dot_dimension_numbers<[1], [0], [0], [1], [0, 0, 1, 1], [], []>} : vector<8x32xbf16>, vector<32x32xbf16>, vector<8x32xf32> -> vector<8x32xf32>
    %c1312 = arith.constant 1312 : index
    %c0_138 = arith.constant 0 : index
    %554 = vector.load %arg3[%c1312, %c0_138] : memref<1600x128xf32, #tpu.memory_space<vmem>>, vector<1x32xf32>
    %555 = vector.broadcast %554 : vector<1x32xf32> to vector<8x32xf32>
    %556 = arith.addf %553, %555 : vector<8x32xf32>
    %557 = arith.addf %491, %556 : vector<8x32xf32>
    %c1504 = arith.constant 1504 : index
    %c0_139 = arith.constant 0 : index
    %558 = vector.load %arg3[%c1504, %c0_139] : memref<1600x128xf32, #tpu.memory_space<vmem>>, vector<1x32xf32>
    %c1520 = arith.constant 1520 : index
    %c0_140 = arith.constant 0 : index
    %559 = vector.load %arg3[%c1520, %c0_140] : memref<1600x128xf32, #tpu.memory_space<vmem>>, vector<1x32xf32>
    %cst_141 = arith.constant dense<0.000000e+00> : vector<8xf32>
    %560 = vector.multi_reduction <add>, %557, %cst_141 [1] : vector<8x32xf32> to vector<8xf32>
    %561 = vector.shape_cast %560 : vector<8xf32> to vector<8x1xf32>
    %cst_142 = arith.constant 3.200000e+01 : f32
    %562 = vector.broadcast %cst_142 : f32 to vector<8x1xf32>
    %563 = arith.divf %561, %562 : vector<8x1xf32>
    %564 = vector.broadcast %563 : vector<8x1xf32> to vector<8x32xf32>
    %565 = arith.subf %557, %564 : vector<8x32xf32>
    %566 = arith.mulf %565, %565 : vector<8x32xf32>
    %cst_143 = arith.constant dense<0.000000e+00> : vector<8xf32>
    %567 = vector.multi_reduction <add>, %566, %cst_143 [1] : vector<8x32xf32> to vector<8xf32>
    %568 = vector.shape_cast %567 : vector<8xf32> to vector<8x1xf32>
    %cst_144 = arith.constant 3.200000e+01 : f32
    %569 = vector.broadcast %cst_144 : f32 to vector<8x1xf32>
    %570 = arith.divf %568, %569 : vector<8x1xf32>
    %571 = vector.broadcast %563 : vector<8x1xf32> to vector<8x32xf32>
    %572 = arith.subf %557, %571 : vector<8x32xf32>
    %cst_145 = arith.constant 9.99999974E-6 : f32
    %573 = vector.broadcast %cst_145 : f32 to vector<8x1xf32>
    %574 = arith.addf %570, %573 : vector<8x1xf32>
    %575 = math.rsqrt %574 : vector<8x1xf32>
    %576 = vector.broadcast %575 : vector<8x1xf32> to vector<8x32xf32>
    %577 = arith.mulf %572, %576 : vector<8x32xf32>
    %578 = vector.broadcast %558 : vector<1x32xf32> to vector<8x32xf32>
    %579 = arith.mulf %577, %578 : vector<8x32xf32>
    %580 = vector.broadcast %559 : vector<1x32xf32> to vector<8x32xf32>
    %581 = arith.addf %579, %580 : vector<8x32xf32>
    %c1328 = arith.constant 1328 : index
    %c0_146 = arith.constant 0 : index
    %582 = vector.load %arg4[%c1328, %c0_146] : memref<1600x128xbf16, #tpu.memory_space<vmem>>, vector<32x32xbf16>
    %583 = arith.truncf %320 : vector<1x32xf32> to vector<1x32xbf16>
    %cst_147 = arith.constant dense<0.000000e+00> : vector<1x32xf32>
    %584 = tpu.matmul %583, %582, %cst_147 {dimension_numbers = #tpu.dot_dimension_numbers<[1], [0], [0], [1], [0, 0, 1, 1], [], []>} : vector<1x32xbf16>, vector<32x32xbf16>, vector<1x32xf32> -> vector<1x32xf32>
    %c1360 = arith.constant 1360 : index
    %c0_148 = arith.constant 0 : index
    %585 = vector.load %arg3[%c1360, %c0_148] : memref<1600x128xf32, #tpu.memory_space<vmem>>, vector<1x32xf32>
    %586 = arith.addf %584, %585 : vector<1x32xf32>
    %587 = vector.broadcast %586 : vector<1x32xf32> to vector<8x32xf32>
    %588 = arith.addf %581, %587 : vector<8x32xf32>
    %c1536 = arith.constant 1536 : index
    %c0_149 = arith.constant 0 : index
    %589 = vector.load %arg3[%c1536, %c0_149] : memref<1600x128xf32, #tpu.memory_space<vmem>>, vector<1x32xf32>
    %c1552 = arith.constant 1552 : index
    %c0_150 = arith.constant 0 : index
    %590 = vector.load %arg3[%c1552, %c0_150] : memref<1600x128xf32, #tpu.memory_space<vmem>>, vector<1x32xf32>
    %cst_151 = arith.constant dense<0.000000e+00> : vector<8xf32>
    %591 = vector.multi_reduction <add>, %588, %cst_151 [1] : vector<8x32xf32> to vector<8xf32>
    %592 = vector.shape_cast %591 : vector<8xf32> to vector<8x1xf32>
    %cst_152 = arith.constant 3.200000e+01 : f32
    %593 = vector.broadcast %cst_152 : f32 to vector<8x1xf32>
    %594 = arith.divf %592, %593 : vector<8x1xf32>
    %595 = vector.broadcast %594 : vector<8x1xf32> to vector<8x32xf32>
    %596 = arith.subf %588, %595 : vector<8x32xf32>
    %597 = arith.mulf %596, %596 : vector<8x32xf32>
    %cst_153 = arith.constant dense<0.000000e+00> : vector<8xf32>
    %598 = vector.multi_reduction <add>, %597, %cst_153 [1] : vector<8x32xf32> to vector<8xf32>
    %599 = vector.shape_cast %598 : vector<8xf32> to vector<8x1xf32>
    %cst_154 = arith.constant 3.200000e+01 : f32
    %600 = vector.broadcast %cst_154 : f32 to vector<8x1xf32>
    %601 = arith.divf %599, %600 : vector<8x1xf32>
    %602 = vector.broadcast %594 : vector<8x1xf32> to vector<8x32xf32>
    %603 = arith.subf %588, %602 : vector<8x32xf32>
    %cst_155 = arith.constant 9.99999974E-6 : f32
    %604 = vector.broadcast %cst_155 : f32 to vector<8x1xf32>
    %605 = arith.addf %601, %604 : vector<8x1xf32>
    %606 = math.rsqrt %605 : vector<8x1xf32>
    %607 = vector.broadcast %606 : vector<8x1xf32> to vector<8x32xf32>
    %608 = arith.mulf %603, %607 : vector<8x32xf32>
    %609 = vector.broadcast %589 : vector<1x32xf32> to vector<8x32xf32>
    %610 = arith.mulf %608, %609 : vector<8x32xf32>
    %611 = vector.broadcast %590 : vector<1x32xf32> to vector<8x32xf32>
    %612 = arith.addf %610, %611 : vector<8x32xf32>
    %c1376 = arith.constant 1376 : index
    %c0_156 = arith.constant 0 : index
    %613 = vector.load %arg4[%c1376, %c0_156] : memref<1600x128xbf16, #tpu.memory_space<vmem>>, vector<32x64xbf16>
    %614 = arith.truncf %612 : vector<8x32xf32> to vector<8x32xbf16>
    %cst_157 = arith.constant dense<0.000000e+00> : vector<8x64xf32>
    %615 = tpu.matmul %614, %613, %cst_157 {dimension_numbers = #tpu.dot_dimension_numbers<[1], [0], [0], [1], [0, 0, 1, 1], [], []>} : vector<8x32xbf16>, vector<32x64xbf16>, vector<8x64xf32> -> vector<8x64xf32>
    %c1408 = arith.constant 1408 : index
    %c0_158 = arith.constant 0 : index
    %616 = vector.load %arg3[%c1408, %c0_158] : memref<1600x128xf32, #tpu.memory_space<vmem>>, vector<1x64xf32>
    %617 = vector.broadcast %616 : vector<1x64xf32> to vector<8x64xf32>
    %618 = arith.addf %615, %617 : vector<8x64xf32>
    %619 = arith.mulf %618, %618 : vector<8x64xf32>
    %620 = arith.mulf %618, %619 : vector<8x64xf32>
    %cst_159 = arith.constant 4.471500e-02 : f32
    %621 = vector.broadcast %cst_159 : f32 to vector<8x64xf32>
    %622 = arith.mulf %621, %620 : vector<8x64xf32>
    %623 = arith.addf %618, %622 : vector<8x64xf32>
    %cst_160 = arith.constant 0.797884583 : f32
    %624 = vector.broadcast %cst_160 : f32 to vector<8x64xf32>
    %625 = arith.mulf %624, %623 : vector<8x64xf32>
    %626 = math.tanh %625 : vector<8x64xf32>
    %cst_161 = arith.constant 1.000000e+00 : f32
    %627 = vector.broadcast %cst_161 : f32 to vector<8x64xf32>
    %628 = arith.addf %627, %626 : vector<8x64xf32>
    %cst_162 = arith.constant 5.000000e-01 : f32
    %629 = vector.broadcast %cst_162 : f32 to vector<8x64xf32>
    %630 = arith.mulf %629, %628 : vector<8x64xf32>
    %631 = arith.mulf %618, %630 : vector<8x64xf32>
    %c1424 = arith.constant 1424 : index
    %c0_163 = arith.constant 0 : index
    %632 = vector.load %arg4[%c1424, %c0_163] : memref<1600x128xbf16, #tpu.memory_space<vmem>>, vector<64x32xbf16>
    %633 = arith.truncf %631 : vector<8x64xf32> to vector<8x64xbf16>
    %cst_164 = arith.constant dense<0.000000e+00> : vector<8x32xf32>
    %634 = tpu.matmul %633, %632, %cst_164 {dimension_numbers = #tpu.dot_dimension_numbers<[1], [0], [0], [1], [0, 0, 1, 1], [], []>} : vector<8x64xbf16>, vector<64x32xbf16>, vector<8x32xf32> -> vector<8x32xf32>
    %c1488 = arith.constant 1488 : index
    %c0_165 = arith.constant 0 : index
    %635 = vector.load %arg3[%c1488, %c0_165] : memref<1600x128xf32, #tpu.memory_space<vmem>>, vector<1x32xf32>
    %636 = vector.broadcast %635 : vector<1x32xf32> to vector<8x32xf32>
    %637 = arith.addf %634, %636 : vector<8x32xf32>
    %638 = arith.addf %612, %637 : vector<8x32xf32>
    %c1568 = arith.constant 1568 : index
    %c0_166 = arith.constant 0 : index
    %639 = vector.load %arg3[%c1568, %c0_166] : memref<1600x128xf32, #tpu.memory_space<vmem>>, vector<1x32xf32>
    %c1584 = arith.constant 1584 : index
    %c0_167 = arith.constant 0 : index
    %640 = vector.load %arg3[%c1584, %c0_167] : memref<1600x128xf32, #tpu.memory_space<vmem>>, vector<1x32xf32>
    %cst_168 = arith.constant dense<0.000000e+00> : vector<8xf32>
    %641 = vector.multi_reduction <add>, %638, %cst_168 [1] : vector<8x32xf32> to vector<8xf32>
    %642 = vector.shape_cast %641 : vector<8xf32> to vector<8x1xf32>
    %cst_169 = arith.constant 3.200000e+01 : f32
    %643 = vector.broadcast %cst_169 : f32 to vector<8x1xf32>
    %644 = arith.divf %642, %643 : vector<8x1xf32>
    %645 = vector.broadcast %644 : vector<8x1xf32> to vector<8x32xf32>
    %646 = arith.subf %638, %645 : vector<8x32xf32>
    %647 = arith.mulf %646, %646 : vector<8x32xf32>
    %cst_170 = arith.constant dense<0.000000e+00> : vector<8xf32>
    %648 = vector.multi_reduction <add>, %647, %cst_170 [1] : vector<8x32xf32> to vector<8xf32>
    %649 = vector.shape_cast %648 : vector<8xf32> to vector<8x1xf32>
    %cst_171 = arith.constant 3.200000e+01 : f32
    %650 = vector.broadcast %cst_171 : f32 to vector<8x1xf32>
    %651 = arith.divf %649, %650 : vector<8x1xf32>
    %652 = vector.broadcast %644 : vector<8x1xf32> to vector<8x32xf32>
    %653 = arith.subf %638, %652 : vector<8x32xf32>
    %cst_172 = arith.constant 9.99999974E-6 : f32
    %654 = vector.broadcast %cst_172 : f32 to vector<8x1xf32>
    %655 = arith.addf %651, %654 : vector<8x1xf32>
    %656 = math.rsqrt %655 : vector<8x1xf32>
    %657 = vector.broadcast %656 : vector<8x1xf32> to vector<8x32xf32>
    %658 = arith.mulf %653, %657 : vector<8x32xf32>
    %659 = vector.broadcast %639 : vector<1x32xf32> to vector<8x32xf32>
    %660 = arith.mulf %658, %659 : vector<8x32xf32>
    %661 = vector.broadcast %640 : vector<1x32xf32> to vector<8x32xf32>
    %662 = arith.addf %660, %661 : vector<8x32xf32>
    %c240 = arith.constant 240 : index
    %c0_173 = arith.constant 0 : index
    %663 = vector.load %arg4[%c240, %c0_173] : memref<1600x128xbf16, #tpu.memory_space<vmem>>, vector<32x128xbf16>
    %664 = arith.truncf %662 : vector<8x32xf32> to vector<8x32xbf16>
    %cst_174 = arith.constant dense<0.000000e+00> : vector<8x128xf32>
    %665 = tpu.matmul %664, %663, %cst_174 {dimension_numbers = #tpu.dot_dimension_numbers<[1], [0], [0], [1], [0, 0, 1, 1], [], []>} : vector<8x32xbf16>, vector<32x128xbf16>, vector<8x128xf32> -> vector<8x128xf32>
    %c272 = arith.constant 272 : index
    %c0_175 = arith.constant 0 : index
    %666 = vector.load %arg3[%c272, %c0_175] : memref<1600x128xf32, #tpu.memory_space<vmem>>, vector<1x128xf32>
    %667 = vector.broadcast %666 : vector<1x128xf32> to vector<8x128xf32>
    %668 = arith.addf %665, %667 : vector<8x128xf32>
    %c0_176 = arith.constant 0 : index
    %c0_177 = arith.constant 0 : index
    %c0_178 = arith.constant 0 : index
    %669 = vector.load %arg5[%c0_176, %c0_177, %c0_178] : memref<1x8x128xf32, #tpu.memory_space<vmem>>, vector<1x8x128xf32>
    %670 = vector.shape_cast %669 : vector<1x8x128xf32> to vector<8x128xf32>
    %671 = vector.shape_cast %668 : vector<8x128xf32> to vector<1x8x128xf32>
    tpu.vector_store %arg5[%c0_176, %c0_177, %c0_178], %671 {strides = array<i32>} : memref<1x8x128xf32, #tpu.memory_space<vmem>>, vector<1x8x128xf32>,
    return
  }
  func.func @transform_0(%arg0: i32) -> (i32, i32, i32) {
    %c0_i32 = arith.constant 0 : i32
    %c0_i32_0 = arith.constant 0 : i32
    %c0_i32_1 = arith.constant 0 : i32
    return %arg0, %c0_i32, %c0_i32_0 : i32, i32, i32
  }
  func.func @transform_1(%arg0: i32) -> (i32, i32, i32) {
    %c0_i32 = arith.constant 0 : i32
    %c0_i32_0 = arith.constant 0 : i32
    %c0_i32_1 = arith.constant 0 : i32
    return %arg0, %c0_i32, %c0_i32_0 : i32, i32, i32
  }
  func.func @transform_2(%arg0: i32) -> (i32, i32) {
    %c0_i32 = arith.constant 0 : i32
    %c0_i32_0 = arith.constant 0 : i32
    %c0_i32_1 = arith.constant 0 : i32
    return %c0_i32, %c0_i32_0 : i32, i32
  }
  func.func @transform_3(%arg0: i32) -> (i32, i32) {
    %c0_i32 = arith.constant 0 : i32
    %c0_i32_0 = arith.constant 0 : i32
    %c0_i32_1 = arith.constant 0 : i32
    return %c0_i32, %c0_i32_0 : i32, i32
  }
  func.func @transform_4(%arg0: i32) -> (i32, i32, i32) {
    %c0_i32 = arith.constant 0 : i32
    %c0_i32_0 = arith.constant 0 : i32
    %c0_i32_1 = arith.constant 0 : i32
    return %arg0, %c0_i32, %c0_i32_0 : i32, i32, i32
  }
}

</mosaic_0001>

<bundles_post_ra>
// kernel: forward.1
= control target key start
LH: loop header
LB: loop body
LE: loop exit
PB: predicated region body
PF: predicated region fallthrough
CT: control target
= control target key end

     0   :  { %9 = vsyncpa [#allocation3], 0  ;;  %s6180_s0 = inlined_call_operand.vmem [shape: f32[2,8,4], index: 0, kind: input, shape index: {}]   ;;  %s6181_s1 = inlined_call_operand.vmem [shape: f32[2,1,32], index: 1, kind: input, shape index: {}]   ;;  %s6182_s2 = inlined_call_operand.hbm [shape: f32[1600,128], index: 2, kind: input, shape index: {}]   ;;  %s6183_s3 = inlined_call_operand.hbm [shape: bf16[1600,128], index: 3, kind: input, shape index: {}]   ;;  %s6184_s4 = inlined_call_operand.vmem [shape: f32[2,8,128], index: 4, kind: output, shape index: {}]  }
   0x1   :  { %10 = vsyncpa [#allocation5], 0  ;;  %s5557_s15 = smov 0  }
   0x2 LB: > { %s5509_s16 = smov [#allocation2]   ;;  %s5563_s18 = sadd.s32 4294967295, %s5507_s15   ;;  %s5507_s15 = sphi %s5557_s15, %s16_s15  }
   0x3   : > { %s153_s17 = sshll.u32 %s5509_s16, 4  ;;  %p4360_p0 = scmp.ge.s32.totalorder %s5507_s15, 1  ;;  %s154_s17 = int_to_ptr.vmem [resolvable:$true] %s153_s17 }
   0x4   : > { %p141_p1 = scmp.lt.s32.totalorder %s5507_s15, 3  ;;  %p5070_p3 = scmp.eq.s32.totalorder %s5563_s18, 0 }
   0x5   : > { %s5510_s20 = smov [#allocation4]   ;;  %s5452_s23 = scalar_lea.vmem %s154_s17, 25600 }
   0x6   : > { %p5567_p2 = pnand %p4360_p0, %p141_p1  ;;  %s166_s21 = sshll.u32 %s5510_s20, 4  ;;  %s167_s21 = int_to_ptr.vmem [resolvable:$true] %s166_s21 }
   0x7   : > { %p5453_p7 = scmp.ne.s32.totalorder %s154_s17, %s5452_s23  ;;  %p5460_p10 = scmp.lt.s32.totalorder %s154_s17, %s154_s17 }
   0x8   : > { %p5063_p4 = pneg %p5567_p2  ;;  %p5461_p11 = scmp.lt.s32.totalorder %s5452_s23, %s5452_s23 }
   0xa   : > { %p5576_p5 = pnand %p5070_p3, %p5063_p4  ;;  %p5462_p12 = por %p5461_p11, %p5460_p10 }
   0xc   : > { %p5443_p6 = pneg %p5576_p5 }
   0xe   : > { %p5455_p8 = pnand %p5453_p7, %p5443_p6 }
  0x10   : > { %p5456_p9 = pneg %p5455_p8 }
  0x12   : > { %p5463_p13 = pnand %p5462_p12, %p5456_p9 }
  0x14   : > { %5466 = shalt.err (!%p5463_p13)
}
  0x15   : > { %s5511_s24 = smov 128   ;;  %s5512_s25 = smov 8  }
  0x16   : > { %5066 = dma.hbm_to_vmem [thread:$0]  (!%p5576_p5), %s6182_s2, 25600, %s154_s17, [#allocation3], %s5511_s24, %s5511_s24, %s5512_s25  }
  0x17   : > { %s5478_s28 = scalar_lea.vmem %s167_s21, 12800  ;;  %p5486_p7 = scmp.lt.s32.totalorder %s167_s21, %s167_s21 }
  0x18   : > { %p5479_p0 = scmp.ne.s32.totalorder %s167_s21, %s5478_s28  ;;  %p5487_p8 = scmp.lt.s32.totalorder %s5478_s28, %s5478_s28 }
  0x1a   : > { %p5481_p1 = pnand %p5479_p0, %p5443_p6  ;;  %p5488_p10 = por %p5487_p8, %p5486_p7 }
  0x1c   : > { %p5482_p4 = pneg %p5481_p1 }
  0x1e   : > { %p5489_p9 = pnand %p5488_p10, %p5482_p4 }
  0x20   : > { %5492 = shalt.err (!%p5489_p9)
}
  0x21   : > { %s5513_s29 = smov 64   ;;  %s5514_s30 = smov 4  }
  0x22   : > { %5069 = dma.hbm_to_vmem [thread:$0]  (!%p5576_p5), %s6183_s3, 12800, %s167_s21, [#allocation5], %s5513_s29, %s5513_s29, %s5514_s30  }
  0x23   : > { %195 = sbr.rel (%p5567_p2) target bundleno = 10236 (0x27fc), region = 36 }
  0x28   : > { %5498 = dma.done.wait (%p5070_p3), [#allocation3], 25600  }
  0x29   : > { %5500 = vsyncadd (%p5070_p3), [#allocation3], 4294941696 }
  0x2a   : > { %5502 = dma.done.wait (%p5070_p3), [#allocation5], 12800  }
  0x2b   : > { %5504 = vsyncadd (%p5070_p3), [#allocation5], 4294954496  ;;  %p226_p6 = scmp.lt.s32.totalorder %s5563_s18, 1  ;;  %v5515_v0 = vmov 0.0   ;;  %vm5516_vm0 = vmmov 0   ;;  %v5245_v1 = vld [vmem:[#allocation4 + $0x18] sm:$0xff]  }
  0x2c   : > { %4667 = vmatprep.subr.bf16.mxu1 %v5515_v0  ;;  %4671 = vmatprep.mubr.msk.bf16.mxu1 %vm5516_vm0, %v5515_v0  ;;  %v5246_v2 = vld [vmem:[#allocation4 + $0x10] sm:$0xff]   ;;  %vm313_vm1 = vcmask 261120   ;;  %v239_v5 = vld [vmem:[#allocation4] sm:$0x3]  ;;  %vm250_vm2 = vcmask 1041408   ;;  %vm246_vm3 = vcmask 31744  }
  0x2d   : > { %s6188_s18 = smov (!%p226_p6, %s5563_s18), 1  ;;  %4661 = vmatprep.subr.bf16.mxu0 %v5515_v0  ;;  %4663 = vmatprep.mubr.msk.bf16.mxu0 %vm5516_vm0, %v5515_v0  ;;  %v252_v6 = vsel %vm250_vm2, %v239_v5, 0  ;;  %v5247_v9 = vld [vmem:[#allocation4 + $0x60] sm:$0xff]   ;;  %v5248_v10 = vld [vmem:[#allocation4 + $0x58] sm:$0xff]   ;;  %v5249_v11 = vld [vmem:[#allocation4 + $0x50] sm:$0xff]   ;;  %s5517_s14 = smov 120  }
  0x2e   : > { %s232_s9 = scalar_lea.vmem %s6181_s1, %s6188_s18  ;;  %4668 = vmatpush3.bf16.msra.mxu1 %v5245_v1  ;;  %s4367_s10 = sshll.u32 %s6188_s18, 3  ;;  %4662 = vmatpush3.bf16.msra.mxu0 %v252_v6  ;;  %v5250_v12 = vld [vmem:[#allocation4 + $0x48] sm:$0xff]   ;;  %v5251_v13 = vld [vmem:[#allocation4 + $0x40] sm:$0xff]   ;;  %v5252_v14 = vld [vmem:[#allocation4 + $0x38] sm:$0xff]   ;;  %vm633_vm6 = vcmask 64512   ;;  %vm822_vm7 = vcmask 72704  }
  0x2f   : > { %v294_v3 = vld [vmem:[%s232_s9] sm:$0x1]  ;;  %4669 = vmatprep.subr.bf16.mxu1 %v5515_v0  ;;  %s229_s13 = scalar_lea.vmem %s6180_s0, %s4367_s10  ;;  %4675 = vmatprep.subr.bf16.mxu0 %v5515_v0  ;;  %v5253_v15 = vld [vmem:[#allocation4 + $0x30] sm:$0xff]   ;;  %v5254_v16 = vld [vmem:[#allocation4 + $0x28] sm:$0xff]   ;;  %s5518_s16 = smov 96   ;;  %vm826_vm8 = vcmask 65536  }
  0x30   : > { %v299_v4 = vpack.c.bf16 %v294_v3, %v294_v3  ;;  %v238_v7 = vld [vmem:[%s229_s13] sm:$0xff]  ;;  %v5255_v45 = vld [vmem:[#allocation4 + $0x98] sm:$0xff]   ;;  %v5256_v46 = vld [vmem:[#allocation4 + $0x90] sm:$0xff]   ;;  %s5519_s17 = smov 80   ;;  %s5520_s19 = smov 88   ;;  %vm919_vm9 = vcmask 1043456  }
  0x31   : > { %v240_v8 = vpack.c.bf16 %v238_v7, %v238_v7  ;;  %v300_v17 = vld [vmem:[#allocation2 + $0x40] sm:$0x1]  ;;  %v4369_v47 = vld [vmem:[#allocation2 + $0x10] ss:$0 sm:$0xff]  ;;  %v484_v52 = vld [vmem:[#allocation2 + $0xe8] sm:$0x1]  ;;  %s236_s6 = scalar_lea.vmem %s6184_s4, %s4367_s10 }
  0x32   : > { %4670 = vmatpush3.bf16.msra.mxu1 %v5246_v2  ;;  %v394_v48 = vld [vmem:[#allocation2 + $0xd0] sm:$0x1]  ;;  %v483_v50 = vld [vmem:[#allocation2 + $0xe0] sm:$0xff]  ;;  %s5521_s20 = smov 112   ;;  %s5522_s21 = smov 72   ;;  %vm920_vm10 = vcmask 1044480  }
  0x33   : > { %4695 = vmatprep.subr.bf16.mxu1 %v5515_v0  ;;  %4664 = vmatmul.mubr.msk.bf16.vlgmr.msra.gmra.mxu0 %vm246_vm3, %v240_v8  ;;  %v4382_v61 = vld [vmem:[#allocation2 + $0x140] ss:$0 sm:$0xff]  ;;  %s5523_s22 = smov 104   ;;  %s5524_s23 = smov 56   ;;  %vm1134_vm11 = vcmask 130048   ;;  %vm1137_vm12 = vcmask 195584  }
  0x34   : > { %4691 = vmatprep.mubr.msk.bf16.mxu0 %vm5516_vm0, %v5515_v0  ;;  %4676 = vmatpush3.bf16.msra.mxu0 %v5247_v9  ;;  %s5525_s24 = smov 64   ;;  %s5527_s25 = smov 48   ;;  %vm1213_vm13 = vcmask 253952   ;;  %vm1372_vm14 = vcmask 523264  }
  0x35   : > { %4672 = vmatmul.mubr.msk.bf16.vlgmr.msra.gmra.mxu1 %vm313_vm1, %v299_v4  ;;  %4677 = vmatprep.subr.bf16.mxu0 %v5515_v0  ;;  %s5528_s26 = smov 40   ;;  %s5529_s27 = smov 8  }
  0x36   : > { %4699 = vmatprep.mubr.msk.bf16.mxu1 %vm5516_vm0, %v5515_v0  ;;  %4696 = vmatpush3.bf16.msra.mxu1 %v5255_v45  ;;  %s5530_s28 = smov 16   ;;  %s5531_s29 = smov 24  }
  0x37   : > { %4697 = vmatprep.subr.bf16.mxu1 %v5515_v0 }
  0x38   : > { %4678 = vmatpush3.bf16.msra.mxu0 %v5248_v10 }
  0x39   : > { %4679 = vmatprep.subr.bf16.mxu0 %v5515_v0 }
  0x3a   : > { %4698 = vmatpush3.bf16.msra.mxu1 %v5256_v46 }
  0x3b   : > { %4703 = vmatprep.subr.bf16.mxu1 %v5515_v0 }
  0x3c   : > { %4680 = vmatpush3.bf16.msra.mxu0 %v5249_v11 }
  0x3d   : > { %4681 = vmatprep.subr.bf16.mxu0 %v5515_v0 }
  0x40   : > { %4682 = vmatpush3.bf16.msra.mxu0 %v5250_v12 }
  0x41   : > { %4683 = vmatprep.subr.bf16.mxu0 %v5515_v0 }
  0x44   : > { %4684 = vmatpush3.bf16.msra.mxu0 %v5251_v13 }
  0x45   : > { %4685 = vmatprep.subr.bf16.mxu0 %v5515_v0 }
  0x48   : > { %4686 = vmatpush3.bf16.msra.mxu0 %v5252_v14 }
  0x49   : > { %4687 = vmatprep.subr.bf16.mxu0 %v5515_v0 }
  0x4c   : > { %4688 = vmatpush3.bf16.msra.mxu0 %v5253_v15 }
  0x4d   : > { %4689 = vmatprep.subr.bf16.mxu0 %v5515_v0 }
  0x50   : > { %4690 = vmatpush3.bf16.msra.mxu0 %v5254_v16 }
  0x51   : > { %4721 = vmatprep.subr.bf16.mxu0 %v5515_v0 }
  0xf3   : > { %v288_v41 = vpop.f32.mrf.mxu0 }
  0xf4   : > { %v289_v49 = vadd.f32 %v4369_v47, %v288_v41 }
  0xf5   : > { %v351_v18 = vpop.f32.mrf.mxu1  ;;  %v4665_v42 = vpop.f32.mrf.mxu0 }
  0xf6   : > { %v352_v19 = vadd.f32 %v351_v18, %v300_v17  ;;  %v5648_v55 = vadd.f32 %v483_v50, %v289_v49 }
  0xf7   : > { %v4673_v20 = vpop.f32.mrf.mxu1  ;;  %v291_v43 = vpop.f32.mrf.mxu0 }
  0xf8   : > { %v360_v21 = vand.u32 2147483647, %v352_v19  ;;  %v357_v34 = vmax.f32 %v352_v19, 0.0  ;;  %vm358_vm5 = vcmp.ne.f32.partialorder %v352_v19, %v352_v19 }
  0xf9   : > { %v354_v22 = vpop.f32.mrf.mxu1  ;;  %v4666_v44 = vpop.f32.mrf.mxu0 }
  0xfa   : > { %v361_v23 = vsub.f32 0.0, %v360_v21 }
  0xfb   : > { %v4674_v24 = vpop.f32.mrf.mxu1 }
  0xfc   : > { %v362_v25 = vmul.f32 1.442695, %v361_v23 }
  0xfe   : > { %5301 = vpow2.f32 %v362_v25 }
 0x10b   : > { %v5302_v26 = vpop.eup %5301 }
 0x10c   : > { %v364_v27 = vadd.f32 1.0, %v5302_v26  ;;  %v367_v28 = vmul.f32 -0.5, %v5302_v26  ;;  %v370_v30 = vand.u32 2147483647, %v5302_v26 }
 0x10e   : > { %5303 = vlog2.f32 %v364_v27  ;;  %v368_v29 = vadd.f32 1.0, %v367_v28  ;;  %vm371_vm4 = vcmp.lt.f32.partialorder %v370_v30, 0.0004427343 }
 0x110   : > { %v369_v33 = vmul.f32 %v5302_v26, %v368_v29 }
 0x11b   : > { %v5304_v31 = vpop.eup %5303 }
 0x11c   : > { %v366_v32 = vmul.f32 0.6931472, %v5304_v31 }
 0x11e   : > { %v372_v35 = vsel %vm371_vm4, %v369_v33, %v366_v32 }
 0x11f   : > { %v373_v36 = vadd.f32 %v372_v35, %v357_v34 }
 0x121   : > { %v374_v37 = vsel %vm358_vm5, %v352_v19, %v373_v36 }
 0x122   : > { %5305 = vtanh.f32 %v374_v37 }
 0x12f   : > { %v5306_v38 = vpop.eup %5305 }
 0x130   : > { %v376_v39 = vmul.f32 %v5306_v38, %v352_v19 }
 0x132   : > { %v393_v40 = vpack.c.bf16 %v376_v39, %v376_v39 }
 0x134   : > { %4692 = vmatmul.mubr.bf16.vlgmr.msra.gmra.mxu0 %v393_v40 }
 0x135   : > { %4723 = vmatprep.mubr.msk.bf16.mxu0 %vm5516_vm0, %v5515_v0 }
 0x1f4   : > { %v477_v51 = vpop.f32.mrf.mxu0 }
 0x1f5   : > { %v478_v53 = vadd.f32 %v477_v51, %v394_v48 }
 0x1f6   : > { %v4693_v54 = vpop.f32.mrf.mxu0 }
 0x1f7   : > { %v5650_v56 = vadd.f32 %v484_v52, %v478_v53 }
 0x1f8   : > { %v480_v57 = vpop.f32.mrf.mxu0 }
 0x1f9   : > { %v491_v58 = vpack.c.bf16 %v5650_v56, %v5648_v55 }
 0x1fa   : > { %v4694_v59 = vpop.f32.mrf.mxu0 }
 0x1fb   : > { %4700 = vmatmul.mubr.msk.bf16.vlgmr.msra.gmra.mxu1 %vm313_vm1, %v491_v58 }
 0x1fc   : > { %4705 = vmatprep.mubr.msk.bf16.mxu1 %vm5516_vm0, %v5515_v0 }
 0x2bb   : > { %v546_v60 = vpop.f32.mrf.mxu1 }
 0x2bc   : > { %v547_v1 = vadd.f32 %v4382_v61, %v546_v60 }
 0x2bd   : > { %v4701_v62 = vpop.f32.mrf.mxu1 }
 0x2bf   : > { %v549_v63 = vpop.f32.mrf.mxu1 }
 0x2c0   : > { %v550_v2 = vadd.f32 %v4382_v61, %v549_v63 }
 0x2c1   : > { %v4702_v3 = vpop.f32.mrf.mxu1 }
 0x2c2   : > { %v5657_v4 = vpack.i.bf16 %v550_v2, %v547_v1  ;;  %v621_v5 = vpack.c.bf16 %v550_v2, %v547_v1 }
 0x2c4   : > { %5116 = vrot.lane.b32.xlu1 %v5657_v4, %s5517_s14  ;;  %5106 = vrot.lane.b32.xlu0 %v5657_v4, %s5518_s16 }
 0x2c8   : > { %5121 = vrot.lane.b32.xlu1 %v5657_v4, %s5519_s17  ;;  %5111 = vrot.lane.b32.xlu0 %v5657_v4, %s5520_s19 }
 0x2cc   : > { %5131 = vrot.lane.b32.xlu1 %v5657_v4, %s5521_s20  ;;  %5126 = vrot.lane.b32.xlu0 %v5657_v4, %s5522_s21 }
 0x2d0   : > { %5136 = vrot.lane.b32.xlu0 %v5657_v4, %s5523_s22 }
 0x336   : > { %v5107_v6 = vpop.permute.xlu0 %5106  ;;  %v5117_v11 = vpop.permute.xlu1 %5116 }
 0x337   : > { %v5109_v7 = vunpack.i.h.bf16 %v5107_v6  ;;  %v5108_v8 = vunpack.i.l.bf16 %v5107_v6  ;;  %v5119_v28 = vunpack.i.h.bf16 %v5117_v11  ;;  %v5118_v29 = vunpack.i.l.bf16 %v5117_v11 }
 0x339   : > { %v625_v9 = vpack.c.bf16 %v5109_v7, %v5108_v8  ;;  %v622_v32 = vpack.c.bf16 %v5119_v28, %v5118_v29 }
 0x33a   : > { %v5112_v10 = vpop.permute.xlu0 %5111  ;;  %v5122_v19 = vpop.permute.xlu1 %5121 }
 0x33b   : > { %v5114_v12 = vunpack.i.h.bf16 %v5112_v10  ;;  %v5113_v13 = vunpack.i.l.bf16 %v5112_v10  ;;  %v638_v14 = vsel %vm633_vm6, %v625_v9, 0  ;;  %v5124_v23 = vunpack.i.h.bf16 %v5122_v19 }
 0x33c   : > { %4704 = vmatpush3.bf16.xpose.msra.mxu1 %v638_v14  ;;  %v5123_v24 = vunpack.i.l.bf16 %v5122_v19 }
 0x33d   : > { %4709 = vmatprep.subr.bf16.mxu1 %v5515_v0  ;;  %v626_v18 = vpack.c.bf16 %v5114_v12, %v5113_v13 }
 0x33e   : > { %v5127_v15 = vpop.permute.xlu0 %5126  ;;  %v627_v30 = vpack.c.bf16 %v5124_v23, %v5123_v24  ;;  %v5132_v33 = vpop.permute.xlu1 %5131 }
 0x33f   : > { %v5129_v16 = vunpack.i.h.bf16 %v5127_v15  ;;  %v5128_v17 = vunpack.i.l.bf16 %v5127_v15  ;;  %v685_v25 = vsel %vm633_vm6, %v626_v18, 0  ;;  %v5134_v35 = vunpack.i.h.bf16 %v5132_v33 }
 0x340   : > { %v732_v34 = vsel %vm633_vm6, %v627_v30, 0  ;;  %v5133_v36 = vunpack.i.l.bf16 %v5132_v33 }
 0x341   : > { %v628_v20 = vpack.c.bf16 %v5129_v16, %v5128_v17 }
 0x342   : > { %v5137_v21 = vpop.permute.xlu0 %5136  ;;  %v623_v37 = vpack.c.bf16 %v5134_v35, %v5133_v36 }
 0x343   : > { %v779_v22 = vsel %vm633_vm6, %v628_v20, 0  ;;  %4706 = vmatmul.mubr.msk.bf16.vlgmr.msra.gmra.mxu1 %vm633_vm6, %v621_v5  ;;  %v5139_v26 = vunpack.i.h.bf16 %v5137_v21  ;;  %v5138_v27 = vunpack.i.l.bf16 %v5137_v21  ;;  %v5526_v21 = vmov 65535  }
 0x344   : > { %4722 = vmatpush3.bf16.xpose.msra.mxu0 %v779_v22  ;;  %4710 = vmatpush3.bf16.xpose.msra.mxu1 %v685_v25  ;;  %v921_v22 = vsel %vm919_vm9, 4294967295, %v5526_v21 }
 0x345   : > { %4711 = vmatprep.mubr.msk.bf16.mxu1 %vm5516_vm0, %v5515_v0  ;;  %4715 = vmatprep.subr.bf16.mxu1 %v5515_v0  ;;  %v624_v31 = vpack.c.bf16 %v5139_v26, %v5138_v27  ;;  %v5714_v30 = vsel %vm920_vm10, %v921_v22, 0 }
 0x346   : > { %4733 = vmatprep.subr.bf16.mxu0 %v5515_v0 }
 0x34b   : > { %4724 = vmatmul.mubr.msk.bf16.vlgmr.msra.gmra.mxu0 %vm633_vm6, %v624_v31  ;;  %4712 = vmatmul.mubr.msk.bf16.vlgmr.msra.gmra.mxu1 %vm633_vm6, %v622_v32 }
 0x34c   : > { %4735 = vmatprep.mubr.msk.bf16.mxu0 %vm5516_vm0, %v5515_v0  ;;  %4716 = vmatpush3.bf16.xpose.msra.mxu1 %v732_v34 }
 0x34d   : > { %4717 = vmatprep.mubr.msk.bf16.mxu1 %vm5516_vm0, %v5515_v0  ;;  %4727 = vmatprep.subr.bf16.mxu1 %v5515_v0 }
 0x353   : > { %4718 = vmatmul.mubr.msk.bf16.vlgmr.msra.gmra.mxu1 %vm633_vm6, %v623_v37 }
 0x354   : > { %4729 = vmatprep.mubr.msk.bf16.mxu1 %vm5516_vm0, %v5515_v0 }
 0x403   : > { %v674_v38 = vpop.f32.mrf.mxu1 }
 0x404   : > { %v823_v39 = vsel %vm822_vm7, %v674_v38, -inf }
 0x405   : > { %824 = vmax.xlane.f32.xlu1 %v823_v39  ;;  %v4707_v40 = vpop.f32.mrf.mxu1 }
 0x407   : > { %v677_v41 = vpop.f32.mrf.mxu1 }
 0x408   : > { %v827_v42 = vsel %vm826_vm8, %v677_v41, -inf }
 0x409   : > { %828 = vmax.xlane.f32.xlu0 %v827_v42  ;;  %v4708_v43 = vpop.f32.mrf.mxu1 }
 0x40b   : > { %v815_v44 = vpop.f32.mrf.mxu0  ;;  %v721_v45 = vpop.f32.mrf.mxu1 }
 0x40c   : > { %v830_v46 = vsel %vm822_vm7, %v721_v45, -inf  ;;  %v842_v61 = vsel %vm822_vm7, %v815_v44, -inf }
 0x40d   : > { %v4725_v47 = vpop.f32.mrf.mxu0  ;;  %831 = vmax.xlane.f32.xlu0 %v830_v46  ;;  %v4713_v48 = vpop.f32.mrf.mxu1 }
 0x40f   : > { %v818_v49 = vpop.f32.mrf.mxu0  ;;  %v724_v50 = vpop.f32.mrf.mxu1 }
 0x410   : > { %v833_v51 = vsel %vm826_vm8, %v724_v50, -inf  ;;  %v845_v63 = vsel %vm826_vm8, %v818_v49, -inf }
 0x411   : > { %v4726_v52 = vpop.f32.mrf.mxu0  ;;  %834 = vmax.xlane.f32.xlu1 %v833_v51  ;;  %v4714_v53 = vpop.f32.mrf.mxu1 }
 0x413   : > { %v768_v54 = vpop.f32.mrf.mxu1 }
 0x414   : > { %v836_v57 = vsel %vm822_vm7, %v768_v54, -inf }
 0x415   : > { %837 = vmax.xlane.f32.xlu0 %v836_v57  ;;  %v4719_v58 = vpop.f32.mrf.mxu1 }
 0x417   : > { %v771_v59 = vpop.f32.mrf.mxu1 }
 0x418   : > { %v839_v60 = vsel %vm826_vm8, %v771_v59, -inf }
 0x419   : > { %840 = vmax.xlane.f32.xlu1 %v839_v60  ;;  %v4720_v62 = vpop.f32.mrf.mxu1  ;;  %843 = vmax.xlane.f32.xlu0 %v842_v61 }
 0x41d   : > { %846 = vmax.xlane.f32.xlu1 %v845_v63 }
 0x42e   : > { %5146 = vrot.lane.b32.xlu1 %v5657_v4, %s5524_s23 }
 0x42f   : > { %5141 = vrot.lane.b32.xlu0 %v5657_v4, %s5525_s24 }
 0x48e   : > { %v825_v1 = vpop.xlane.xlu1 %824 }
 0x48f   : > { %v848_v2 = vsub.f32 %v674_v38, %v825_v1 }
 0x491   : > { %v856_v3 = vmul.f32 1.442695, %v848_v2 }
 0x492   : > { %v829_v5 = vpop.xlane.xlu0 %828 }
 0x493   : > { %5307 = vpow2.f32 %v856_v3  ;;  %v849_v6 = vsub.f32 %v677_v41, %v829_v5 }
 0x495   : > { %v858_v7 = vmul.f32 1.442695, %v849_v6 }
 0x496   : > { %v832_v8 = vpop.xlane.xlu0 %831 }
 0x497   : > { %5309 = vpow2.f32 %v858_v7  ;;  %v850_v13 = vsub.f32 %v721_v45, %v832_v8 }
 0x499   : > { %v860_v23 = vmul.f32 1.442695, %v850_v13 }
 0x49a   : > { %v835_v9 = vpop.xlane.xlu1 %834 }
 0x49b   : > { %v851_v18 = vsub.f32 %v724_v50, %v835_v9 }
 0x49d   : > { %v862_v31 = vmul.f32 1.442695, %v851_v18 }
 0x49e   : > { %v838_v10 = vpop.xlane.xlu0 %837 }
 0x49f   : > { %v852_v24 = vsub.f32 %v768_v54, %v838_v10 }
 0x4a0   : > { %v5705_v11 = vpop.eup %5307 }
 0x4a1   : > { %v872_v12 = vsel %vm822_vm7, %v5705_v11, 0.0  ;;  %v864_v35 = vmul.f32 1.442695, %v852_v24 }
 0x4a2   : > { %v841_v14 = vpop.xlane.xlu1 %840  ;;  %873 = vadd.xlane.f32.xlu0 %v872_v12  ;;  %v844_v15 = vpop.xlane.xlu0 %843 }
 0x4a3   : > { %v854_v16 = vsub.f32 %v815_v44, %v844_v15  ;;  %v853_v32 = vsub.f32 %v771_v59, %v841_v14 }
 0x4a4   : > { %v5709_v17 = vpop.eup %5309 }
 0x4a5   : > { %v868_v19 = vmul.f32 1.442695, %v854_v16  ;;  %v875_v20 = vsel %vm826_vm8, %v5709_v17, 0.0  ;;  %v866_v40 = vmul.f32 1.442695, %v853_v32 }
 0x4a6   : > { %v5142_v25 = vpop.permute.xlu0 %5141  ;;  %876 = vadd.xlane.f32.xlu1 %v875_v20  ;;  %v847_v26 = vpop.xlane.xlu1 %846 }
 0x4a7   : > { %v5144_v27 = vunpack.i.h.bf16 %v5142_v25  ;;  %v5143_v28 = vunpack.i.l.bf16 %v5142_v25  ;;  %v855_v29 = vsub.f32 %v818_v49, %v847_v26  ;;  %5311 = vpow2.f32 %v868_v19 }
 0x4a8   : > { %5313 = vpow2.f32 %v860_v23 }
 0x4a9   : > { %v629_v33 = vpack.c.bf16 %v5144_v27, %v5143_v28  ;;  %v870_v34 = vmul.f32 1.442695, %v855_v29 }
 0x4aa   : > { %v5147_v36 = vpop.permute.xlu1 %5146 }
 0x4ab   : > { %5315 = vpow2.f32 %v870_v34  ;;  %v5149_v37 = vunpack.i.h.bf16 %v5147_v36  ;;  %v5148_v38 = vunpack.i.l.bf16 %v5147_v36  ;;  %v924_v39 = vand.u32 %v5714_v30, %v629_v33 }
 0x4ac   : > { %5317 = vpow2.f32 %v862_v31 }
 0x4ad   : > { %v630_v41 = vpack.c.bf16 %v5149_v37, %v5148_v38  ;;  %4728 = vmatpush3.bf16.msra.mxu1 %v924_v39  ;;  %5319 = vpow2.f32 %v864_v35  ;;  %v5257_v38 = vld [vmem:[#allocation4 + $0xb0] sm:$0xff]  }
 0x4ae   : > { %4739 = vmatprep.subr.bf16.mxu1 %v5515_v0  ;;  %5321 = vpow2.f32 %v866_v40 }
 0x4af   : > { %v971_v42 = vand.u32 %v5714_v30, %v630_v41 }
 0x4b1   : > { %4734 = vmatpush3.bf16.msra.mxu0 %v971_v42  ;;  %v5258_v42 = vld [vmem:[#allocation4 + $0xa8] sm:$0xff]  }
 0x4b2   : > { %4745 = vmatprep.subr.bf16.mxu0 %v5515_v0 }
 0x4b4   : > { %v5720_v43 = vpop.eup %5311 }
 0x4b5   : > { %v890_v44 = vsel %vm822_vm7, %v5720_v43, 0.0  ;;  %v5314_v45 = vpop.eup %5313 }
 0x4b6   : > { %891 = vadd.xlane.f32.xlu0 %v890_v44  ;;  %v878_v49 = vsel %vm822_vm7, %v5314_v45, 0.0 }
 0x4b8   : > { %v5724_v46 = vpop.eup %5315 }
 0x4b9   : > { %v893_v47 = vsel %vm826_vm8, %v5724_v46, 0.0  ;;  %v5318_v48 = vpop.eup %5317 }
 0x4ba   : > { %894 = vadd.xlane.f32.xlu1 %v893_v47  ;;  %v5320_v50 = vpop.eup %5319  ;;  %879 = vadd.xlane.f32.xlu0 %v878_v49  ;;  %v881_v51 = vsel %vm826_vm8, %v5318_v48, 0.0 }
 0x4bb   : > { %v5322_v52 = vpop.eup %5321  ;;  %v884_v53 = vsel %vm822_vm7, %v5320_v50, 0.0 }
 0x4bc   : > { %v887_v54 = vsel %vm826_vm8, %v5322_v52, 0.0 }
 0x4be   : > { %882 = vadd.xlane.f32.xlu1 %v881_v51  ;;  %885 = vadd.xlane.f32.xlu0 %v884_v53 }
 0x4c2   : > { %888 = vadd.xlane.f32.xlu1 %v887_v54 }
 0x4d3   : > { %5151 = vrot.lane.b32.xlu1 %v5657_v4, %s5527_s25 }
 0x4d4   : > { %5156 = vrot.lane.b32.xlu0 %v5657_v4, %s5528_s26 }
 0x52b   : > { %v874_v57 = vpop.xlane.xlu0 %873 }
 0x52c   : > { %5323 = vrcp.f32 %v874_v57 }
 0x52f   : > { %v877_v58 = vpop.xlane.xlu1 %876 }
 0x530   : > { %5325 = vrcp.f32 %v877_v58 }
 0x539   : > { %v5324_v59 = vpop.eup %5323 }
 0x53a   : > { %v904_v61 = vmul.f32 %v5324_v59, %v5705_v11 }
 0x53d   : > { %v5326_v60 = vpop.eup %5325 }
 0x53e   : > { %v905_v62 = vmul.f32 %v5326_v60, %v5709_v17 }
 0x53f   : > { %v892_v63 = vpop.xlane.xlu0 %891 }
 0x540   : > { %v912_v1 = vpack.c.bf16 %v905_v62, %v904_v61 }
 0x542   : > { %4730 = vmatmul.mubr.msk.bf16.vlgmr.msra.gmra.mxu1 %vm822_vm7, %v912_v1 }
 0x543   : > { %v895_v2 = vpop.xlane.xlu1 %894  ;;  %4741 = vmatprep.mubr.msk.bf16.mxu1 %vm5516_vm0, %v5515_v0  ;;  %v880_v3 = vpop.xlane.xlu0 %879 }
 0x544   : > { %5327 = vrcp.f32 %v880_v3 }
 0x547   : > { %v883_v4 = vpop.xlane.xlu1 %882  ;;  %v886_v5 = vpop.xlane.xlu0 %885 }
 0x548   : > { %5329 = vrcp.f32 %v883_v4 }
 0x549   : > { %5331 = vrcp.f32 %v886_v5 }
 0x54a   : > { %5333 = vrcp.f32 %v895_v2 }
 0x54b   : > { %v889_v6 = vpop.xlane.xlu1 %888  ;;  %v5157_v7 = vpop.permute.xlu0 %5156 }
 0x54c   : > { %5335 = vrcp.f32 %v889_v6  ;;  %v5159_v11 = vunpack.i.h.bf16 %v5157_v7  ;;  %v5158_v12 = vunpack.i.l.bf16 %v5157_v7 }
 0x54d   : > { %5337 = vrcp.f32 %v892_v63 }
 0x54e   : > { %v632_v17 = vpack.c.bf16 %v5159_v11, %v5158_v12 }
 0x54f   : > { %v5152_v8 = vpop.permute.xlu1 %5151 }
 0x550   : > { %v5154_v9 = vunpack.i.h.bf16 %v5152_v8  ;;  %v5153_v10 = vunpack.i.l.bf16 %v5152_v8  ;;  %v1065_v24 = vand.u32 %v5714_v30, %v632_v17 }
 0x551   : > { %v5328_v14 = vpop.eup %5327 }
 0x552   : > { %v631_v13 = vpack.c.bf16 %v5154_v9, %v5153_v10  ;;  %v906_v18 = vmul.f32 %v5328_v14, %v5314_v45  ;;  %v4394_v9 = vld [vmem:[#allocation2 + $0x170] ss:$0 sm:$0xff] }
 0x554   : > { %v1018_v15 = vand.u32 %v5714_v30, %v631_v13 }
 0x555   : > { %v5330_v16 = vpop.eup %5329 }
 0x556   : > { %4740 = vmatpush3.bf16.msra.mxu1 %v1018_v15  ;;  %v907_v19 = vmul.f32 %v5330_v16, %v5318_v48  ;;  %v5332_v20 = vpop.eup %5331 }
 0x557   : > { %4751 = vmatprep.subr.bf16.mxu1 %v5515_v0  ;;  %v5334_v21 = vpop.eup %5333  ;;  %v908_v25 = vmul.f32 %v5332_v20, %v5320_v50 }
 0x558   : > { %v913_v22 = vpack.c.bf16 %v907_v19, %v906_v18  ;;  %v911_v29 = vmul.f32 %v5334_v21, %v5724_v46 }
 0x559   : > { %v5336_v23 = vpop.eup %5335 }
 0x55a   : > { %4736 = vmatmul.mubr.msk.bf16.vlgmr.msra.gmra.mxu0 %vm822_vm7, %v913_v22  ;;  %v909_v26 = vmul.f32 %v5336_v23, %v5322_v52  ;;  %v5338_v27 = vpop.eup %5337 }
 0x55b   : > { %4746 = vmatpush3.bf16.msra.mxu0 %v1065_v24  ;;  %4747 = vmatprep.mubr.msk.bf16.mxu0 %vm5516_vm0, %v5515_v0  ;;  %v910_v31 = vmul.f32 %v5338_v27, %v5720_v43 }
 0x55c   : > { %v914_v28 = vpack.c.bf16 %v909_v26, %v908_v25  ;;  %4759 = vmatprep.subr.bf16.mxu0 %v5515_v0 }
 0x55d   : > { %v915_v32 = vpack.c.bf16 %v911_v29, %v910_v31  ;;  %v5259_v31 = vld [vmem:[#allocation4 + $0xc8] sm:$0xff]  }
 0x55e   : > { %4742 = vmatmul.mubr.msk.bf16.vlgmr.msra.gmra.mxu1 %vm822_vm7, %v914_v28 }
 0x55f   : > { %4755 = vmatprep.mubr.msk.bf16.mxu1 %vm5516_vm0, %v5515_v0  ;;  %4752 = vmatpush3.bf16.msra.mxu1 %v5257_v38 }
 0x560   : > { %4753 = vmatprep.subr.bf16.mxu1 %v5515_v0 }
 0x562   : > { %4748 = vmatmul.mubr.msk.bf16.vlgmr.msra.gmra.mxu0 %vm822_vm7, %v915_v32 }
 0x563   : > { %4763 = vmatprep.mubr.msk.bf16.mxu0 %vm5516_vm0, %v5515_v0  ;;  %4754 = vmatpush3.bf16.msra.mxu1 %v5258_v42 }
 0x564   : > { %4767 = vmatprep.subr.bf16.mxu1 %v5515_v0  ;;  %4760 = vmatpush3.bf16.msra.mxu0 %v5259_v31 }
 0x565   : > { %4761 = vmatprep.subr.bf16.mxu0 %v5515_v0 }
 0x602   : > { %v960_v33 = vpop.f32.mrf.mxu1 }
 0x604   : > { %v4731_v34 = vpop.f32.mrf.mxu1 }
 0x606   : > { %v963_v35 = vpop.f32.mrf.mxu1 }
 0x608   : > { %v4732_v36 = vpop.f32.mrf.mxu1 }
 0x61a   : > { %v1007_v37 = vpop.f32.mrf.mxu0 }
 0x61c   : > { %v4737_v39 = vpop.f32.mrf.mxu0 }
 0x61e   : > { %v1010_v40 = vpop.f32.mrf.mxu0  ;;  %v1054_v41 = vpop.f32.mrf.mxu1 }
 0x61f   : > { %v5160_v43 = vpack.i.bf16 %v1010_v40, %v1007_v37  ;;  %v4398_v40 = vld [vmem:[#allocation2 + $0x200] ss:$0 sm:$0xff] }
 0x620   : > { %v4738_v44 = vpop.f32.mrf.mxu0  ;;  %v4743_v45 = vpop.f32.mrf.mxu1 }
 0x621   : > { %5161 = vrot.lane.b32.xlu1 %v5160_v43, %s5529_s27  ;;  %v4399_v44 = vld [vmem:[#allocation2 + $0x210] ss:$0 sm:$0xff] }
 0x622   : > { %v1057_v46 = vpop.f32.mrf.mxu1  ;;  %v1101_v47 = vpop.f32.mrf.mxu0 }
 0x623   : > { %v5165_v48 = vpack.i.bf16 %v1057_v46, %v1054_v41 }
 0x624   : > { %v4744_v49 = vpop.f32.mrf.mxu1  ;;  %v4749_v50 = vpop.f32.mrf.mxu0 }
 0x625   : > { %5166 = vrot.lane.b32.xlu0 %v5165_v48, %s5530_s28  ;;  %v5261_v49 = vld [vmem:[#allocation4 + $0xf0] sm:$0xff]   ;;  %v5262_v50 = vld [vmem:[#allocation4 + $0xe8] sm:$0xff]  }
 0x626   : > { %v1104_v51 = vpop.f32.mrf.mxu0 }
 0x627   : > { %v5170_v52 = vpack.i.bf16 %v1104_v51, %v1101_v47  ;;  %v5263_v51 = vld [vmem:[#allocation4 + $0xe0] sm:$0xff]  }
 0x628   : > { %v4750_v53 = vpop.f32.mrf.mxu0 }
 0x629   : > { %5171 = vrot.lane.b32.xlu1 %v5170_v52, %s5531_s29  ;;  %v5264_v52 = vld [vmem:[#allocation4 + $0xd8] sm:$0xff]   ;;  %v4400_v53 = vld [vmem:[#allocation2 + $0x1a0] ss:$0 sm:$0xff] }
 0x693   : > { %v5162_v54 = vpop.permute.xlu1 %5161 }
 0x694   : > { %v5164_v58 = vunpack.i.h.bf16 %v5162_v54  ;;  %v5163_v59 = vunpack.i.l.bf16 %v5162_v54 }
 0x696   : > { %v1133_v63 = vsel %vm633_vm6, %v963_v35, %v5164_v58  ;;  %v1132_v1 = vsel %vm633_vm6, %v960_v33, %v5163_v59 }
 0x697   : > { %v5167_v57 = vpop.permute.xlu0 %5166 }
 0x698   : > { %v5169_v60 = vunpack.i.h.bf16 %v5167_v57  ;;  %v5168_v61 = vunpack.i.l.bf16 %v5167_v57 }
 0x69a   : > { %v1135_v4 = vsel %vm1134_vm11, %v1132_v1, %v5168_v61  ;;  %v1136_v5 = vsel %vm1134_vm11, %v1133_v63, %v5169_v60 }
 0x69b   : > { %v5172_v62 = vpop.permute.xlu1 %5171 }
 0x69c   : > { %v5174_v2 = vunpack.i.h.bf16 %v5172_v62  ;;  %v5173_v3 = vunpack.i.l.bf16 %v5172_v62 }
 0x69e   : > { %v1139_v6 = vsel %vm1137_vm12, %v1136_v5, %v5174_v2  ;;  %v1138_v7 = vsel %vm1137_vm12, %v1135_v4, %v5173_v3 }
 0x69f   : > { %v1144_v8 = vpack.c.bf16 %v1139_v6, %v1138_v7 }
 0x6a1   : > { %4756 = vmatmul.mubr.msk.bf16.vlgmr.msra.gmra.mxu1 %vm313_vm1, %v1144_v8 }
 0x6a2   : > { %4775 = vmatprep.mubr.msk.bf16.mxu1 %vm5516_vm0, %v5515_v0  ;;  %4768 = vmatpush3.bf16.msra.mxu1 %v5261_v49  ;;  %v4410_v49 = vld [vmem:[#allocation2 + $0x220] ss:$0 sm:$0xff] }
 0x6a3   : > { %4769 = vmatprep.subr.bf16.mxu1 %v5515_v0 }
 0x6a6   : > { %4770 = vmatpush3.bf16.msra.mxu1 %v5262_v50 }
 0x6a7   : > { %4771 = vmatprep.subr.bf16.mxu1 %v5515_v0 }
 0x6aa   : > { %4772 = vmatpush3.bf16.msra.mxu1 %v5263_v51 }
 0x6ab   : > { %4773 = vmatprep.subr.bf16.mxu1 %v5515_v0 }
 0x6ae   : > { %4774 = vmatpush3.bf16.msra.mxu1 %v5264_v52 }
 0x6af   : > { %4793 = vmatprep.subr.bf16.mxu1 %v5515_v0 }
 0x761   : > { %v1199_v10 = vpop.f32.mrf.mxu1 }
 0x762   : > { %v1200_v11 = vadd.f32 %v4394_v9, %v1199_v10 }
 0x763   : > { %v4757_v12 = vpop.f32.mrf.mxu1 }
 0x764   : > { %v1206_v13 = vadd.f32 %v1200_v11, %v5648_v55 }
 0x765   : > { %v1202_v14 = vpop.f32.mrf.mxu1 }
 0x766   : > { %v1203_v15 = vadd.f32 %v4394_v9, %v1202_v14  ;;  %v1210_v16 = vsel %vm313_vm1, %v1206_v13, 0.0 }
 0x767   : > { %1211 = vadd.xlane.f32.xlu0 %v1210_v16  ;;  %v4758_v17 = vpop.f32.mrf.mxu1 }
 0x768   : > { %v1207_v18 = vadd.f32 %v1203_v15, %v5650_v56  ;;  %v5260_v56 = vld [vmem:[#allocation4 + $0xc0] sm:$0xff]  }
 0x769   : > { %4762 = vmatpush3.bf16.msra.mxu0 %v5260_v56 }
 0x76a   : > { %v1214_v19 = vsel %vm1213_vm13, %v1207_v18, 0.0  ;;  %4779 = vmatprep.subr.bf16.mxu0 %v5515_v0 }
 0x76b   : > { %1215 = vadd.xlane.f32.xlu1 %v1214_v19 }
 0x7f0   : > { %v1212_v20 = vpop.xlane.xlu0 %1211 }
 0x7f1   : > { %v1218_v21 = vmul.f32 0.03125, %v1212_v20 }
 0x7f3   : > { %v1220_v22 = vsub.f32 %v1206_v13, %v1218_v21 }
 0x7f4   : > { %v1216_v23 = vpop.xlane.xlu1 %1215 }
 0x7f5   : > { %v1219_v24 = vmul.f32 0.03125, %v1216_v23  ;;  %v1222_v25 = vmul.f32 %v1220_v22, %v1220_v22 }
 0x7f7   : > { %v1221_v26 = vsub.f32 %v1207_v18, %v1219_v24  ;;  %v1224_v27 = vsel %vm313_vm1, %v1222_v25, 0.0  ;;  %v4404_v18 = vld [vmem:[#allocation2 + $0x1f0] ss:$0 sm:$0xff] }
 0x7f8   : > { %1225 = vadd.xlane.f32.xlu0 %v1224_v27 }
 0x7f9   : > { %v1223_v28 = vmul.f32 %v1221_v26, %v1221_v26 }
 0x7fb   : > { %v1227_v29 = vsel %vm1213_vm13, %v1223_v28, 0.0 }
 0x7fc   : > { %1228 = vadd.xlane.f32.xlu0 %v1227_v29 }
 0x881   : > { %v1226_v32 = vpop.xlane.xlu0 %1225 }
 0x882   : > { %v1230_v33 = vmul.f32 0.03125, %v1226_v32 }
 0x884   : > { %v1232_v34 = vadd.f32 1e-05, %v1230_v33 }
 0x885   : > { %v1229_v35 = vpop.xlane.xlu0 %1228 }
 0x886   : > { %5339 = vrsqrt.f32 %v1232_v34  ;;  %v1231_v36 = vmul.f32 0.03125, %v1229_v35 }
 0x888   : > { %v1233_v37 = vadd.f32 1e-05, %v1231_v36 }
 0x88a   : > { %5341 = vrsqrt.f32 %v1233_v37 }
 0x893   : > { %v5340_v38 = vpop.eup %5339 }
 0x894   : > { %v1236_v39 = vmul.f32 %v5340_v38, %v1220_v22 }
 0x896   : > { %v1242_v43 = vmul.f32 %v4398_v40, %v1236_v39  ;;  %v5265_v39 = vld [vmem:[#allocation4 + $0x128] sm:$0xff]  }
 0x897   : > { %v5342_v41 = vpop.eup %5341 }
 0x898   : > { %v1237_v42 = vmul.f32 %v5342_v41, %v1221_v26  ;;  %v1248_v46 = vadd.f32 %v4399_v44, %v1242_v43 }
 0x89a   : > { %v1243_v45 = vmul.f32 %v4398_v40, %v1237_v42  ;;  %v5266_v40 = vld [vmem:[#allocation4 + $0x120] sm:$0xff]  }
 0x89c   : > { %v1249_v47 = vadd.f32 %v4399_v44, %v1243_v45 }
 0x89e   : > { %v1254_v48 = vpack.c.bf16 %v1249_v47, %v1248_v46 }
 0x8a0   : > { %4764 = vmatmul.mubr.msk.bf16.vlgmr.msra.gmra.mxu0 %vm313_vm1, %v1254_v48 }
 0x8a1   : > { %4783 = vmatprep.mubr.msk.bf16.mxu0 %vm5516_vm0, %v5515_v0  ;;  %4780 = vmatpush3.bf16.msra.mxu0 %v5265_v39 }
 0x8a2   : > { %4781 = vmatprep.subr.bf16.mxu0 %v5515_v0 }
 0x8a5   : > { %4782 = vmatpush3.bf16.msra.mxu0 %v5266_v40 }
 0x8a6   : > { %4787 = vmatprep.subr.bf16.mxu0 %v5515_v0 }
 0x960   : > { %v1309_v54 = vpop.f32.mrf.mxu0 }
 0x961   : > { %v1310_v57 = vadd.f32 %v4400_v53, %v1309_v54 }
 0x962   : > { %v4765_v58 = vpop.f32.mrf.mxu0 }
 0x963   : > { %v1316_v59 = vmul.f32 %v1310_v57, %v1310_v57 }
 0x964   : > { %v1312_v60 = vpop.f32.mrf.mxu0 }
 0x965   : > { %v1318_v61 = vmul.f32 %v1316_v59, %v1310_v57  ;;  %v1313_v62 = vadd.f32 %v4400_v53, %v1312_v60  ;;  %v4411_v53 = vld [vmem:[#allocation2 + $0x230] ss:$0 sm:$0xff] }
 0x966   : > { %v4766_v63 = vpop.f32.mrf.mxu0 }
 0x967   : > { %v1320_v1 = vmul.f32 0.044715, %v1318_v61  ;;  %v1317_v2 = vmul.f32 %v1313_v62, %v1313_v62  ;;  %v4412_v61 = vld [vmem:[#allocation2 + $0x260] ss:$0 sm:$0xff] }
 0x969   : > { %v1322_v3 = vadd.f32 %v1320_v1, %v1310_v57  ;;  %v1319_v4 = vmul.f32 %v1317_v2, %v1313_v62 }
 0x96b   : > { %v1324_v5 = vmul.f32 0.7978846, %v1322_v3  ;;  %v1321_v6 = vmul.f32 0.044715, %v1319_v4 }
 0x96d   : > { %5343 = vtanh.f32 %v1324_v5  ;;  %v1323_v7 = vadd.f32 %v1321_v6, %v1313_v62 }
 0x96f   : > { %v1325_v8 = vmul.f32 0.7978846, %v1323_v7 }
 0x971   : > { %5345 = vtanh.f32 %v1325_v8 }
 0x97a   : > { %v5344_v9 = vpop.eup %5343 }
 0x97b   : > { %v1328_v10 = vadd.f32 1.0, %v5344_v9 }
 0x97d   : > { %v1330_v12 = vmul.f32 0.5, %v1328_v10 }
 0x97e   : > { %v5346_v11 = vpop.eup %5345 }
 0x97f   : > { %v1329_v13 = vadd.f32 1.0, %v5346_v11  ;;  %v1332_v15 = vmul.f32 %v1330_v12, %v1310_v57 }
 0x981   : > { %v1331_v14 = vmul.f32 0.5, %v1329_v13 }
 0x983   : > { %v1333_v16 = vmul.f32 %v1331_v14, %v1313_v62 }
 0x985   : > { %v1342_v17 = vpack.c.bf16 %v1333_v16, %v1332_v15 }
 0x987   : > { %4776 = vmatmul.mubr.msk.bf16.vlgmr.msra.gmra.mxu1 %vm1372_vm14, %v1342_v17 }
 0x988   : > { %4795 = vmatprep.mubr.msk.bf16.mxu1 %vm5516_vm0, %v5515_v0 }
 0xa47   : > { %v1410_v19 = vpop.f32.mrf.mxu1 }
 0xa48   : > { %v1411_v20 = vadd.f32 %v4404_v18, %v1410_v19 }
 0xa49   : > { %v4777_v21 = vpop.f32.mrf.mxu1 }
 0xa4a   : > { %v1417_v22 = vadd.f32 %v1411_v20, %v1248_v46 }
 0xa4b   : > { %v1413_v23 = vpop.f32.mrf.mxu1 }
 0xa4c   : > { %v1414_v24 = vadd.f32 %v4404_v18, %v1413_v23  ;;  %v1421_v25 = vsel %vm313_vm1, %v1417_v22, 0.0 }
 0xa4d   : > { %1422 = vadd.xlane.f32.xlu1 %v1421_v25  ;;  %v4778_v26 = vpop.f32.mrf.mxu1 }
 0xa4e   : > { %v1418_v27 = vadd.f32 %v1414_v24, %v1249_v47 }
 0xa50   : > { %v1424_v28 = vsel %vm1213_vm13, %v1418_v27, 0.0 }
 0xa51   : > { %1425 = vadd.xlane.f32.xlu0 %v1424_v28 }
 0xad6   : > { %v1423_v29 = vpop.xlane.xlu1 %1422 }
 0xad7   : > { %v1427_v31 = vmul.f32 0.03125, %v1423_v29 }
 0xad9   : > { %v1429_v56 = vsub.f32 %v1417_v22, %v1427_v31 }
 0xada   : > { %v1426_v32 = vpop.xlane.xlu0 %1425 }
 0xadb   : > { %v1428_v33 = vmul.f32 0.03125, %v1426_v32  ;;  %v1431_v34 = vmul.f32 %v1429_v56, %v1429_v56 }
 0xadd   : > { %v1430_v35 = vsub.f32 %v1418_v27, %v1428_v33  ;;  %v1433_v36 = vsel %vm313_vm1, %v1431_v34, 0.0 }
 0xade   : > { %1434 = vadd.xlane.f32.xlu1 %v1433_v36 }
 0xadf   : > { %v1432_v37 = vmul.f32 %v1430_v35, %v1430_v35 }
 0xae1   : > { %v1436_v38 = vsel %vm1213_vm13, %v1432_v37, 0.0 }
 0xae2   : > { %1437 = vadd.xlane.f32.xlu0 %v1436_v38 }
 0xb67   : > { %v1435_v41 = vpop.xlane.xlu1 %1434 }
 0xb68   : > { %v1439_v42 = vmul.f32 0.03125, %v1435_v41 }
 0xb6a   : > { %v1441_v43 = vadd.f32 1e-05, %v1439_v42 }
 0xb6b   : > { %v1438_v44 = vpop.xlane.xlu0 %1437 }
 0xb6c   : > { %5347 = vrsqrt.f32 %v1441_v43  ;;  %v1440_v45 = vmul.f32 0.03125, %v1438_v44 }
 0xb6e   : > { %v1442_v46 = vadd.f32 1e-05, %v1440_v45 }
 0xb70   : > { %5349 = vrsqrt.f32 %v1442_v46 }
 0xb79   : > { %v5348_v47 = vpop.eup %5347 }
 0xb7a   : > { %v1445_v48 = vmul.f32 %v5348_v47, %v1429_v56 }
 0xb7c   : > { %v1451_v52 = vmul.f32 %v4410_v49, %v1445_v48 }
 0xb7d   : > { %v5350_v50 = vpop.eup %5349 }
 0xb7e   : > { %v1446_v51 = vmul.f32 %v5350_v50, %v1430_v35  ;;  %v5794_v57 = vadd.f32 %v4411_v53, %v1451_v52 }
 0xb80   : > { %v1452_v54 = vmul.f32 %v4410_v49, %v1446_v51 }
 0xb82   : > { %v5796_v58 = vadd.f32 %v4411_v53, %v1452_v54 }
 0xb84   : > { %v1463_v59 = vpack.c.bf16 %v5796_v58, %v5794_v57 }
 0xb86   : > { %4784 = vmatmul.mubr.msk.bf16.vlgmr.msra.gmra.mxu0 %vm313_vm1, %v1463_v59 }
 0xb87   : > { %4789 = vmatprep.mubr.msk.bf16.mxu0 %vm5516_vm0, %v5515_v0 }
 0xc46   : > { %v1518_v60 = vpop.f32.mrf.mxu0 }
 0xc47   : > { %v1519_v1 = vadd.f32 %v4412_v61, %v1518_v60 }
 0xc48   : > { %v4785_v62 = vpop.f32.mrf.mxu0 }
 0xc4a   : > { %v1521_v63 = vpop.f32.mrf.mxu0 }
 0xc4b   : > { %v1522_v2 = vadd.f32 %v4412_v61, %v1521_v63 }
 0xc4c   : > { %v4786_v3 = vpop.f32.mrf.mxu0 }
 0xc4d   : > { %v5803_v4 = vpack.i.bf16 %v1522_v2, %v1519_v1  ;;  %v1593_v5 = vpack.c.bf16 %v1522_v2, %v1519_v1 }
 0xc4f   : > { %5181 = vrot.lane.b32.xlu0 %v5803_v4, %s5520_s19  ;;  %5176 = vrot.lane.b32.xlu1 %v5803_v4, %s5518_s16 }
 0xc53   : > { %5196 = vrot.lane.b32.xlu0 %v5803_v4, %s5522_s21  ;;  %5186 = vrot.lane.b32.xlu1 %v5803_v4, %s5519_s17 }
 0xc57   : > { %5206 = vrot.lane.b32.xlu0 %v5803_v4, %s5523_s22  ;;  %5191 = vrot.lane.b32.xlu1 %v5803_v4, %s5517_s14 }
 0xc5b   : > { %5201 = vrot.lane.b32.xlu1 %v5803_v4, %s5521_s20 }
 0xcc1   : > { %v5182_v6 = vpop.permute.xlu0 %5181  ;;  %v5177_v7 = vpop.permute.xlu1 %5176 }
 0xcc2   : > { %v5184_v8 = vunpack.i.h.bf16 %v5182_v6  ;;  %v5183_v9 = vunpack.i.l.bf16 %v5182_v6  ;;  %v5179_v10 = vunpack.i.h.bf16 %v5177_v7  ;;  %v5178_v11 = vunpack.i.l.bf16 %v5177_v7 }
 0xcc4   : > { %v1598_v12 = vpack.c.bf16 %v5184_v8, %v5183_v9  ;;  %v1597_v13 = vpack.c.bf16 %v5179_v10, %v5178_v11 }
 0xcc5   : > { %v5197_v14 = vpop.permute.xlu0 %5196  ;;  %v5187_v15 = vpop.permute.xlu1 %5186 }
 0xcc6   : > { %v5199_v16 = vunpack.i.h.bf16 %v5197_v14  ;;  %v5198_v17 = vunpack.i.l.bf16 %v5197_v14  ;;  %v5189_v18 = vunpack.i.h.bf16 %v5187_v15  ;;  %v5188_v19 = vunpack.i.l.bf16 %v5187_v15 }
 0xcc7   : > { %v1609_v20 = vsel %vm633_vm6, %v1597_v13, 0  ;;  %v1656_v21 = vsel %vm633_vm6, %v1598_v12, 0 }
 0xcc8   : > { %4788 = vmatpush3.bf16.xpose.msra.mxu0 %v1609_v20  ;;  %4794 = vmatpush3.bf16.xpose.msra.mxu1 %v1656_v21  ;;  %v1600_v25 = vpack.c.bf16 %v5199_v16, %v5198_v17  ;;  %v1599_v26 = vpack.c.bf16 %v5189_v18, %v5188_v19 }
 0xcc9   : > { %v5192_v22 = vpop.permute.xlu1 %5191  ;;  %4799 = vmatprep.subr.bf16.mxu0 %v5515_v0  ;;  %4805 = vmatprep.subr.bf16.mxu1 %v5515_v0  ;;  %v5207_v28 = vpop.permute.xlu0 %5206 }
 0xcca   : > { %v5194_v23 = vunpack.i.h.bf16 %v5192_v22  ;;  %v5193_v24 = vunpack.i.l.bf16 %v5192_v22  ;;  %v1703_v31 = vsel %vm633_vm6, %v1599_v26, 0  ;;  %v1750_v56 = vsel %vm633_vm6, %v1600_v25, 0 }
 0xccb   : > { %v5209_v32 = vunpack.i.h.bf16 %v5207_v28  ;;  %v5208_v33 = vunpack.i.l.bf16 %v5207_v28 }
 0xccc   : > { %v1594_v27 = vpack.c.bf16 %v5194_v23, %v5193_v24 }
 0xccd   : > { %v5202_v29 = vpop.permute.xlu1 %5201  ;;  %v1596_v36 = vpack.c.bf16 %v5209_v32, %v5208_v33 }
 0xcce   : > { %v5204_v34 = vunpack.i.h.bf16 %v5202_v29  ;;  %v5203_v35 = vunpack.i.l.bf16 %v5202_v29 }
 0xccf   : > { %4790 = vmatmul.mubr.msk.bf16.vlgmr.msra.gmra.mxu0 %vm633_vm6, %v1593_v5  ;;  %4796 = vmatmul.mubr.msk.bf16.vlgmr.msra.gmra.mxu1 %vm633_vm6, %v1594_v27 }
 0xcd0   : > { %4800 = vmatpush3.bf16.xpose.msra.mxu0 %v1703_v31  ;;  %4806 = vmatpush3.bf16.xpose.msra.mxu1 %v1750_v56  ;;  %v1595_v37 = vpack.c.bf16 %v5204_v34, %v5203_v35 }
 0xcd1   : > { %4801 = vmatprep.mubr.msk.bf16.mxu0 %vm5516_vm0, %v5515_v0  ;;  %4807 = vmatprep.mubr.msk.bf16.mxu1 %vm5516_vm0, %v5515_v0 }
 0xcd2   : > { %4811 = vmatprep.subr.bf16.mxu0 %v5515_v0  ;;  %4817 = vmatprep.subr.bf16.mxu1 %v5515_v0 }
 0xcd7   : > { %4802 = vmatmul.mubr.msk.bf16.vlgmr.msra.gmra.mxu0 %vm633_vm6, %v1595_v37  ;;  %4808 = vmatmul.mubr.msk.bf16.vlgmr.msra.gmra.mxu1 %vm633_vm6, %v1596_v36 }
 0xcd8   : > { %4813 = vmatprep.mubr.msk.bf16.mxu0 %vm5516_vm0, %v5515_v0  ;;  %4819 = vmatprep.mubr.msk.bf16.mxu1 %vm5516_vm0, %v5515_v0 }
 0xd8f   : > { %v1645_v38 = vpop.f32.mrf.mxu0  ;;  %v1692_v39 = vpop.f32.mrf.mxu1 }
 0xd90   : > { %v1793_v40 = vsel %vm822_vm7, %v1645_v38, -inf  ;;  %v1799_v51 = vsel %vm822_vm7, %v1692_v39, -inf }
 0xd91   : > { %v4797_v41 = vpop.f32.mrf.mxu1  ;;  %1794 = vmax.xlane.f32.xlu1 %v1793_v40  ;;  %v4791_v42 = vpop.f32.mrf.mxu0 }
 0xd93   : > { %v1648_v43 = vpop.f32.mrf.mxu0  ;;  %v1695_v44 = vpop.f32.mrf.mxu1 }
 0xd94   : > { %v1802_v45 = vsel %vm826_vm8, %v1695_v44, -inf  ;;  %v1796_v46 = vsel %vm826_vm8, %v1648_v43, -inf }
 0xd95   : > { %v4798_v47 = vpop.f32.mrf.mxu1  ;;  %1803 = vmax.xlane.f32.xlu1 %v1802_v45  ;;  %1797 = vmax.xlane.f32.xlu0 %v1796_v46  ;;  %v4792_v48 = vpop.f32.mrf.mxu0 }
 0xd97   : > { %v1739_v49 = vpop.f32.mrf.mxu0  ;;  %v1786_v50 = vpop.f32.mrf.mxu1 }
 0xd98   : > { %v1805_v60 = vsel %vm822_vm7, %v1739_v49, -inf  ;;  %v1811_v1 = vsel %vm822_vm7, %v1786_v50, -inf }
 0xd99   : > { %v4809_v52 = vpop.f32.mrf.mxu1  ;;  %1800 = vmax.xlane.f32.xlu0 %v1799_v51  ;;  %v4803_v53 = vpop.f32.mrf.mxu0 }
 0xd9b   : > { %v1742_v54 = vpop.f32.mrf.mxu0  ;;  %v1789_v59 = vpop.f32.mrf.mxu1 }
 0xd9c   : > { %v1808_v61 = vsel %vm826_vm8, %v1742_v54, -inf  ;;  %v1814_v2 = vsel %vm826_vm8, %v1789_v59, -inf }
 0xd9d   : > { %v4810_v62 = vpop.f32.mrf.mxu1  ;;  %1806 = vmax.xlane.f32.xlu0 %v1805_v60  ;;  %1809 = vmax.xlane.f32.xlu1 %v1808_v61  ;;  %v4804_v63 = vpop.f32.mrf.mxu0 }
 0xda1   : > { %1812 = vmax.xlane.f32.xlu0 %v1811_v1  ;;  %1815 = vmax.xlane.f32.xlu1 %v1814_v2 }
 0xdb2   : > { %5216 = vrot.lane.b32.xlu1 %v5803_v4, %s5524_s23 }
 0xdb7   : > { %5211 = vrot.lane.b32.xlu0 %v5803_v4, %s5525_s24 }
 0xe1a   : > { %v1795_v3 = vpop.xlane.xlu1 %1794 }
 0xe1b   : > { %v1817_v5 = vsub.f32 %v1645_v38, %v1795_v3 }
 0xe1d   : > { %v1825_v6 = vmul.f32 1.442695, %v1817_v5 }
 0xe1e   : > { %v1804_v7 = vpop.xlane.xlu1 %1803  ;;  %v1798_v8 = vpop.xlane.xlu0 %1797 }
 0xe1f   : > { %5351 = vpow2.f32 %v1825_v6  ;;  %v1820_v9 = vsub.f32 %v1695_v44, %v1804_v7  ;;  %v1818_v10 = vsub.f32 %v1648_v43, %v1798_v8 }
 0xe21   : > { %v1827_v11 = vmul.f32 1.442695, %v1818_v10  ;;  %v1831_v12 = vmul.f32 1.442695, %v1820_v9 }
 0xe22   : > { %v1801_v13 = vpop.xlane.xlu0 %1800 }
 0xe23   : > { %v1819_v14 = vsub.f32 %v1692_v39, %v1801_v13  ;;  %5353 = vpow2.f32 %v1827_v11 }
 0xe24   : > { %5355 = vpow2.f32 %v1831_v12 }
 0xe25   : > { %v1829_v15 = vmul.f32 1.442695, %v1819_v14 }
 0xe26   : > { %v1807_v16 = vpop.xlane.xlu0 %1806  ;;  %v1810_v17 = vpop.xlane.xlu1 %1809 }
 0xe27   : > { %5357 = vpow2.f32 %v1829_v15  ;;  %v1821_v18 = vsub.f32 %v1739_v49, %v1807_v16  ;;  %v1822_v19 = vsub.f32 %v1742_v54, %v1810_v17 }
 0xe29   : > { %v1833_v20 = vmul.f32 1.442695, %v1821_v18  ;;  %v1835_v21 = vmul.f32 1.442695, %v1822_v19 }
 0xe2a   : > { %v1813_v22 = vpop.xlane.xlu0 %1812  ;;  %v1816_v23 = vpop.xlane.xlu1 %1815 }
 0xe2b   : > { %5359 = vpow2.f32 %v1833_v20  ;;  %v1823_v24 = vsub.f32 %v1786_v50, %v1813_v22  ;;  %v1824_v25 = vsub.f32 %v1789_v59, %v1816_v23 }
 0xe2c   : > { %v5851_v26 = vpop.eup %5351  ;;  %5361 = vpow2.f32 %v1835_v21 }
 0xe2d   : > { %v1837_v27 = vmul.f32 1.442695, %v1823_v24  ;;  %v1839_v28 = vmul.f32 1.442695, %v1824_v25  ;;  %v1841_v29 = vsel %vm822_vm7, %v5851_v26, 0.0 }
 0xe2e   : > { %1842 = vadd.xlane.f32.xlu0 %v1841_v29  ;;  %v5212_v31 = vpop.permute.xlu0 %5211  ;;  %v5217_v56 = vpop.permute.xlu1 %5216 }
 0xe2f   : > { %5363 = vpow2.f32 %v1837_v27  ;;  %v5214_v32 = vunpack.i.h.bf16 %v5212_v31  ;;  %v5213_v33 = vunpack.i.l.bf16 %v5212_v31  ;;  %v5219_v34 = vunpack.i.h.bf16 %v5217_v56 }
 0xe30   : > { %5365 = vpow2.f32 %v1839_v28  ;;  %v5218_v35 = vunpack.i.l.bf16 %v5217_v56  ;;  %v5354_v36 = vpop.eup %5353 }
 0xe31   : > { %v1601_v37 = vpack.c.bf16 %v5214_v32, %v5213_v33  ;;  %v1844_v39 = vsel %vm826_vm8, %v5354_v36, 0.0  ;;  %v5356_v40 = vpop.eup %5355 }
 0xe32   : > { %v1602_v38 = vpack.c.bf16 %v5219_v34, %v5218_v35  ;;  %1845 = vadd.xlane.f32.xlu1 %v1844_v39  ;;  %v1850_v45 = vsel %vm826_vm8, %v5356_v40, 0.0  ;;  %v5267_v34 = vld [vmem:[#allocation4 + $0x140] sm:$0xff]   ;;  %v5268_v39 = vld [vmem:[#allocation4 + $0x138] sm:$0xff]  }
 0xe33   : > { %v1889_v41 = vand.u32 %v1601_v37, %v5714_v30 }
 0xe34   : > { %v5358_v42 = vpop.eup %5357  ;;  %v1936_v43 = vand.u32 %v1602_v38, %v5714_v30 }
 0xe35   : > { %4812 = vmatpush3.bf16.msra.mxu0 %v1889_v41  ;;  %v1847_v44 = vsel %vm822_vm7, %v5358_v42, 0.0 }
 0xe36   : > { %4818 = vmatpush3.bf16.msra.mxu1 %v1936_v43  ;;  %1848 = vadd.xlane.f32.xlu0 %v1847_v44 }
 0xe37   : > { %1851 = vadd.xlane.f32.xlu1 %v1850_v45  ;;  %4823 = vmatprep.subr.bf16.mxu0 %v5515_v0 }
 0xe38   : > { %v5360_v46 = vpop.eup %5359  ;;  %4829 = vmatprep.subr.bf16.mxu1 %v5515_v0 }
 0xe39   : > { %v5362_v47 = vpop.eup %5361  ;;  %v1853_v48 = vsel %vm822_vm7, %v5360_v46, 0.0 }
 0xe3a   : > { %1854 = vadd.xlane.f32.xlu0 %v1853_v48  ;;  %v1856_v49 = vsel %vm826_vm8, %v5362_v47, 0.0 }
 0xe3b   : > { %1857 = vadd.xlane.f32.xlu1 %v1856_v49 }
 0xe3c   : > { %v5364_v50 = vpop.eup %5363 }
 0xe3d   : > { %v5366_v51 = vpop.eup %5365  ;;  %v1859_v52 = vsel %vm822_vm7, %v5364_v50, 0.0 }
 0xe3e   : > { %1860 = vadd.xlane.f32.xlu0 %v1859_v52  ;;  %v1862_v53 = vsel %vm826_vm8, %v5366_v51, 0.0 }
 0xe3f   : > { %1863 = vadd.xlane.f32.xlu1 %v1862_v53 }
 0xe50   : > { %5221 = vrot.lane.b32.xlu1 %v5803_v4, %s5527_s25 }
 0xe54   : > { %5226 = vrot.lane.b32.xlu0 %v5803_v4, %s5528_s26 }
 0xeb7   : > { %v1843_v54 = vpop.xlane.xlu0 %1842 }
 0xeb8   : > { %5367 = vrcp.f32 %v1843_v54 }
 0xebb   : > { %v1846_v59 = vpop.xlane.xlu1 %1845 }
 0xebc   : > { %5369 = vrcp.f32 %v1846_v59 }
 0xebf   : > { %v1849_v60 = vpop.xlane.xlu0 %1848 }
 0xec0   : > { %5371 = vrcp.f32 %v1849_v60  ;;  %v1852_v61 = vpop.xlane.xlu1 %1851 }
 0xec1   : > { %5373 = vrcp.f32 %v1852_v61 }
 0xec3   : > { %v1855_v62 = vpop.xlane.xlu0 %1854 }
 0xec4   : > { %5375 = vrcp.f32 %v1855_v62  ;;  %v1858_v63 = vpop.xlane.xlu1 %1857 }
 0xec5   : > { %5377 = vrcp.f32 %v1858_v63  ;;  %v5368_v2 = vpop.eup %5367 }
 0xec6   : > { %v1873_v4 = vmul.f32 %v5368_v2, %v5851_v26 }
 0xec7   : > { %v1861_v1 = vpop.xlane.xlu0 %1860 }
 0xec8   : > { %5379 = vrcp.f32 %v1861_v1  ;;  %v1864_v3 = vpop.xlane.xlu1 %1863 }
 0xec9   : > { %5381 = vrcp.f32 %v1864_v3  ;;  %v5370_v5 = vpop.eup %5369 }
 0xeca   : > { %v1874_v7 = vmul.f32 %v5370_v5, %v5354_v36 }
 0xecb   : > { %v5227_v6 = vpop.permute.xlu0 %5226 }
 0xecc   : > { %v5229_v8 = vunpack.i.h.bf16 %v5227_v6  ;;  %v5228_v9 = vunpack.i.l.bf16 %v5227_v6  ;;  %v5222_v10 = vpop.permute.xlu1 %5221  ;;  %v1881_v14 = vpack.c.bf16 %v1874_v7, %v1873_v4 }
 0xecd   : > { %v5372_v11 = vpop.eup %5371  ;;  %v5224_v12 = vunpack.i.h.bf16 %v5222_v10  ;;  %v5223_v13 = vunpack.i.l.bf16 %v5222_v10  ;;  %v4424_v10 = vld [vmem:[#allocation2 + $0x290] ss:$0 sm:$0xff] }
 0xece   : > { %v5374_v15 = vpop.eup %5373  ;;  %v1604_v16 = vpack.c.bf16 %v5229_v8, %v5228_v9  ;;  %v1875_v17 = vmul.f32 %v5372_v11, %v5358_v42  ;;  %4814 = vmatmul.mubr.msk.bf16.vlgmr.msra.gmra.mxu0 %vm822_vm7, %v1881_v14 }
 0xecf   : > { %v1603_v18 = vpack.c.bf16 %v5224_v12, %v5223_v13  ;;  %v1876_v19 = vmul.f32 %v5374_v15, %v5356_v40  ;;  %4825 = vmatprep.mubr.msk.bf16.mxu0 %vm5516_vm0, %v5515_v0 }
 0xed0   : > { %v2030_v20 = vand.u32 %v1604_v16, %v5714_v30 }
 0xed1   : > { %v5376_v21 = vpop.eup %5375  ;;  %v1983_v22 = vand.u32 %v1603_v18, %v5714_v30  ;;  %v1882_v23 = vpack.c.bf16 %v1876_v19, %v1875_v17 }
 0xed2   : > { %v5378_v24 = vpop.eup %5377  ;;  %v1877_v25 = vmul.f32 %v5376_v21, %v5360_v46 }
 0xed3   : > { %4820 = vmatmul.mubr.msk.bf16.vlgmr.msra.gmra.mxu1 %vm822_vm7, %v1882_v23  ;;  %4824 = vmatpush3.bf16.msra.mxu0 %v1983_v22  ;;  %v1878_v26 = vmul.f32 %v5378_v24, %v5362_v47 }
 0xed4   : > { %4830 = vmatpush3.bf16.msra.mxu1 %v2030_v20  ;;  %4831 = vmatprep.mubr.msk.bf16.mxu1 %vm5516_vm0, %v5515_v0 }
 0xed5   : > { %v5380_v27 = vpop.eup %5379  ;;  %v1883_v28 = vpack.c.bf16 %v1878_v26, %v1877_v25  ;;  %4835 = vmatprep.subr.bf16.mxu0 %v5515_v0  ;;  %4843 = vmatprep.subr.bf16.mxu1 %v5515_v0 }
 0xed6   : > { %v5382_v29 = vpop.eup %5381  ;;  %v1879_v31 = vmul.f32 %v5380_v27, %v5364_v50 }
 0xed7   : > { %4826 = vmatmul.mubr.msk.bf16.vlgmr.msra.gmra.mxu0 %vm822_vm7, %v1883_v28  ;;  %v1880_v30 = vmul.f32 %v5382_v29, %v5366_v51 }
 0xed8   : > { %4839 = vmatprep.mubr.msk.bf16.mxu0 %vm5516_vm0, %v5515_v0  ;;  %4836 = vmatpush3.bf16.msra.mxu0 %v5267_v34 }
 0xed9   : > { %v1884_v56 = vpack.c.bf16 %v1880_v30, %v1879_v31  ;;  %4837 = vmatprep.subr.bf16.mxu0 %v5515_v0  ;;  %v5269_v31 = vld [vmem:[#allocation4 + $0x158] sm:$0xff]  }
 0xedb   : > { %4832 = vmatmul.mubr.msk.bf16.vlgmr.msra.gmra.mxu1 %vm822_vm7, %v1884_v56 }
 0xedc   : > { %4847 = vmatprep.mubr.msk.bf16.mxu1 %vm5516_vm0, %v5515_v0  ;;  %4838 = vmatpush3.bf16.msra.mxu0 %v5268_v39 }
 0xedd   : > { %4851 = vmatprep.subr.bf16.mxu0 %v5515_v0  ;;  %4844 = vmatpush3.bf16.msra.mxu1 %v5269_v31 }
 0xede   : > { %4845 = vmatprep.subr.bf16.mxu1 %v5515_v0 }
 0xf8e   : > { %v1925_v32 = vpop.f32.mrf.mxu0 }
 0xf90   : > { %v4815_v33 = vpop.f32.mrf.mxu0 }
 0xf92   : > { %v1928_v35 = vpop.f32.mrf.mxu0 }
 0xf93   : > { %v1972_v36 = vpop.f32.mrf.mxu1 }
 0xf94   : > { %v4816_v37 = vpop.f32.mrf.mxu0 }
 0xf95   : > { %v4821_v38 = vpop.f32.mrf.mxu1 }
 0xf96   : > { %v4428_v38 = vld [vmem:[#allocation2 + $0x320] ss:$0 sm:$0xff] }
 0xf97   : > { %v1975_v40 = vpop.f32.mrf.mxu1  ;;  %v2019_v41 = vpop.f32.mrf.mxu0 }
 0xf98   : > { %v5230_v42 = vpack.i.bf16 %v1975_v40, %v1972_v36 }
 0xf99   : > { %v4822_v43 = vpop.f32.mrf.mxu1  ;;  %v4827_v44 = vpop.f32.mrf.mxu0 }
 0xf9a   : > { %5231 = vrot.lane.b32.xlu1 %v5230_v42, %s5529_s27  ;;  %v4429_v42 = vld [vmem:[#allocation2 + $0x330] ss:$0 sm:$0xff] }
 0xf9b   : > { %v2022_v45 = vpop.f32.mrf.mxu0  ;;  %v2066_v46 = vpop.f32.mrf.mxu1 }
 0xf9c   : > { %v5235_v47 = vpack.i.bf16 %v2022_v45, %v2019_v41 }
 0xf9d   : > { %v4828_v48 = vpop.f32.mrf.mxu0  ;;  %v4833_v49 = vpop.f32.mrf.mxu1 }
 0xf9e   : > { %5236 = vrot.lane.b32.xlu0 %v5235_v47, %s5530_s28  ;;  %v5272_v48 = vld [vmem:[#allocation4 + $0x1b0] sm:$0xff]   ;;  %v2406_v49 = vpack.c.bf16 %v5648_v55, %v5648_v55 }
 0xf9f   : > { %v2069_v50 = vpop.f32.mrf.mxu1 }
 0xfa0   : > { %v5240_v51 = vpack.i.bf16 %v2069_v50, %v2066_v46  ;;  %v5271_v46 = vld [vmem:[#allocation4 + $0x1b8] sm:$0xff]   ;;  %v5273_v50 = vld [vmem:[#allocation4 + $0x180] sm:$0xff]  }
 0xfa1   : > { %v4834_v52 = vpop.f32.mrf.mxu1 }
 0xfa2   : > { %5241 = vrot.lane.b32.xlu1 %v5240_v51, %s5531_s29  ;;  %v5274_v51 = vld [vmem:[#allocation4 + $0x178] sm:$0xff]   ;;  %v5275_v52 = vld [vmem:[#allocation4 + $0x170] sm:$0xff]  }
0x100c   : > { %v5232_v53 = vpop.permute.xlu1 %5231 }
0x100d   : > { %v5234_v59 = vunpack.i.h.bf16 %v5232_v53  ;;  %v5233_v60 = vunpack.i.l.bf16 %v5232_v53  ;;  %v5276_v53 = vld [vmem:[#allocation4 + $0x168] sm:$0xff]  }
0x100f   : > { %v2097_v1 = vsel %vm633_vm6, %v1925_v32, %v5233_v60  ;;  %v2098_v2 = vsel %vm633_vm6, %v1928_v35, %v5234_v59 }
0x1010   : > { %v5237_v54 = vpop.permute.xlu0 %5236 }
0x1011   : > { %v5239_v61 = vunpack.i.h.bf16 %v5237_v54  ;;  %v5238_v62 = vunpack.i.l.bf16 %v5237_v54  ;;  %v4430_v54 = vld [vmem:[#allocation2 + $0x2c0] ss:$0 sm:$0xff] }
0x1013   : > { %v2100_v6 = vsel %vm1134_vm11, %v2098_v2, %v5239_v61  ;;  %v2099_v4 = vsel %vm1134_vm11, %v2097_v1, %v5238_v62 }
0x1014   : > { %v5242_v63 = vpop.permute.xlu1 %5241 }
0x1015   : > { %v5244_v3 = vunpack.i.h.bf16 %v5242_v63  ;;  %v5243_v5 = vunpack.i.l.bf16 %v5242_v63 }
0x1017   : > { %v2101_v7 = vsel %vm1137_vm12, %v2099_v4, %v5243_v5  ;;  %v2102_v8 = vsel %vm1137_vm12, %v2100_v6, %v5244_v3  ;;  %v4442_v5 = vld [vmem:[#allocation2 + $0x380] ss:$0 sm:$0xff] }
0x1018   : > { %v2107_v9 = vpack.c.bf16 %v2102_v8, %v2101_v7 }
0x101a   : > { %4840 = vmatmul.mubr.msk.bf16.vlgmr.msra.gmra.mxu0 %vm313_vm1, %v2107_v9 }
0x101b   : > { %4859 = vmatprep.mubr.msk.bf16.mxu0 %vm5516_vm0, %v5515_v0  ;;  %4852 = vmatpush3.bf16.msra.mxu0 %v5273_v50 }
0x101c   : > { %4853 = vmatprep.subr.bf16.mxu0 %v5515_v0 }
0x101f   : > { %4854 = vmatpush3.bf16.msra.mxu0 %v5274_v51 }
0x1020   : > { %4855 = vmatprep.subr.bf16.mxu0 %v5515_v0 }
0x1023   : > { %4856 = vmatpush3.bf16.msra.mxu0 %v5275_v52 }
0x1024   : > { %4857 = vmatprep.subr.bf16.mxu0 %v5515_v0 }
0x1027   : > { %4858 = vmatpush3.bf16.msra.mxu0 %v5276_v53 }
0x1028   : > { %4877 = vmatprep.subr.bf16.mxu0 %v5515_v0 }
0x10da   : > { %v2162_v11 = vpop.f32.mrf.mxu0 }
0x10db   : > { %v2163_v12 = vadd.f32 %v4424_v10, %v2162_v11 }
0x10dc   : > { %v4841_v13 = vpop.f32.mrf.mxu0 }
0x10dd   : > { %v2169_v14 = vadd.f32 %v2163_v12, %v5794_v57 }
0x10de   : > { %v2165_v15 = vpop.f32.mrf.mxu0 }
0x10df   : > { %v2166_v16 = vadd.f32 %v4424_v10, %v2165_v15  ;;  %v2173_v17 = vsel %vm313_vm1, %v2169_v14, 0.0 }
0x10e0   : > { %2174 = vadd.xlane.f32.xlu0 %v2173_v17  ;;  %v4842_v18 = vpop.f32.mrf.mxu0 }
0x10e1   : > { %v2170_v19 = vadd.f32 %v2166_v16, %v5796_v58  ;;  %v5270_v58 = vld [vmem:[#allocation4 + $0x150] sm:$0xff]  }
0x10e2   : > { %4846 = vmatpush3.bf16.msra.mxu1 %v5270_v58 }
0x10e3   : > { %v2176_v20 = vsel %vm1213_vm13, %v2170_v19, 0.0  ;;  %4863 = vmatprep.subr.bf16.mxu1 %v5515_v0 }
0x10e4   : > { %2177 = vadd.xlane.f32.xlu1 %v2176_v20 }
0x1169   : > { %v2175_v21 = vpop.xlane.xlu0 %2174 }
0x116a   : > { %v2179_v22 = vmul.f32 0.03125, %v2175_v21 }
0x116c   : > { %v2181_v23 = vsub.f32 %v2169_v14, %v2179_v22 }
0x116d   : > { %v2178_v24 = vpop.xlane.xlu1 %2177 }
0x116e   : > { %v2180_v25 = vmul.f32 0.03125, %v2178_v24  ;;  %v2183_v26 = vmul.f32 %v2181_v23, %v2181_v23 }
0x1170   : > { %v2182_v27 = vsub.f32 %v2170_v19, %v2180_v25  ;;  %v2185_v57 = vsel %vm313_vm1, %v2183_v26, 0.0 }
0x1171   : > { %2186 = vadd.xlane.f32.xlu0 %v2185_v57 }
0x1172   : > { %v2184_v28 = vmul.f32 %v2182_v27, %v2182_v27 }
0x1174   : > { %v2188_v29 = vsel %vm1213_vm13, %v2184_v28, 0.0 }
0x1175   : > { %2189 = vadd.xlane.f32.xlu0 %v2188_v29 }
0x11fa   : > { %v2187_v30 = vpop.xlane.xlu0 %2186 }
0x11fb   : > { %v2191_v56 = vmul.f32 0.03125, %v2187_v30 }
0x11fd   : > { %v2193_v32 = vadd.f32 1e-05, %v2191_v56 }
0x11fe   : > { %v2190_v33 = vpop.xlane.xlu0 %2189 }
0x11ff   : > { %5383 = vrsqrt.f32 %v2193_v32  ;;  %v2192_v34 = vmul.f32 0.03125, %v2190_v33 }
0x1201   : > { %v2194_v35 = vadd.f32 1e-05, %v2192_v34 }
0x1203   : > { %5385 = vrsqrt.f32 %v2194_v35 }
0x120c   : > { %v5384_v36 = vpop.eup %5383 }
0x120d   : > { %v2197_v37 = vmul.f32 %v5384_v36, %v2181_v23 }
0x120f   : > { %v2203_v41 = vmul.f32 %v4428_v38, %v2197_v37 }
0x1210   : > { %v5386_v39 = vpop.eup %5385 }
0x1211   : > { %v2198_v40 = vmul.f32 %v5386_v39, %v2182_v27  ;;  %v2209_v44 = vadd.f32 %v4429_v42, %v2203_v41 }
0x1213   : > { %v2204_v43 = vmul.f32 %v4428_v38, %v2198_v40 }
0x1215   : > { %v5909_v45 = vadd.f32 %v4429_v42, %v2204_v43 }
0x1217   : > { %v2215_v47 = vpack.c.bf16 %v5909_v45, %v2209_v44 }
0x1219   : > { %4848 = vmatmul.mubr.msk.bf16.vlgmr.msra.gmra.mxu1 %vm313_vm1, %v2215_v47 }
0x121a   : > { %4864 = vmatpush3.bf16.msra.mxu1 %v5271_v46  ;;  %4867 = vmatprep.mubr.msk.bf16.mxu1 %vm5516_vm0, %v5515_v0 }
0x121b   : > { %4865 = vmatprep.subr.bf16.mxu1 %v5515_v0 }
0x121e   : > { %4866 = vmatpush3.bf16.msra.mxu1 %v5272_v48 }
0x121f   : > { %4871 = vmatprep.subr.bf16.mxu1 %v5515_v0 }
0x1221   : > { %4868 = vmatmul.mubr.msk.bf16.vlgmr.msra.gmra.mxu1 %vm313_vm1, %v2406_v49 }
0x1222   : > { %4873 = vmatprep.mubr.msk.bf16.mxu1 %vm5516_vm0, %v5515_v0 }
0x12d9   : > { %v2270_v59 = vpop.f32.mrf.mxu1 }
0x12da   : > { %v2271_v60 = vadd.f32 %v4430_v54, %v2270_v59 }
0x12db   : > { %v4849_v61 = vpop.f32.mrf.mxu1 }
0x12dc   : > { %v2277_v62 = vmul.f32 %v2271_v60, %v2271_v60 }
0x12dd   : > { %v2273_v63 = vpop.f32.mrf.mxu1 }
0x12de   : > { %v2279_v1 = vmul.f32 %v2277_v62, %v2271_v60  ;;  %v2274_v2 = vadd.f32 %v4430_v54, %v2273_v63 }
0x12df   : > { %v4850_v3 = vpop.f32.mrf.mxu1 }
0x12e0   : > { %v2281_v6 = vmul.f32 0.044715, %v2279_v1  ;;  %v2278_v4 = vmul.f32 %v2274_v2, %v2274_v2 }
0x12e1   : > { %v2461_v7 = vpop.f32.mrf.mxu1 }
0x12e2   : > { %v2283_v8 = vadd.f32 %v2281_v6, %v2271_v60  ;;  %v2280_v9 = vmul.f32 %v2278_v4, %v2274_v2  ;;  %v5926_v10 = vadd.f32 %v4442_v5, %v2461_v7 }
0x12e3   : > { %v4869_v11 = vpop.f32.mrf.mxu1 }
0x12e4   : > { %v2285_v12 = vmul.f32 0.7978846, %v2283_v8  ;;  %v2282_v13 = vmul.f32 0.044715, %v2280_v9  ;;  %2480 = vrot.lane.b32.xlu0 %v5926_v10, %s5520_s19  ;;  %2477 = vrot.lane.b32.xlu1 %v5926_v10, %s5518_s16  ;;  %v2501_v36 = vpack.c.bf16 %v5926_v10, %v5926_v10 }
0x12e5   : > { %v2464_v14 = vpop.f32.mrf.mxu1 }
0x12e6   : > { %5387 = vtanh.f32 %v2285_v12  ;;  %v2284_v15 = vadd.f32 %v2282_v13, %v2274_v2 }
0x12e7   : > { %v4870_v16 = vpop.f32.mrf.mxu1 }
0x12e8   : > { %v2286_v17 = vmul.f32 0.7978846, %v2284_v15  ;;  %2486 = vrot.lane.b32.xlu0 %v5926_v10, %s5522_s21  ;;  %2483 = vrot.lane.b32.xlu1 %v5926_v10, %s5519_s17 }
0x12ea   : > { %5389 = vtanh.f32 %v2286_v17 }
0x12ec   : > { %2474 = vrot.lane.b32.xlu0 %v5926_v10, %s5523_s22  ;;  %2468 = vrot.lane.b32.xlu1 %v5926_v10, %s5517_s14 }
0x12f0   : > { %2471 = vrot.lane.b32.xlu1 %v5926_v10, %s5521_s20 }
0x12f3   : > { %v5388_v18 = vpop.eup %5387 }
0x12f4   : > { %v2289_v19 = vadd.f32 1.0, %v5388_v18 }
0x12f6   : > { %v2291_v21 = vmul.f32 0.5, %v2289_v19 }
0x12f7   : > { %v5390_v20 = vpop.eup %5389 }
0x12f8   : > { %v2290_v22 = vadd.f32 1.0, %v5390_v20  ;;  %v2293_v24 = vmul.f32 %v2291_v21, %v2271_v60 }
0x12fa   : > { %v2292_v23 = vmul.f32 0.5, %v2290_v22 }
0x12fc   : > { %v2294_v25 = vmul.f32 %v2292_v23, %v2274_v2 }
0x12fe   : > { %v2303_v26 = vpack.c.bf16 %v2294_v25, %v2293_v24 }
0x1300   : > { %4860 = vmatmul.mubr.msk.bf16.vlgmr.msra.gmra.mxu0 %vm1372_vm14, %v2303_v26 }
0x1301   : > { %4879 = vmatprep.mubr.msk.bf16.mxu0 %vm5516_vm0, %v5515_v0 }
0x1356   : > { %v2481_v27 = vpop.permute.xlu0 %2480  ;;  %v2478_v57 = vpop.permute.xlu1 %2477 }
0x1357   : > { %v2506_v28 = vpack.c.bf16 %v2481_v27, %v2481_v27  ;;  %v2505_v29 = vpack.c.bf16 %v2478_v57, %v2478_v57 }
0x1359   : > { %v2563_v31 = vsel %vm633_vm6, %v2506_v28, 0  ;;  %v2517_v58 = vsel %vm633_vm6, %v2505_v29, 0 }
0x135a   : > { %4878 = vmatpush3.bf16.xpose.msra.mxu0 %v2563_v31  ;;  %v2487_v30 = vpop.permute.xlu0 %2486  ;;  %4872 = vmatpush3.bf16.xpose.msra.mxu1 %v2517_v58  ;;  %v2484_v56 = vpop.permute.xlu1 %2483 }
0x135b   : > { %4883 = vmatprep.subr.bf16.mxu1 %v5515_v0  ;;  %4889 = vmatprep.subr.bf16.mxu0 %v5515_v0  ;;  %v2508_v32 = vpack.c.bf16 %v2487_v30, %v2487_v30  ;;  %v2507_v33 = vpack.c.bf16 %v2484_v56, %v2484_v56 }
0x135d   : > { %v2655_v37 = vsel %vm633_vm6, %v2508_v32, 0  ;;  %v2609_v38 = vsel %vm633_vm6, %v2507_v33, 0 }
0x135e   : > { %v2469_v34 = vpop.permute.xlu1 %2468  ;;  %v2475_v39 = vpop.permute.xlu0 %2474 }
0x135f   : > { %v2502_v35 = vpack.c.bf16 %v2469_v34, %v2469_v34  ;;  %v2504_v41 = vpack.c.bf16 %v2475_v39, %v2475_v39 }
0x1361   : > { %4874 = vmatmul.mubr.msk.bf16.vlgmr.msra.gmra.mxu1 %vm633_vm6, %v2501_v36  ;;  %4880 = vmatmul.mubr.msk.bf16.vlgmr.msra.gmra.mxu0 %vm633_vm6, %v2502_v35 }
0x1362   : > { %4890 = vmatpush3.bf16.xpose.msra.mxu0 %v2655_v37  ;;  %4884 = vmatpush3.bf16.xpose.msra.mxu1 %v2609_v38  ;;  %v2472_v40 = vpop.permute.xlu1 %2471 }
0x1363   : > { %4885 = vmatprep.mubr.msk.bf16.mxu1 %vm5516_vm0, %v5515_v0  ;;  %4891 = vmatprep.mubr.msk.bf16.mxu0 %vm5516_vm0, %v5515_v0  ;;  %v2503_v42 = vpack.c.bf16 %v2472_v40, %v2472_v40 }
0x1364   : > { %4895 = vmatprep.subr.bf16.mxu1 %v5515_v0  ;;  %4901 = vmatprep.subr.bf16.mxu0 %v5515_v0 }
0x1369   : > { %4886 = vmatmul.mubr.msk.bf16.vlgmr.msra.gmra.mxu1 %vm633_vm6, %v2503_v42  ;;  %4892 = vmatmul.mubr.msk.bf16.vlgmr.msra.gmra.mxu0 %vm633_vm6, %v2504_v41 }
0x136a   : > { %4897 = vmatprep.mubr.msk.bf16.mxu1 %vm5516_vm0, %v5515_v0  ;;  %4903 = vmatprep.mubr.msk.bf16.mxu0 %vm5516_vm0, %v5515_v0 }
0x13c0   : > { %v2370_v43 = vpop.f32.mrf.mxu0 }
0x13c2   : > { %v4861_v44 = vpop.f32.mrf.mxu0 }
0x13c4   : > { %v5967_v46 = vpop.f32.mrf.mxu0 }
0x13c6   : > { %v4862_v47 = vpop.f32.mrf.mxu0 }
0x1421   : > { %v2553_v48 = vpop.f32.mrf.mxu1  ;;  %v2599_v49 = vpop.f32.mrf.mxu0 }
0x1422   : > { %v2697_v50 = vsel %vm633_vm6, %v2553_v48, -inf  ;;  %v2700_v51 = vsel %vm633_vm6, %v2599_v49, -inf }
0x1423   : > { %2698 = vmax.xlane.f32.xlu1 %v2697_v50  ;;  %v4875_v52 = vpop.f32.mrf.mxu1  ;;  %2701 = vmax.xlane.f32.xlu0 %v2700_v51  ;;  %v4881_v53 = vpop.f32.mrf.mxu0 }
0x1425   : > { %v2556_v54 = vpop.f32.mrf.mxu1  ;;  %v2602_v59 = vpop.f32.mrf.mxu0 }
0x1427   : > { %v4876_v60 = vpop.f32.mrf.mxu1  ;;  %v4882_v61 = vpop.f32.mrf.mxu0 }
0x1428   : > { %v5277_v60 = vld [vmem:[#allocation4 + $0x1d0] sm:$0xff]   ;;  %v5278_v61 = vld [vmem:[#allocation4 + $0x1c8] sm:$0xff]  }
0x1429   : > { %v2645_v62 = vpop.f32.mrf.mxu1  ;;  %v2691_v63 = vpop.f32.mrf.mxu0 }
0x142a   : > { %v2703_v1 = vsel %vm633_vm6, %v2645_v62, -inf  ;;  %v2706_v2 = vsel %vm633_vm6, %v2691_v63, -inf }
0x142b   : > { %v4887_v3 = vpop.f32.mrf.mxu1  ;;  %2704 = vmax.xlane.f32.xlu0 %v2703_v1  ;;  %2707 = vmax.xlane.f32.xlu1 %v2706_v2  ;;  %v4893_v5 = vpop.f32.mrf.mxu0 }
0x142d   : > { %v2648_v6 = vpop.f32.mrf.mxu1  ;;  %v2694_v4 = vpop.f32.mrf.mxu0 }
0x142f   : > { %v4888_v7 = vpop.f32.mrf.mxu1  ;;  %v4894_v8 = vpop.f32.mrf.mxu0 }
0x143c   : > { %2492 = vrot.lane.b32.xlu1 %v5926_v10, %s5524_s23 }
0x1441   : > { %2489 = vrot.lane.b32.xlu0 %v5926_v10, %s5525_s24 }
0x14ac   : > { %v2699_v9 = vpop.xlane.xlu1 %2698  ;;  %v2702_v11 = vpop.xlane.xlu0 %2701 }
0x14ad   : > { %v2709_v12 = vsub.f32 %v2553_v48, %v2699_v9  ;;  %v2710_v13 = vsub.f32 %v2599_v49, %v2702_v11 }
0x14af   : > { %v2713_v14 = vmul.f32 1.442695, %v2709_v12  ;;  %v2715_v15 = vmul.f32 1.442695, %v2710_v13 }
0x14b1   : > { %5391 = vpow2.f32 %v2713_v14 }
0x14b2   : > { %5393 = vpow2.f32 %v2715_v15 }
0x14b4   : > { %v2705_v16 = vpop.xlane.xlu0 %2704  ;;  %v2708_v17 = vpop.xlane.xlu1 %2707 }
0x14b5   : > { %v2711_v18 = vsub.f32 %v2645_v62, %v2705_v16  ;;  %v2712_v19 = vsub.f32 %v2691_v63, %v2708_v17  ;;  %v4434_v16 = vld [vmem:[#allocation2 + $0x310] ss:$0 sm:$0xff] }
0x14b6   : > { %v2373_v17 = vadd.f32 %v4434_v16, %v5967_v46 }
0x14b7   : > { %v2717_v20 = vmul.f32 1.442695, %v2711_v18  ;;  %v2719_v21 = vmul.f32 1.442695, %v2712_v19 }
0x14b8   : > { %v2490_v22 = vpop.permute.xlu0 %2489  ;;  %v2493_v23 = vpop.permute.xlu1 %2492  ;;  %v2376_v18 = vadd.f32 %v2373_v17, %v5909_v45 }
0x14b9   : > { %5395 = vpow2.f32 %v2717_v20  ;;  %v2509_v24 = vpack.c.bf16 %v2490_v22, %v2490_v22  ;;  %v2510_v25 = vpack.c.bf16 %v2493_v23, %v2493_v23 }
0x14ba   : > { %5397 = vpow2.f32 %v2719_v21  ;;  %v2379_v19 = vsel %vm1213_vm13, %v2376_v18, 0.0 }
0x14bb   : > { %v2749_v26 = vsel %vm919_vm9, %v2509_v24, 0  ;;  %v2795_v27 = vsel %vm919_vm9, %v2510_v25, 0 }
0x14bc   : > { %4896 = vmatpush3.bf16.msra.mxu1 %v2749_v26  ;;  %4902 = vmatpush3.bf16.msra.mxu0 %v2795_v27 }
0x14bd   : > { %4907 = vmatprep.subr.bf16.mxu1 %v5515_v0  ;;  %4913 = vmatprep.subr.bf16.mxu0 %v5515_v0 }
0x14be   : > { %v5392_v57 = vpop.eup %5391 }
0x14bf   : > { %v5394_v28 = vpop.eup %5393  ;;  %v2721_v29 = vsel %vm633_vm6, %v5392_v57, 0.0 }
0x14c0   : > { %2722 = vadd.xlane.f32.xlu0 %v2721_v29  ;;  %v2724_v31 = vsel %vm633_vm6, %v5394_v28, 0.0  ;;  %v5279_v29 = vld [vmem:[#allocation4 + $0x1e8] sm:$0xff]  }
0x14c1   : > { %2725 = vadd.xlane.f32.xlu1 %v2724_v31  ;;  %v5280_v31 = vld [vmem:[#allocation4 + $0x1e0] sm:$0xff]  }
0x14c6   : > { %v5396_v58 = vpop.eup %5395 }
0x14c7   : > { %v5398_v30 = vpop.eup %5397  ;;  %v2727_v56 = vsel %vm633_vm6, %v5396_v58, 0.0 }
0x14c8   : > { %2728 = vadd.xlane.f32.xlu0 %v2727_v56  ;;  %v2730_v32 = vsel %vm633_vm6, %v5398_v30, 0.0 }
0x14c9   : > { %2731 = vadd.xlane.f32.xlu1 %v2730_v32 }
0x14da   : > { %2495 = vrot.lane.b32.xlu1 %v5926_v10, %s5527_s25 }
0x14de   : > { %2498 = vrot.lane.b32.xlu0 %v5926_v10, %s5528_s26 }
0x1549   : > { %v2723_v33 = vpop.xlane.xlu0 %2722 }
0x154a   : > { %5399 = vrcp.f32 %v2723_v33  ;;  %v2726_v34 = vpop.xlane.xlu1 %2725 }
0x154b   : > { %5401 = vrcp.f32 %v2726_v34 }
0x1551   : > { %v2729_v35 = vpop.xlane.xlu0 %2728 }
0x1552   : > { %5403 = vrcp.f32 %v2729_v35  ;;  %v2732_v36 = vpop.xlane.xlu1 %2731 }
0x1553   : > { %5405 = vrcp.f32 %v2732_v36 }
0x1555   : > { %v2499_v37 = vpop.permute.xlu0 %2498 }
0x1556   : > { %v2496_v38 = vpop.permute.xlu1 %2495  ;;  %v2512_v43 = vpack.c.bf16 %v2499_v37, %v2499_v37 }
0x1557   : > { %v5400_v39 = vpop.eup %5399  ;;  %v2511_v41 = vpack.c.bf16 %v2496_v38, %v2496_v38 }
0x1558   : > { %v5402_v40 = vpop.eup %5401  ;;  %v2737_v42 = vmul.f32 %v5400_v39, %v5392_v57  ;;  %v2887_v49 = vsel %vm919_vm9, %v2512_v43, 0  ;;  %v4441_v43 = vld [vmem:[#allocation2 + $0x350] ss:$0 sm:$0xff] }
0x1559   : > { %v2738_v44 = vmul.f32 %v5402_v40, %v5394_v28  ;;  %v2841_v10 = vsel %vm919_vm9, %v2511_v41, 0  ;;  %v4440_v41 = vld [vmem:[#allocation2 + $0x340] ss:$0 sm:$0xff] }
0x155a   : > { %v2741_v47 = vpack.c.bf16 %v2737_v42, %v2737_v42 }
0x155b   : > { %v2742_v48 = vpack.c.bf16 %v2738_v44, %v2738_v44 }
0x155c   : > { %4898 = vmatmul.mubr.msk.bf16.vlgmr.msra.gmra.mxu1 %vm633_vm6, %v2741_v47 }
0x155d   : > { %4904 = vmatmul.mubr.msk.bf16.vlgmr.msra.gmra.mxu0 %vm633_vm6, %v2742_v48  ;;  %4908 = vmatpush3.bf16.msra.mxu1 %v2841_v10 }
0x155e   : > { %4914 = vmatpush3.bf16.msra.mxu0 %v2887_v49  ;;  %4909 = vmatprep.mubr.msk.bf16.mxu1 %vm5516_vm0, %v5515_v0 }
0x155f   : > { %v5404_v50 = vpop.eup %5403  ;;  %4915 = vmatprep.mubr.msk.bf16.mxu0 %vm5516_vm0, %v5515_v0  ;;  %4919 = vmatprep.subr.bf16.mxu1 %v5515_v0 }
0x1560   : > { %v5406_v51 = vpop.eup %5405  ;;  %v2739_v52 = vmul.f32 %v5404_v50, %v5396_v58  ;;  %4927 = vmatprep.subr.bf16.mxu0 %v5515_v0  ;;  %v4454_v58 = vld [vmem:[#allocation2 + $0x3b0] ss:$0 sm:$0xff] }
0x1561   : > { %v2740_v53 = vmul.f32 %v5406_v51, %v5398_v30 }
0x1562   : > { %v2743_v54 = vpack.c.bf16 %v2739_v52, %v2739_v52 }
0x1563   : > { %v2744_v59 = vpack.c.bf16 %v2740_v53, %v2740_v53 }
0x1564   : > { %4910 = vmatmul.mubr.msk.bf16.vlgmr.msra.gmra.mxu1 %vm633_vm6, %v2743_v54 }
0x1565   : > { %4916 = vmatmul.mubr.msk.bf16.vlgmr.msra.gmra.mxu0 %vm633_vm6, %v2744_v59  ;;  %4923 = vmatprep.mubr.msk.bf16.mxu1 %vm5516_vm0, %v5515_v0 }
0x1566   : > { %4931 = vmatprep.mubr.msk.bf16.mxu0 %vm5516_vm0, %v5515_v0  ;;  %4920 = vmatpush3.bf16.msra.mxu1 %v5277_v60 }
0x1567   : > { %4921 = vmatprep.subr.bf16.mxu1 %v5515_v0  ;;  %4928 = vmatpush3.bf16.msra.mxu0 %v5279_v29  ;;  %v5283_v29 = vld [vmem:[#allocation4 + $0x228] sm:$0xff]  }
0x1568   : > { %4929 = vmatprep.subr.bf16.mxu0 %v5515_v0 }
0x156a   : > { %4922 = vmatpush3.bf16.msra.mxu1 %v5278_v61 }
0x156b   : > { %4935 = vmatprep.subr.bf16.mxu1 %v5515_v0  ;;  %4930 = vmatpush3.bf16.msra.mxu0 %v5280_v31  ;;  %v5284_v31 = vld [vmem:[#allocation4 + $0x220] sm:$0xff]  }
0x156c   : > { %4943 = vmatprep.subr.bf16.mxu0 %v5515_v0 }
0x161c   : > { %v2785_v62 = vpop.f32.mrf.mxu1 }
0x161d   : > { %v2831_v63 = vpop.f32.mrf.mxu0 }
0x161e   : > { %2930 = vrot.lane.b32.xlu1 %v2831_v63, %s5529_s27  ;;  %v4899_v1 = vpop.f32.mrf.mxu1  ;;  %v3096_v63 = vlaneseq }
0x161f   : > { %v4905_v2 = vpop.f32.mrf.mxu0 }
0x1620   : > { %v2788_v3 = vpop.f32.mrf.mxu1  ;;  %v6031_v1 = vshrl.u32 %v3096_v63, 7  ;;  %v3040_v2 = vld [vmem:[#allocation2 + $0x3e0] sm:$0x1] }
0x1621   : > { %v2834_v5 = vpop.f32.mrf.mxu0 }
0x1622   : > { %v4900_v6 = vpop.f32.mrf.mxu1  ;;  %v4458_v5 = vld [vmem:[#allocation2 + $0x470] ss:$0 sm:$0xff] }
0x1623   : > { %v4906_v4 = vpop.f32.mrf.mxu0 }
0x1624   : > { %v2877_v7 = vpop.f32.mrf.mxu1  ;;  %v3098_v4 = vsub.s32 0, %v6031_v1 }
0x1625   : > { %v2923_v8 = vpop.f32.mrf.mxu0  ;;  %2934 = vrot.lane.b32.xlu0 %v2877_v7, %s5530_s28 }
0x1626   : > { %2938 = vrot.lane.b32.xlu1 %v2923_v8, %s5531_s29  ;;  %v4911_v9 = vpop.f32.mrf.mxu1  ;;  %v4459_v8 = vld [vmem:[#allocation2 + $0x480] ss:$0 sm:$0xff] }
0x1627   : > { %v4917_v11 = vpop.f32.mrf.mxu0 }
0x1628   : > { %v2880_v12 = vpop.f32.mrf.mxu1 }
0x1629   : > { %v2926_v13 = vpop.f32.mrf.mxu0 }
0x162a   : > { %v4912_v14 = vpop.f32.mrf.mxu1 }
0x162b   : > { %v4918_v15 = vpop.f32.mrf.mxu0 }
0x1644   : > { %2380 = vadd.xlane.f32.xlu0 %v2379_v19 }
0x1690   : > { %v2931_v20 = vpop.permute.xlu1 %2930 }
0x1691   : > { %v2941_v21 = vsel %vm633_vm6, %v2785_v62, %v2931_v20  ;;  %v5281_v20 = vld [vmem:[#allocation4 + $0x200] sm:$0xff]  }
0x1697   : > { %v2935_v22 = vpop.permute.xlu0 %2934 }
0x1698   : > { %v2942_v23 = vsel %vm1134_vm11, %v2941_v21, %v2935_v22  ;;  %v2939_v24 = vpop.permute.xlu1 %2938  ;;  %v5282_v21 = vld [vmem:[#allocation4 + $0x1f8] sm:$0xff]  }
0x1699   : > { %v2943_v25 = vsel %vm1137_vm12, %v2942_v23, %v2939_v24 }
0x169a   : > { %v2948_v26 = vpack.c.bf16 %v2943_v25, %v2943_v25 }
0x169c   : > { %4924 = vmatmul.mubr.msk.bf16.vlgmr.msra.gmra.mxu1 %vm313_vm1, %v2948_v26  ;;  %v4463_v26 = vld [vmem:[#allocation2 + $0x490] ss:$0 sm:$0xff] }
0x169d   : > { %4939 = vmatprep.mubr.msk.bf16.mxu1 %vm5516_vm0, %v5515_v0  ;;  %4936 = vmatpush3.bf16.msra.mxu1 %v5281_v20 }
0x169e   : > { %4937 = vmatprep.subr.bf16.mxu1 %v5515_v0 }
0x16a1   : > { %4938 = vmatpush3.bf16.msra.mxu1 %v5282_v21 }
0x16a2   : > { %4955 = vmatprep.subr.bf16.mxu1 %v5515_v0 }
0x16cd   : > { %v2381_v46 = vpop.xlane.xlu0 %2380 }
0x16ce   : > { %v2382_v45 = vmul.f32 0.03125, %v2381_v46 }
0x16d0   : > { %v2383_v27 = vsub.f32 %v2376_v18, %v2382_v45  ;;  %v4464_v45 = vld [vmem:[#allocation2 + $0x4a0] ss:$0 sm:$0xff] }
0x16d2   : > { %v2384_v57 = vmul.f32 %v2383_v27, %v2383_v27 }
0x16d4   : > { %v2385_v28 = vsel %vm1213_vm13, %v2384_v57, 0.0 }
0x16d5   : > { %2386 = vadd.xlane.f32.xlu1 %v2385_v28 }
0x175c   : > { %v3003_v30 = vpop.f32.mrf.mxu1 }
0x175d   : > { %v3004_v56 = vadd.f32 %v4454_v58, %v3003_v30  ;;  %v5285_v58 = vld [vmem:[#allocation4 + $0x218] sm:$0xff]   ;;  %v5286_v30 = vld [vmem:[#allocation4 + $0x210] sm:$0xff]  }
0x175e   : > { %v4925_v32 = vpop.f32.mrf.mxu1  ;;  %v2387_v33 = vpop.xlane.xlu1 %2386 }
0x175f   : > { %v2388_v34 = vmul.f32 0.03125, %v2387_v33  ;;  %v3009_v35 = vadd.f32 %v3004_v56, %v5648_v55  ;;  %v4465_v56 = vld [vmem:[#allocation2 + $0x410] ss:$0 sm:$0xff] }
0x1760   : > { %v3006_v36 = vpop.f32.mrf.mxu1 }
0x1761   : > { %v2389_v37 = vadd.f32 1e-05, %v2388_v34  ;;  %v3012_v38 = vsel %vm313_vm1, %v3009_v35, 0.0 }
0x1762   : > { %3013 = vadd.xlane.f32.xlu0 %v3012_v38  ;;  %v4926_v39 = vpop.f32.mrf.mxu1 }
0x1763   : > { %5407 = vrsqrt.f32 %v2389_v37 }
0x1770   : > { %v5408_v40 = vpop.eup %5407 }
0x1771   : > { %v2391_v42 = vmul.f32 %v5408_v40, %v2383_v27 }
0x1773   : > { %v2396_v44 = vmul.f32 %v4440_v41, %v2391_v42 }
0x1775   : > { %v2401_v47 = vadd.f32 %v4441_v43, %v2396_v44 }
0x1777   : > { %v6024_v48 = vpack.c.bf16 %v2401_v47, %v2401_v47 }
0x1779   : > { %4932 = vmatmul.mubr.msk.bf16.vlgmr.msra.gmra.mxu0 %vm313_vm1, %v6024_v48 }
0x177a   : > { %4951 = vmatprep.mubr.msk.bf16.mxu0 %vm5516_vm0, %v5515_v0  ;;  %4944 = vmatpush3.bf16.msra.mxu0 %v5283_v29 }
0x177b   : > { %4945 = vmatprep.subr.bf16.mxu0 %v5515_v0 }
0x177e   : > { %4946 = vmatpush3.bf16.msra.mxu0 %v5284_v31 }
0x177f   : > { %4947 = vmatprep.subr.bf16.mxu0 %v5515_v0 }
0x1782   : > { %4948 = vmatpush3.bf16.msra.mxu0 %v5285_v58 }
0x1783   : > { %4949 = vmatprep.subr.bf16.mxu0 %v5515_v0 }
0x1786   : > { %4950 = vmatpush3.bf16.msra.mxu0 %v5286_v30 }
0x1787   : > { %4969 = vmatprep.subr.bf16.mxu0 %v5515_v0 }
0x17eb   : > { %v3014_v55 = vpop.xlane.xlu0 %3013 }
0x17ec   : > { %v3015_v10 = vmul.f32 0.03125, %v3014_v55 }
0x17ee   : > { %v3016_v49 = vsub.f32 %v3009_v35, %v3015_v10  ;;  %v4469_v10 = vld [vmem:[#allocation2 + $0x460] ss:$0 sm:$0xff] }
0x17f0   : > { %v3017_v50 = vmul.f32 %v3016_v49, %v3016_v49 }
0x17f2   : > { %v3018_v51 = vsel %vm313_vm1, %v3017_v50, 0.0 }
0x17f3   : > { %3019 = vadd.xlane.f32.xlu0 %v3018_v51 }
0x1839   : > { %v3090_v52 = vpop.f32.mrf.mxu0 }
0x183a   : > { %v3091_v6 = vadd.f32 %v3090_v52, %v3040_v2 }
0x183b   : > { %v4933_v53 = vpop.f32.mrf.mxu0 }
0x183c   : > { %v3099_v11 = vrot.slane %v3091_v6, %v3098_v4 }
0x183d   : > { %v3093_v54 = vpop.f32.mrf.mxu0 }
0x183f   : > { %v4934_v59 = vpop.f32.mrf.mxu0 }
0x187c   : > { %v3020_v60 = vpop.xlane.xlu0 %3019 }
0x187d   : > { %v3021_v61 = vmul.f32 0.03125, %v3020_v60 }
0x187f   : > { %v3022_v62 = vadd.f32 1e-05, %v3021_v61 }
0x1881   : > { %5409 = vrsqrt.f32 %v3022_v62 }
0x188e   : > { %v5410_v3 = vpop.eup %5409 }
0x188f   : > { %v3024_v7 = vmul.f32 %v5410_v3, %v3016_v49  ;;  %v5287_v3 = vld [vmem:[#allocation4 + $0x270] sm:$0xff]  }
0x1891   : > { %v3029_v9 = vmul.f32 %v4458_v5, %v3024_v7  ;;  %v5288_v5 = vld [vmem:[#allocation4 + $0x268] sm:$0xff]  }
0x1893   : > { %v3034_v12 = vadd.f32 %v4459_v8, %v3029_v9 }
0x1895   : > { %v3100_v13 = vadd.f32 %v3099_v11, %v3034_v12  ;;  %v4475_v11 = vld [vmem:[#allocation2 + $0x4b0] ss:$0 sm:$0xff] }
0x1897   : > { %v3103_v14 = vsel %vm313_vm1, %v3100_v13, 0.0 }
0x1898   : > { %3104 = vadd.xlane.f32.xlu1 %v3103_v14 }
0x1921   : > { %v3105_v15 = vpop.xlane.xlu1 %3104 }
0x1922   : > { %v3106_v16 = vmul.f32 0.03125, %v3105_v15 }
0x1924   : > { %v3107_v17 = vsub.f32 %v3100_v13, %v3106_v16  ;;  %v4476_v13 = vld [vmem:[#allocation2 + $0x4c0] ss:$0 sm:$0xff] }
0x1926   : > { %v3108_v18 = vmul.f32 %v3107_v17, %v3107_v17 }
0x1928   : > { %v3109_v19 = vsel %vm313_vm1, %v3108_v18, 0.0 }
0x1929   : > { %3110 = vadd.xlane.f32.xlu0 %v3109_v19 }
0x19b2   : > { %v3111_v22 = vpop.xlane.xlu0 %3110 }
0x19b3   : > { %v3112_v23 = vmul.f32 0.03125, %v3111_v22 }
0x19b5   : > { %v3113_v24 = vadd.f32 1e-05, %v3112_v23 }
0x19b7   : > { %5411 = vrsqrt.f32 %v3113_v24 }
0x19c4   : > { %v5412_v25 = vpop.eup %5411 }
0x19c5   : > { %v3115_v46 = vmul.f32 %v5412_v25, %v3107_v17  ;;  %v4477_v17 = vld [vmem:[#allocation2 + $0x4f0] ss:$0 sm:$0xff] }
0x19c7   : > { %v3120_v27 = vmul.f32 %v4463_v26, %v3115_v46 }
0x19c9   : > { %v3125_v57 = vadd.f32 %v4464_v45, %v3120_v27 }
0x19cb   : > { %v3130_v28 = vpack.c.bf16 %v3125_v57, %v3125_v57 }
0x19cd   : > { %4940 = vmatmul.mubr.msk.bf16.vlgmr.msra.gmra.mxu1 %vm313_vm1, %v3130_v28 }
0x19ce   : > { %4959 = vmatprep.mubr.msk.bf16.mxu1 %vm5516_vm0, %v5515_v0  ;;  %4956 = vmatpush3.bf16.msra.mxu1 %v5287_v3 }
0x19cf   : > { %4957 = vmatprep.subr.bf16.mxu1 %v5515_v0 }
0x19d2   : > { %4958 = vmatpush3.bf16.msra.mxu1 %v5288_v5 }
0x19d3   : > { %4963 = vmatprep.subr.bf16.mxu1 %v5515_v0 }
0x1a8d   : > { %v3185_v32 = vpop.f32.mrf.mxu1 }
0x1a8e   : > { %v3186_v33 = vadd.f32 %v4465_v56, %v3185_v32 }
0x1a8f   : > { %v4941_v34 = vpop.f32.mrf.mxu1 }
0x1a90   : > { %v3191_v35 = vmul.f32 %v3186_v33, %v3186_v33 }
0x1a91   : > { %v3188_v36 = vpop.f32.mrf.mxu1 }
0x1a92   : > { %v3192_v37 = vmul.f32 %v3191_v35, %v3186_v33 }
0x1a93   : > { %v4942_v38 = vpop.f32.mrf.mxu1 }
0x1a94   : > { %v3193_v39 = vmul.f32 0.044715, %v3192_v37 }
0x1a96   : > { %v3194_v40 = vadd.f32 %v3193_v39, %v3186_v33 }
0x1a98   : > { %v3195_v41 = vmul.f32 0.7978846, %v3194_v40 }
0x1a9a   : > { %5413 = vtanh.f32 %v3195_v41 }
0x1aa7   : > { %v5414_v42 = vpop.eup %5413 }
0x1aa8   : > { %v3197_v43 = vadd.f32 1.0, %v5414_v42 }
0x1aaa   : > { %v3198_v44 = vmul.f32 0.5, %v3197_v43 }
0x1aac   : > { %v3199_v47 = vmul.f32 %v3198_v44, %v3186_v33 }
0x1aae   : > { %v3208_v55 = vpack.c.bf16 %v3199_v47, %v3199_v47 }
0x1ab0   : > { %4952 = vmatmul.mubr.msk.bf16.vlgmr.msra.gmra.mxu0 %vm1372_vm14, %v3208_v55 }
0x1ab1   : > { %4971 = vmatprep.mubr.msk.bf16.mxu0 %vm5516_vm0, %v5515_v0 }
0x1b70   : > { %v3275_v49 = vpop.f32.mrf.mxu0 }
0x1b71   : > { %v3276_v50 = vadd.f32 %v4469_v10, %v3275_v49 }
0x1b72   : > { %v4953_v51 = vpop.f32.mrf.mxu0 }
0x1b73   : > { %v3281_v52 = vadd.f32 %v3276_v50, %v3125_v57 }
0x1b74   : > { %v3278_v53 = vpop.f32.mrf.mxu0 }
0x1b75   : > { %v3284_v54 = vsel %vm313_vm1, %v3281_v52, 0.0 }
0x1b76   : > { %3285 = vadd.xlane.f32.xlu1 %v3284_v54  ;;  %v4954_v59 = vpop.f32.mrf.mxu0 }
0x1bff   : > { %v3286_v60 = vpop.xlane.xlu1 %3285 }
0x1c00   : > { %v3287_v61 = vmul.f32 0.03125, %v3286_v60 }
0x1c02   : > { %v3288_v62 = vsub.f32 %v3281_v52, %v3287_v61 }
0x1c04   : > { %v3289_v63 = vmul.f32 %v3288_v62, %v3288_v62 }
0x1c06   : > { %v3290_v2 = vsel %vm313_vm1, %v3289_v63, 0.0 }
0x1c07   : > { %3291 = vadd.xlane.f32.xlu0 %v3290_v2 }
0x1c90   : > { %v3292_v6 = vpop.xlane.xlu0 %3291 }
0x1c91   : > { %v3293_v7 = vmul.f32 0.03125, %v3292_v6 }
0x1c93   : > { %v3294_v8 = vadd.f32 1e-05, %v3293_v7 }
0x1c95   : > { %5415 = vrsqrt.f32 %v3294_v8 }
0x1ca2   : > { %v5416_v9 = vpop.eup %5415 }
0x1ca3   : > { %v3296_v12 = vmul.f32 %v5416_v9, %v3288_v62 }
0x1ca5   : > { %v3301_v14 = vmul.f32 %v4475_v11, %v3296_v12 }
0x1ca7   : > { %v6054_v15 = vadd.f32 %v4476_v13, %v3301_v14 }
0x1ca9   : > { %v3311_v16 = vpack.c.bf16 %v6054_v15, %v6054_v15 }
0x1cab   : > { %4960 = vmatmul.mubr.msk.bf16.vlgmr.msra.gmra.mxu1 %vm313_vm1, %v3311_v16 }
0x1cac   : > { %4965 = vmatprep.mubr.msk.bf16.mxu1 %vm5516_vm0, %v5515_v0 }
0x1d6b   : > { %v3366_v18 = vpop.f32.mrf.mxu1 }
0x1d6c   : > { %v6061_v19 = vadd.f32 %v4477_v17, %v3366_v18 }
0x1d6d   : > { %v4961_v20 = vpop.f32.mrf.mxu1 }
0x1d6e   : > { %3385 = vrot.lane.b32.xlu0 %v6061_v19, %s5520_s19  ;;  %3382 = vrot.lane.b32.xlu1 %v6061_v19, %s5518_s16  ;;  %v3406_v30 = vpack.c.bf16 %v6061_v19, %v6061_v19 }
0x1d6f   : > { %v3369_v21 = vpop.f32.mrf.mxu1 }
0x1d71   : > { %v4962_v22 = vpop.f32.mrf.mxu1 }
0x1d72   : > { %3391 = vrot.lane.b32.xlu0 %v6061_v19, %s5522_s21  ;;  %3388 = vrot.lane.b32.xlu1 %v6061_v19, %s5519_s17 }
0x1d76   : > { %3379 = vrot.lane.b32.xlu0 %v6061_v19, %s5523_s22  ;;  %3373 = vrot.lane.b32.xlu1 %v6061_v19, %s5517_s14 }
0x1d7a   : > { %3376 = vrot.lane.b32.xlu1 %v6061_v19, %s5521_s20 }
0x1de0   : > { %v3386_v23 = vpop.permute.xlu0 %3385  ;;  %v3383_v24 = vpop.permute.xlu1 %3382 }
0x1de1   : > { %v3411_v25 = vpack.c.bf16 %v3386_v23, %v3386_v23  ;;  %v3410_v26 = vpack.c.bf16 %v3383_v24, %v3383_v24 }
0x1de3   : > { %v3468_v46 = vsel %vm633_vm6, %v3411_v25, 0  ;;  %v3422_v45 = vsel %vm633_vm6, %v3410_v26, 0 }
0x1de4   : > { %4970 = vmatpush3.bf16.xpose.msra.mxu0 %v3468_v46  ;;  %v3392_v27 = vpop.permute.xlu0 %3391  ;;  %4964 = vmatpush3.bf16.xpose.msra.mxu1 %v3422_v45  ;;  %v3389_v57 = vpop.permute.xlu1 %3388 }
0x1de5   : > { %4975 = vmatprep.subr.bf16.mxu1 %v5515_v0  ;;  %4981 = vmatprep.subr.bf16.mxu0 %v5515_v0  ;;  %v3413_v28 = vpack.c.bf16 %v3392_v27, %v3392_v27  ;;  %v3412_v29 = vpack.c.bf16 %v3389_v57, %v3389_v57 }
0x1de7   : > { %v3560_v56 = vsel %vm633_vm6, %v3413_v28, 0  ;;  %v3514_v32 = vsel %vm633_vm6, %v3412_v29, 0 }
0x1de8   : > { %v3374_v31 = vpop.permute.xlu1 %3373  ;;  %v3380_v33 = vpop.permute.xlu0 %3379 }
0x1de9   : > { %v3407_v58 = vpack.c.bf16 %v3374_v31, %v3374_v31  ;;  %v3409_v35 = vpack.c.bf16 %v3380_v33, %v3380_v33 }
0x1deb   : > { %4966 = vmatmul.mubr.msk.bf16.vlgmr.msra.gmra.mxu1 %vm633_vm6, %v3406_v30  ;;  %4972 = vmatmul.mubr.msk.bf16.vlgmr.msra.gmra.mxu0 %vm633_vm6, %v3407_v58 }
0x1dec   : > { %4982 = vmatpush3.bf16.xpose.msra.mxu0 %v3560_v56  ;;  %4976 = vmatpush3.bf16.xpose.msra.mxu1 %v3514_v32  ;;  %v3377_v34 = vpop.permute.xlu1 %3376 }
0x1ded   : > { %4977 = vmatprep.mubr.msk.bf16.mxu1 %vm5516_vm0, %v5515_v0  ;;  %4983 = vmatprep.mubr.msk.bf16.mxu0 %vm5516_vm0, %v5515_v0  ;;  %v3408_v36 = vpack.c.bf16 %v3377_v34, %v3377_v34 }
0x1dee   : > { %4987 = vmatprep.subr.bf16.mxu1 %v5515_v0  ;;  %4993 = vmatprep.subr.bf16.mxu0 %v5515_v0 }
0x1df3   : > { %4978 = vmatmul.mubr.msk.bf16.vlgmr.msra.gmra.mxu1 %vm633_vm6, %v3408_v36  ;;  %4984 = vmatmul.mubr.msk.bf16.vlgmr.msra.gmra.mxu0 %vm633_vm6, %v3409_v35 }
0x1df4   : > { %4989 = vmatprep.mubr.msk.bf16.mxu1 %vm5516_vm0, %v5515_v0  ;;  %4995 = vmatprep.mubr.msk.bf16.mxu0 %vm5516_vm0, %v5515_v0 }
0x1eab   : > { %v3458_v37 = vpop.f32.mrf.mxu1  ;;  %v3504_v38 = vpop.f32.mrf.mxu0 }
0x1eac   : > { %v3602_v39 = vsel %vm633_vm6, %v3458_v37, -inf  ;;  %v3605_v40 = vsel %vm633_vm6, %v3504_v38, -inf }
0x1ead   : > { %3603 = vmax.xlane.f32.xlu1 %v3602_v39  ;;  %v4967_v41 = vpop.f32.mrf.mxu1  ;;  %3606 = vmax.xlane.f32.xlu0 %v3605_v40  ;;  %v4973_v42 = vpop.f32.mrf.mxu0 }
0x1eaf   : > { %v3461_v43 = vpop.f32.mrf.mxu1  ;;  %v3507_v44 = vpop.f32.mrf.mxu0 }
0x1eb1   : > { %v4968_v47 = vpop.f32.mrf.mxu1  ;;  %v4974_v55 = vpop.f32.mrf.mxu0 }
0x1eb2   : > { %v5289_v47 = vld [vmem:[#allocation4 + $0x2a0] sm:$0xff]  }
0x1eb3   : > { %v3550_v10 = vpop.f32.mrf.mxu1  ;;  %v3596_v49 = vpop.f32.mrf.mxu0 }
0x1eb4   : > { %v3608_v50 = vsel %vm633_vm6, %v3550_v10, -inf  ;;  %v3611_v51 = vsel %vm633_vm6, %v3596_v49, -inf }
0x1eb5   : > { %v4979_v52 = vpop.f32.mrf.mxu1  ;;  %3609 = vmax.xlane.f32.xlu0 %v3608_v50  ;;  %3612 = vmax.xlane.f32.xlu1 %v3611_v51  ;;  %v4985_v53 = vpop.f32.mrf.mxu0  ;;  %v5292_v50 = vld [vmem:[#allocation4 + $0x280] sm:$0xff]  }
0x1eb7   : > { %v3553_v54 = vpop.f32.mrf.mxu1  ;;  %v3599_v59 = vpop.f32.mrf.mxu0 }
0x1eb9   : > { %v4980_v60 = vpop.f32.mrf.mxu1  ;;  %v4986_v61 = vpop.f32.mrf.mxu0 }
0x1ec6   : > { %3397 = vrot.lane.b32.xlu1 %v6061_v19, %s5524_s23 }
0x1ecb   : > { %3394 = vrot.lane.b32.xlu0 %v6061_v19, %s5525_s24 }
0x1f36   : > { %v3604_v62 = vpop.xlane.xlu1 %3603  ;;  %v3607_v63 = vpop.xlane.xlu0 %3606 }
0x1f37   : > { %v3614_v2 = vsub.f32 %v3458_v37, %v3604_v62  ;;  %v3615_v3 = vsub.f32 %v3504_v38, %v3607_v63 }
0x1f39   : > { %v3618_v5 = vmul.f32 1.442695, %v3614_v2  ;;  %v3620_v6 = vmul.f32 1.442695, %v3615_v3 }
0x1f3b   : > { %5417 = vpow2.f32 %v3618_v5 }
0x1f3c   : > { %5419 = vpow2.f32 %v3620_v6 }
0x1f3e   : > { %v3610_v7 = vpop.xlane.xlu0 %3609  ;;  %v3613_v8 = vpop.xlane.xlu1 %3612 }
0x1f3f   : > { %v3616_v9 = vsub.f32 %v3550_v10, %v3610_v7  ;;  %v3617_v11 = vsub.f32 %v3596_v49, %v3613_v8  ;;  %v5290_v10 = vld [vmem:[#allocation4 + $0x298] sm:$0xff]   ;;  %v5291_v49 = vld [vmem:[#allocation4 + $0x288] sm:$0xff]  }
0x1f41   : > { %v3622_v12 = vmul.f32 1.442695, %v3616_v9  ;;  %v3624_v13 = vmul.f32 1.442695, %v3617_v11 }
0x1f42   : > { %v3395_v14 = vpop.permute.xlu0 %3394  ;;  %v3398_v16 = vpop.permute.xlu1 %3397 }
0x1f43   : > { %5421 = vpow2.f32 %v3622_v12  ;;  %v3414_v17 = vpack.c.bf16 %v3395_v14, %v3395_v14  ;;  %v3415_v18 = vpack.c.bf16 %v3398_v16, %v3398_v16 }
0x1f44   : > { %5423 = vpow2.f32 %v3624_v13 }
0x1f45   : > { %v3654_v20 = vsel %vm919_vm9, %v3414_v17, 0  ;;  %v3700_v21 = vsel %vm919_vm9, %v3415_v18, 0 }
0x1f46   : > { %4988 = vmatpush3.bf16.msra.mxu1 %v3654_v20  ;;  %4994 = vmatpush3.bf16.msra.mxu0 %v3700_v21 }
0x1f47   : > { %4999 = vmatprep.subr.bf16.mxu1 %v5515_v0  ;;  %5005 = vmatprep.subr.bf16.mxu0 %v5515_v0 }
0x1f48   : > { %v5418_v22 = vpop.eup %5417 }
0x1f49   : > { %v5420_v23 = vpop.eup %5419  ;;  %v3626_v24 = vsel %vm633_vm6, %v5418_v22, 0.0 }
0x1f4a   : > { %3627 = vadd.xlane.f32.xlu0 %v3626_v24  ;;  %v3629_v25 = vsel %vm633_vm6, %v5420_v23, 0.0 }
0x1f4b   : > { %3630 = vadd.xlane.f32.xlu1 %v3629_v25 }
0x1f50   : > { %v5422_v26 = vpop.eup %5421 }
0x1f51   : > { %v5424_v46 = vpop.eup %5423  ;;  %v3632_v45 = vsel %vm633_vm6, %v5422_v26, 0.0 }
0x1f52   : > { %3633 = vadd.xlane.f32.xlu0 %v3632_v45  ;;  %v3635_v27 = vsel %vm633_vm6, %v5424_v46, 0.0 }
0x1f53   : > { %3636 = vadd.xlane.f32.xlu1 %v3635_v27 }
0x1f64   : > { %3400 = vrot.lane.b32.xlu1 %v6061_v19, %s5527_s25 }
0x1f68   : > { %3403 = vrot.lane.b32.xlu0 %v6061_v19, %s5528_s26 }
0x1fd3   : > { %v3628_v57 = vpop.xlane.xlu0 %3627 }
0x1fd4   : > { %5425 = vrcp.f32 %v3628_v57  ;;  %v3631_v28 = vpop.xlane.xlu1 %3630 }
0x1fd5   : > { %5427 = vrcp.f32 %v3631_v28 }
0x1fdb   : > { %v3634_v29 = vpop.xlane.xlu0 %3633 }
0x1fdc   : > { %5429 = vrcp.f32 %v3634_v29  ;;  %v3637_v31 = vpop.xlane.xlu1 %3636 }
0x1fdd   : > { %5431 = vrcp.f32 %v3637_v31 }
0x1fdf   : > { %v3404_v58 = vpop.permute.xlu0 %3403 }
0x1fe0   : > { %v3401_v30 = vpop.permute.xlu1 %3400  ;;  %v3417_v35 = vpack.c.bf16 %v3404_v58, %v3404_v58 }
0x1fe1   : > { %v5426_v56 = vpop.eup %5425  ;;  %v3416_v33 = vpack.c.bf16 %v3401_v30, %v3401_v30 }
0x1fe2   : > { %v5428_v32 = vpop.eup %5427  ;;  %v3642_v34 = vmul.f32 %v5426_v56, %v5418_v22  ;;  %v3792_v39 = vsel %vm919_vm9, %v3417_v35, 0 }
0x1fe3   : > { %v3643_v36 = vmul.f32 %v5428_v32, %v5420_v23  ;;  %v3746_v19 = vsel %vm919_vm9, %v3416_v33, 0  ;;  %v4489_v23 = vld [vmem:[#allocation2 + $0x520] ss:$0 sm:$0xff] }
0x1fe4   : > { %v3646_v37 = vpack.c.bf16 %v3642_v34, %v3642_v34  ;;  %v3944_v34 = vld [vmem:[#allocation2 + $0x550] sm:$0x1] }
0x1fe5   : > { %v3647_v38 = vpack.c.bf16 %v3643_v36, %v3643_v36  ;;  %v4493_v36 = vld [vmem:[#allocation2 + $0x5e0] ss:$0 sm:$0xff] }
0x1fe6   : > { %4990 = vmatmul.mubr.msk.bf16.vlgmr.msra.gmra.mxu1 %vm633_vm6, %v3646_v37 }
0x1fe7   : > { %4996 = vmatmul.mubr.msk.bf16.vlgmr.msra.gmra.mxu0 %vm633_vm6, %v3647_v38  ;;  %5000 = vmatpush3.bf16.msra.mxu1 %v3746_v19  ;;  %v4494_v38 = vld [vmem:[#allocation2 + $0x5f0] ss:$0 sm:$0xff] }
0x1fe8   : > { %5006 = vmatpush3.bf16.msra.mxu0 %v3792_v39  ;;  %5001 = vmatprep.mubr.msk.bf16.mxu1 %vm5516_vm0, %v5515_v0 }
0x1fe9   : > { %v5430_v40 = vpop.eup %5429  ;;  %5007 = vmatprep.mubr.msk.bf16.mxu0 %vm5516_vm0, %v5515_v0  ;;  %5019 = vmatprep.subr.bf16.mxu0 %v5515_v0 }
0x1fea   : > { %v5432_v41 = vpop.eup %5431  ;;  %v3644_v42 = vmul.f32 %v5430_v40, %v5422_v26  ;;  %5011 = vmatprep.subr.bf16.mxu1 %v5515_v0 }
0x1feb   : > { %v3645_v43 = vmul.f32 %v5432_v41, %v5424_v46 }
0x1fec   : > { %v3648_v44 = vpack.c.bf16 %v3644_v42, %v3644_v42 }
0x1fed   : > { %v3649_v55 = vpack.c.bf16 %v3645_v43, %v3645_v43 }
0x1fee   : > { %5002 = vmatmul.mubr.msk.bf16.vlgmr.msra.gmra.mxu1 %vm633_vm6, %v3648_v44 }
0x1fef   : > { %5008 = vmatmul.mubr.msk.bf16.vlgmr.msra.gmra.mxu0 %vm633_vm6, %v3649_v55  ;;  %5015 = vmatprep.mubr.msk.bf16.mxu1 %vm5516_vm0, %v5515_v0 }
0x1ff0   : > { %5020 = vmatpush3.bf16.msra.mxu0 %v5289_v47  ;;  %5023 = vmatprep.mubr.msk.bf16.mxu0 %vm5516_vm0, %v5515_v0 }
0x1ff1   : > { %5021 = vmatprep.subr.bf16.mxu0 %v5515_v0  ;;  %5012 = vmatpush3.bf16.msra.mxu1 %v5291_v49  ;;  %v5293_v49 = vld [vmem:[#allocation4 + $0x2b8] sm:$0xff]  }
0x1ff2   : > { %5013 = vmatprep.subr.bf16.mxu1 %v5515_v0 }
0x1ff4   : > { %5022 = vmatpush3.bf16.msra.mxu0 %v5290_v10 }
0x1ff5   : > { %5035 = vmatprep.subr.bf16.mxu0 %v5515_v0  ;;  %5014 = vmatpush3.bf16.msra.mxu1 %v5292_v50  ;;  %v5294_v50 = vld [vmem:[#allocation4 + $0x2b0] sm:$0xff]  }
0x1ff6   : > { %5027 = vmatprep.subr.bf16.mxu1 %v5515_v0 }
0x1ff7   : > { %5024 = vmatmul.mubr.msk.bf16.vlgmr.msra.gmra.mxu0 %vm313_vm1, %v6024_v48 }
0x1ff8   : > { %5043 = vmatprep.mubr.msk.bf16.mxu0 %vm5516_vm0, %v5515_v0 }
0x20a6   : > { %v3690_v51 = vpop.f32.mrf.mxu1 }
0x20a7   : > { %v3736_v52 = vpop.f32.mrf.mxu0 }
0x20a8   : > { %3835 = vrot.lane.b32.xlu1 %v3736_v52, %s5529_s27  ;;  %v4991_v53 = vpop.f32.mrf.mxu1 }
0x20a9   : > { %v4997_v54 = vpop.f32.mrf.mxu0  ;;  %v4498_v53 = vld [vmem:[#allocation2 + $0x600] ss:$0 sm:$0xff] }
0x20aa   : > { %v3693_v59 = vpop.f32.mrf.mxu1 }
0x20ab   : > { %v3739_v60 = vpop.f32.mrf.mxu0  ;;  %v4499_v59 = vld [vmem:[#allocation2 + $0x610] ss:$0 sm:$0xff] }
0x20ac   : > { %v4992_v48 = vpop.f32.mrf.mxu1 }
0x20ad   : > { %v4998_v61 = vpop.f32.mrf.mxu0 }
0x20ae   : > { %v3782_v62 = vpop.f32.mrf.mxu1 }
0x20af   : > { %v3828_v63 = vpop.f32.mrf.mxu0  ;;  %3839 = vrot.lane.b32.xlu0 %v3782_v62, %s5530_s28  ;;  %v5295_v62 = vld [vmem:[#allocation4 + $0x2e0] sm:$0xff]  }
0x20b0   : > { %3843 = vrot.lane.b32.xlu1 %v3828_v63, %s5531_s29  ;;  %v5003_v2 = vpop.f32.mrf.mxu1  ;;  %5036 = vmatpush3.bf16.msra.mxu0 %v5295_v62  ;;  %v5296_v63 = vld [vmem:[#allocation4 + $0x2d8] sm:$0xff]  }
0x20b1   : > { %v5009_v3 = vpop.f32.mrf.mxu0  ;;  %5037 = vmatprep.subr.bf16.mxu0 %v5515_v0  ;;  %v5297_v2 = vld [vmem:[#allocation4 + $0x2d0] sm:$0xff]  }
0x20b2   : > { %v3785_v5 = vpop.f32.mrf.mxu1  ;;  %v5298_v3 = vld [vmem:[#allocation4 + $0x2c8] sm:$0xff]  }
0x20b3   : > { %v3831_v6 = vpop.f32.mrf.mxu0  ;;  %v4500_v5 = vld [vmem:[#allocation2 + $0x580] ss:$0 sm:$0xff] }
0x20b4   : > { %v5004_v7 = vpop.f32.mrf.mxu1  ;;  %5038 = vmatpush3.bf16.msra.mxu0 %v5296_v63 }
0x20b5   : > { %v5010_v8 = vpop.f32.mrf.mxu0  ;;  %5039 = vmatprep.subr.bf16.mxu0 %v5515_v0 }
0x20b7   : > { %v3991_v9 = vpop.f32.mrf.mxu0 }
0x20b8   : > { %5040 = vmatpush3.bf16.msra.mxu0 %v5297_v2 }
0x20b9   : > { %v5025_v11 = vpop.f32.mrf.mxu0  ;;  %5041 = vmatprep.subr.bf16.mxu0 %v5515_v0 }
0x20bb   : > { %v3994_v12 = vpop.f32.mrf.mxu0 }
0x20bc   : > { %5042 = vmatpush3.bf16.msra.mxu0 %v5298_v3 }
0x20bd   : > { %v5026_v13 = vpop.f32.mrf.mxu0 }
0x211a   : > { %v3836_v14 = vpop.permute.xlu1 %3835 }
0x211b   : > { %v3846_v16 = vsel %vm633_vm6, %v3690_v51, %v3836_v14 }
0x2121   : > { %v3840_v17 = vpop.permute.xlu0 %3839 }
0x2122   : > { %v3847_v18 = vsel %vm1134_vm11, %v3846_v16, %v3840_v17  ;;  %v3844_v20 = vpop.permute.xlu1 %3843 }
0x2123   : > { %v3848_v21 = vsel %vm1137_vm12, %v3847_v18, %v3844_v20 }
0x2124   : > { %v3853_v22 = vpack.c.bf16 %v3848_v21, %v3848_v21 }
0x2126   : > { %5016 = vmatmul.mubr.msk.bf16.vlgmr.msra.gmra.mxu1 %vm313_vm1, %v3853_v22 }
0x2127   : > { %5031 = vmatprep.mubr.msk.bf16.mxu1 %vm5516_vm0, %v5515_v0  ;;  %5028 = vmatpush3.bf16.msra.mxu1 %v5293_v49 }
0x2128   : > { %5029 = vmatprep.subr.bf16.mxu1 %v5515_v0 }
0x212b   : > { %5030 = vmatpush3.bf16.msra.mxu1 %v5294_v50 }
0x212c   : > { %5047 = vmatprep.subr.bf16.mxu1 %v5515_v0 }
0x21e6   : > { %v3908_v24 = vpop.f32.mrf.mxu1 }
0x21e7   : > { %v3909_v25 = vadd.f32 %v4489_v23, %v3908_v24  ;;  %v4504_v24 = vld [vmem:[#allocation2 + $0x5d0] ss:$0 sm:$0xff] }
0x21e8   : > { %v5017_v26 = vpop.f32.mrf.mxu1 }
0x21e9   : > { %v3914_v46 = vadd.f32 %v3909_v25, %v6054_v15  ;;  %v3992_v15 = vadd.f32 %v3991_v9, %v3944_v34 }
0x21ea   : > { %v3911_v45 = vpop.f32.mrf.mxu1 }
0x21eb   : > { %v3917_v27 = vsel %vm313_vm1, %v3914_v46, 0.0  ;;  %v4000_v39 = vrot.slane %v3992_v15, %v3098_v4 }
0x21ec   : > { %3918 = vadd.xlane.f32.xlu0 %v3917_v27  ;;  %v5018_v57 = vpop.f32.mrf.mxu1 }
0x2275   : > { %v3919_v28 = vpop.xlane.xlu0 %3918 }
0x2276   : > { %v3920_v29 = vmul.f32 0.03125, %v3919_v28 }
0x2278   : > { %v3921_v31 = vsub.f32 %v3914_v46, %v3920_v29 }
0x227a   : > { %v3922_v58 = vmul.f32 %v3921_v31, %v3921_v31 }
0x227c   : > { %v3923_v30 = vsel %vm313_vm1, %v3922_v58, 0.0 }
0x227d   : > { %3924 = vadd.xlane.f32.xlu1 %v3923_v30 }
0x2306   : > { %v3925_v56 = vpop.xlane.xlu1 %3924 }
0x2307   : > { %v3926_v32 = vmul.f32 0.03125, %v3925_v56 }
0x2309   : > { %v3927_v33 = vadd.f32 1e-05, %v3926_v32  ;;  %v5299_v32 = vld [vmem:[#allocation4 + $0x80] sm:$0xff]  }
0x230b   : > { %5433 = vrsqrt.f32 %v3927_v33  ;;  %v5300_v33 = vld [vmem:[#allocation4 + $0x78] sm:$0xff]  }
0x2318   : > { %v5434_v35 = vpop.eup %5433 }
0x2319   : > { %v3929_v37 = vmul.f32 %v5434_v35, %v3921_v31 }
0x231b   : > { %v3934_v19 = vmul.f32 %v4493_v36, %v3929_v37  ;;  %v4510_v37 = vld [vmem:[#allocation2 + $0x620] ss:$0 sm:$0xff] }
0x231d   : > { %v3939_v40 = vadd.f32 %v4494_v38, %v3934_v19  ;;  %v4511_v19 = vld [vmem:[#allocation2 + $0x630] ss:$0 sm:$0xff] }
0x231f   : > { %v4001_v41 = vadd.f32 %v4000_v39, %v3939_v40 }
0x2321   : > { %v4004_v42 = vsel %vm313_vm1, %v4001_v41, 0.0 }
0x2322   : > { %4005 = vadd.xlane.f32.xlu0 %v4004_v42  ;;  %v4512_v42 = vld [vmem:[#allocation2 + $0x110] ss:$0 sm:$0xff] }
0x23ab   : > { %v4006_v43 = vpop.xlane.xlu0 %4005 }
0x23ac   : > { %v4007_v44 = vmul.f32 0.03125, %v4006_v43 }
0x23ae   : > { %v4008_v47 = vsub.f32 %v4001_v41, %v4007_v44 }
0x23b0   : > { %v4009_v55 = vmul.f32 %v4008_v47, %v4008_v47 }
0x23b2   : > { %v4010_v10 = vsel %vm313_vm1, %v4009_v55, 0.0 }
0x23b3   : > { %4011 = vadd.xlane.f32.xlu0 %v4010_v10 }
0x243c   : > { %v4012_v1 = vpop.xlane.xlu0 %4011 }
0x243d   : > { %v4013_v4 = vmul.f32 0.03125, %v4012_v1 }
0x243f   : > { %v4014_v51 = vadd.f32 1e-05, %v4013_v4 }
0x2441   : > { %5435 = vrsqrt.f32 %v4014_v51 }
0x244e   : > { %v5436_v52 = vpop.eup %5435 }
0x244f   : > { %v4016_v54 = vmul.f32 %v5436_v52, %v4008_v47 }
0x2451   : > { %v4021_v60 = vmul.f32 %v4498_v53, %v4016_v54 }
0x2453   : > { %v4026_v48 = vadd.f32 %v4499_v59, %v4021_v60 }
0x2455   : > { %v4031_v61 = vpack.c.bf16 %v4026_v48, %v4026_v48 }
0x2457   : > { %5032 = vmatmul.mubr.msk.bf16.vlgmr.msra.gmra.mxu1 %vm313_vm1, %v4031_v61 }
0x2458   : > { %5051 = vmatprep.mubr.msk.bf16.mxu1 %vm5516_vm0, %v5515_v0  ;;  %5048 = vmatpush3.bf16.msra.mxu1 %v5299_v32 }
0x2459   : > { %5049 = vmatprep.subr.bf16.mxu1 %v5515_v0 }
0x245c   : > { %5050 = vmatpush3.bf16.msra.mxu1 %v5300_v33 }
0x2517   : > { %v4086_v6 = vpop.f32.mrf.mxu1 }
0x2518   : > { %v4087_v7 = vadd.f32 %v4500_v5, %v4086_v6 }
0x2519   : > { %v5033_v8 = vpop.f32.mrf.mxu1 }
0x251a   : > { %v4092_v9 = vmul.f32 %v4087_v7, %v4087_v7 }
0x251b   : > { %v4089_v11 = vpop.f32.mrf.mxu1 }
0x251c   : > { %v4093_v12 = vmul.f32 %v4092_v9, %v4087_v7 }
0x251d   : > { %v5034_v13 = vpop.f32.mrf.mxu1 }
0x251e   : > { %v4094_v14 = vmul.f32 0.044715, %v4093_v12 }
0x2520   : > { %v4095_v16 = vadd.f32 %v4094_v14, %v4087_v7 }
0x2522   : > { %v4096_v17 = vmul.f32 0.7978846, %v4095_v16 }
0x2524   : > { %5437 = vtanh.f32 %v4096_v17 }
0x2531   : > { %v5438_v18 = vpop.eup %5437 }
0x2532   : > { %v4098_v20 = vadd.f32 1.0, %v5438_v18 }
0x2534   : > { %v4099_v21 = vmul.f32 0.5, %v4098_v20 }
0x2536   : > { %v4100_v22 = vmul.f32 %v4099_v21, %v4087_v7 }
0x2538   : > { %v4109_v23 = vpack.c.bf16 %v4100_v22, %v4100_v22 }
0x253a   : > { %5044 = vmatmul.mubr.msk.bf16.vlgmr.msra.gmra.mxu0 %vm1372_vm14, %v4109_v23 }
0x25fa   : > { %v4176_v25 = vpop.f32.mrf.mxu0 }
0x25fb   : > { %v4177_v26 = vadd.f32 %v4504_v24, %v4176_v25 }
0x25fc   : > { %v5045_v46 = vpop.f32.mrf.mxu0 }
0x25fd   : > { %v4182_v45 = vadd.f32 %v4177_v26, %v4026_v48 }
0x25fe   : > { %v4179_v27 = vpop.f32.mrf.mxu0 }
0x25ff   : > { %v4185_v57 = vsel %vm313_vm1, %v4182_v45, 0.0 }
0x2600   : > { %4186 = vadd.xlane.f32.xlu1 %v4185_v57  ;;  %v5046_v28 = vpop.f32.mrf.mxu0 }
0x2689   : > { %v4187_v29 = vpop.xlane.xlu1 %4186 }
0x268a   : > { %v4188_v31 = vmul.f32 0.03125, %v4187_v29 }
0x268c   : > { %v4189_v58 = vsub.f32 %v4182_v45, %v4188_v31 }
0x268e   : > { %v4190_v30 = vmul.f32 %v4189_v58, %v4189_v58 }
0x2690   : > { %v4191_v56 = vsel %vm313_vm1, %v4190_v30, 0.0 }
0x2691   : > { %4192 = vadd.xlane.f32.xlu0 %v4191_v56 }
0x271a   : > { %v4193_v34 = vpop.xlane.xlu0 %4192 }
0x271b   : > { %v4194_v35 = vmul.f32 0.03125, %v4193_v34 }
0x271d   : > { %v4195_v36 = vadd.f32 1e-05, %v4194_v35 }
0x271f   : > { %5439 = vrsqrt.f32 %v4195_v36 }
0x272c   : > { %v5440_v15 = vpop.eup %5439 }
0x272d   : > { %v4197_v38 = vmul.f32 %v5440_v15, %v4189_v58 }
0x272f   : > { %v4202_v39 = vmul.f32 %v4510_v37, %v4197_v38 }
0x2731   : > { %v4207_v40 = vadd.f32 %v4511_v19, %v4202_v39 }
0x2733   : > { %v4212_v41 = vpack.c.bf16 %v4207_v40, %v4207_v40 }
0x2735   : > { %5052 = vmatmul.mubr.msk.bf16.vlgmr.msra.gmra.mxu1 %vm313_vm1, %v4212_v41 }
0x27f5   : > { %v4267_v0 = vpop.f32.mrf.mxu1 }
0x27f6   : > { %v4268_v43 = vadd.f32 %v4512_v42, %v4267_v0 }
0x27f7   : > { %v5053_v44 = vpop.f32.mrf.mxu1 }
0x27f8   : > { %4273 = vst [vmem:[%s236_s6] sm:$0xff] %v4268_v43 }
0x27f9   : > { %v4270_v47 = vpop.f32.mrf.mxu1 }
0x27fb   : > { %v5054_v55 = vpop.f32.mrf.mxu1 }
0x27fc PF: > { %s16_s15 = sadd.s32 1, %s5507_s15  }
0x27fd   : > { %p13_p2 = scmp.ge.s32.totalorder %s16_s15, 4  }
0x27ff   :  { %15 = sbr.rel (!%p13_p2) target bundleno = 2 (0x2), region = 78 }
0x2804   :  { %4293 = vsyncpa [#allocation3], 1 }
0x2805   :  { %4295 = vsyncpa [#allocation3 + $0x1], 1 }
0x2806   :  { %4296 = vsyncpa [#allocation5], 1 }

</bundles_post_ra>
